<compile_context>
chip_gen: v6e
topology: v6e:2x2x1
jax: 0.10.0
libtpu: 0.0.40
codegen_flags: <defaults>
</compile_context>

<pallas_src>
import functools
import math

import jax
import jax.numpy as jnp
import numpy as np
from jax.experimental import pallas as pl
from jax.experimental.pallas import tpu as pltpu


CFG = dict(chin=1, chout=1, hidden=8, depth=3, kernel_size=8, stride=4,
           causal=True, resample=1, growth=2, max_hidden=10000,
           normalize=True, glu=True, floor=1e-3)


# ------------------------------ shape planning ---------------------------------

def valid_length(length, cfg):
    depth, K, S, R = cfg["depth"], cfg["kernel_size"], cfg["stride"], cfg["resample"]
    length = math.ceil(length * R)
    for _ in range(depth):
        length = math.ceil((length - K) / S) + 1
        length = max(length, 1)
    for _ in range(depth):
        length = (length - 1) * S + K
    return int(math.ceil(length / R))


def _plan_time_lengths(cfg, length):
    """Per-encoder output lengths and per-decoder (ModuleList order) input lengths."""
    K, S, depth = cfg["kernel_size"], cfg["stride"], cfg["depth"]
    t_pad = valid_length(length, cfg)
    enc_T, t = [], t_pad
    for _ in range(depth):
        t = max((t - K) // S + 1, 1)
        enc_T.append(t)
    # mirror the reference forward's skip bookkeeping to get each decoder's T_in
    dec_T_in = []
    skips = list(enc_T)
    x_t = skips.pop(-1)
    for current in range(depth - 1):
        cur = [skips.pop(-1) for _ in range(current)]
        for st in cur:
            dec_T_in.append(st)
            skips.append((st - 1) * S + K)
        dec_T_in.append(x_t)
        x_t = (x_t - 1) * S + K
    dec_T_in.append(x_t)
    return t_pad, enc_T, dec_T_in


def _gather_mats(K, S, rows, t_out):
    """G[k, t, m] = 1 iff t == m*S + k (rows < the padded length act as zero-pad)."""
    g = np.zeros((K, rows, t_out), np.float32)
    m = np.arange(t_out)
    for k in range(K):
        t = m * S + k
        ok = t < rows
        g[k, t[ok], m[ok]] = 1.0
    return jnp.asarray(g, dtype=jnp.bfloat16)          # one-hot: exact in bf16


def _scatter_mats(K, S, t_in, t_full):
    """Sc[k, m, n] = 1 iff n == m*S + k (transposed-conv overlap-add operator)."""
    s = np.zeros((K, t_in, t_full), np.float32)
    m = np.arange(t_in)
    for k in range(K):
        s[k, m, m * S + k] = 1.0
    return jnp.asarray(s, dtype=jnp.bfloat16)


# ------------------------------ the fused kernel --------------------------------

def _forward_kernel(*refs, depth, dec_relu, floor, normalize, out_len):
    """Entire LU_net_plus forward for one batch element (grid axis = batch)."""
    mix_ref, o_ref = refs[0], refs[-1]
    prm = refs[1:-1]
    n_dec = len(dec_relu)
    enc_refs = [prm[5 * l: 5 * l + 5] for l in range(depth)]
    dec_refs = [prm[5 * depth + 5 * d: 5 * depth + 5 * d + 5] for d in range(n_dec)]

    bf16, f32 = jnp.bfloat16, jnp.float32

    x = mix_ref[0].astype(f32)                             # (chin, T)

    if normalize:
        mono = jnp.mean(x, axis=0, keepdims=True)          # (1, T)
        mu = jnp.mean(mono, axis=1, keepdims=True)
        var = jnp.sum((mono - mu) ** 2, axis=1, keepdims=True) / (mono.shape[1] - 1)
        std = jnp.sqrt(var)                                 # unbiased, like torch
        x = x / (floor + std)
    else:
        std = jnp.float32(1.0)

    def glu(z, h):
        return z[:h] * jax.nn.sigmoid(z[h:])

    def run_encoder(x, gsel_ref, w1_ref, b1_ref, w2_ref, b2_ref):
        cin = x.shape[0]
        kk = gsel_ref.shape[0]
        xb = x.astype(bf16)
        # Conv1d(cin, H, K, S): K exact selection matmuls -> one MXU matmul.
        pieces = [jnp.dot(xb, gsel_ref[k], preferred_element_type=f32)
                  for k in range(kk)]                       # each (cin, T_out)
        t_out = pieces[0].shape[1]
        if cin % 8 == 0:
            patches = jnp.concatenate([p.astype(bf16) for p in pieces], axis=0)
        else:
            # cin == 1 (raw audio): place the K single-row pieces with an iota
            # mask (VPU broadcast/select) to avoid unaligned sublane concat.
            row = jax.lax.broadcasted_iota(jnp.int32, (kk, t_out), 0)
            patches = jnp.zeros((kk * cin, t_out), f32)
            for k in range(kk):
                patches = patches + jnp.where(
                    row == k, jnp.broadcast_to(pieces[k], (kk, t_out)), 0.0)
            patches = patches.astype(bf16)
        h = jnp.dot(w1_ref[...], patches, preferred_element_type=f32) + b1_ref[...]
        h = jnp.maximum(h, 0.0)                             # ReLU, f32 epilogue
        z = jnp.dot(w2_ref[...], h.astype(bf16),
                    preferred_element_type=f32) + b2_ref[...]
        return glu(z, w1_ref.shape[0])                      # (H, T_out), f32

    def run_decoder(x, scat_ref, w1_ref, b1_ref, wt_ref, bt_ref, relu):
        hch = x.shape[0]
        kk = scat_ref.shape[0]
        z = jnp.dot(w1_ref[...], x.astype(bf16),
                    preferred_element_type=f32) + b1_ref[...]
        g = glu(z, hch).astype(bf16)                        # (H, T_in)
        # ConvTranspose1d: K exact scatter matmuls -> one MXU matmul.
        pieces = [jnp.dot(g, scat_ref[k], preferred_element_type=f32).astype(bf16)
                  for k in range(kk)]                       # each (H, T_full)
        gex = jnp.concatenate(pieces, axis=0)               # (K*H, T_full)
        out = jnp.dot(wt_ref[...], gex, preferred_element_type=f32) + bt_ref[...]
        if relu:
            out = jnp.maximum(out, 0.0)
        return out                                          # (Co, T_full), f32

    skips = []
    for l in range(depth):
        x = run_encoder(x, *enc_refs[l])
        skips.append(x)

    # NOTE: the reference forward runs a (Bi)LSTM here but immediately
    # overwrites its result with `x = skips.pop(-1)`; dead compute, omitted.
    x = skips.pop(-1)

    index = 0
    for current in range(depth - 1):
        current_skips = [skips.pop(-1) for _ in range(current)]
        total_skip = jnp.zeros_like(x)
        for skip in current_skips:
            total_skip = total_skip + skip[:, : x.shape[-1]]
            skips.append(run_decoder(skip, *dec_refs[index], dec_relu[index]))
            index += 1
        x = x + total_skip
        x = run_decoder(x, *dec_refs[index], dec_relu[index])
        index += 1

    total_skip = jnp.zeros_like(x)
    for skip in skips:
        total_skip = total_skip + skip[:, : x.shape[-1]]
    x = x + total_skip
    x = run_decoder(x, *dec_refs[index], dec_relu[index])   # last level: no ReLU

    o_ref[0] = (std * x[:, :out_len]).astype(o_ref.dtype)   # lane-dense f32 store


# ------------------------------ params & wrapper --------------------------------

def init_params(key, cfg):
    chin, chout, hidden = cfg["chin"], cfg["chout"], cfg["hidden"]
    depth, K = cfg["depth"], cfg["kernel_size"]
    growth, max_hidden = cfg["growth"], cfg["max_hidden"]

    levels = []
    ci, co, h = chin, chout, hidden
    for _ in range(depth):
        levels.append((ci, h, co))          # (in_ch, hidden_ch, decoder out_ch)
        co, ci = h, h
        h = min(int(growth * h), max_hidden)

    def w_init(k, shape, fan_in):
        return 0.5 * jax.random.normal(k, shape, jnp.float32) / math.sqrt(fan_in)

    n_dec = 1 + depth * (depth - 1) // 2
    keys = iter(jax.random.split(key, 4 * depth + 4 * n_dec))

    encoders = []
    for (ci, h, co) in levels:
        encoders.append(dict(
            w1=w_init(next(keys), (h, ci, K), ci * K),
            b1=w_init(next(keys), (h,), ci * K),
            w2=w_init(next(keys), (2 * h, h, 1), h),
            b2=w_init(next(keys), (2 * h,), h),
        ))

    # decoder ModuleList order produced by the repeated insert(0, ...) pattern
    dec_levels = []
    for i in range(depth - 1, 0, -1):
        dec_levels += [i] * (depth - i)
    dec_levels += [0]

    decoders = []
    for lvl in dec_levels:
        ci, h, co = levels[lvl]
        decoders.append(dict(
            w1=w_init(next(keys), (2 * h, h, 1), h),
            b1=w_init(next(keys), (2 * h,), h),
            wt=w_init(next(keys), (h, co, K), h),
            bt=w_init(next(keys), (co,), h),
            relu=(lvl > 0),                 # level-0 decoder has no trailing ReLU
        ))
    return dict(encoders=encoders, decoders=decoders)


def prepare_params(params, cfg):
    """One-time conversion to kernel-ready layouts (bf16 weights, f32 biases)."""
    assert cfg["glu"], "only the glu=True configuration is implemented"
    K = cfg["kernel_size"]

    enc = []
    for p in params["encoders"]:
        H, Cin, _ = p["w1"].shape
        enc.append(dict(
            # (H, Cin, K) -> (H, K*Cin): row order matches patches (k*Cin + c)
            w1=jnp.transpose(p["w1"], (0, 2, 1)).reshape(H, K * Cin).astype(jnp.bfloat16),
            b1=p["b1"].reshape(H, 1).astype(jnp.float32),
            w2=p["w2"][:, :, 0].astype(jnp.bfloat16),
            b2=p["b2"].reshape(2 * H, 1).astype(jnp.float32),
        ))

    dec = []
    for p in params["decoders"]:
        h2, h = p["w1"].shape[:2]
        _, co, _ = p["wt"].shape
        dec.append(dict(
            w1=p["w1"][:, :, 0].astype(jnp.bfloat16),
            b1=p["b1"].reshape(h2, 1).astype(jnp.float32),
            # (H, Co, K) -> (Co, K*H): column order matches gex rows (k*H + h)
            wt=jnp.transpose(p["wt"], (1, 2, 0)).reshape(co, K * h).astype(jnp.bfloat16),
            bt=p["bt"].reshape(co, 1).astype(jnp.float32),
            relu=bool(p["relu"]),
        ))
    return dict(encoders=enc, decoders=dec)


def make_forward(kparams, cfg):
    K, S, depth = cfg["kernel_size"], cfg["stride"], cfg["depth"]
    chout = cfg["chout"]
    dec_relu = tuple(p["relu"] for p in kparams["decoders"])

    @jax.jit
    def forward(mix):
        if mix.ndim == 2:
            mix = mix[:, None, :]
        mix = mix.astype(jnp.float32)
        B, cin, length = mix.shape
        _, enc_T, dec_T_in = _plan_time_lengths(cfg, length)

        flat = []
        in_specs = [pl.BlockSpec((1, cin, length), lambda b: (b, 0, 0))]

        def add(arr):
            flat.append(arr)
            in_specs.append(
                pl.BlockSpec(arr.shape, lambda b, _r=arr.ndim: (0,) * _r))

        for l, p in enumerate(kparams["encoders"]):
            rows = length if l == 0 else enc_T[l - 1]   # rows<pad => implicit zero-pad
            add(_gather_mats(K, S, rows, enc_T[l]))
            for name in ("w1", "b1", "w2", "b2"):
                add(p[name])
        for d, p in enumerate(kparams["decoders"]):
            t_in = dec_T_in[d]
            add(_scatter_mats(K, S, t_in, (t_in - 1) * S + K))
            for name in ("w1", "b1", "wt", "bt"):
                add(p[name])

        kern = functools.partial(
            _forward_kernel, depth=depth, dec_relu=dec_relu,
            floor=float(cfg["floor"]), normalize=bool(cfg["normalize"]),
            out_len=length)

        return pl.pallas_call(
            kern,
            out_shape=jax.ShapeDtypeStruct((B, chout, length), jnp.float32),
            grid=(B,),
            in_specs=in_specs,
            out_specs=pl.BlockSpec((1, chout, length), lambda b: (b, 0, 0)),
            compiler_params=pltpu.CompilerParams(
                dimension_semantics=("parallel",)),     # v7x: 2 TCs, one per batch
        )(mix, *flat)

    return forward


if __name__ == "__main__":
    key = jax.random.PRNGKey(0)
    k_param, k_data = jax.random.split(key)

    B, T = 2, 256
    mix = jax.random.normal(k_data, (B, T), dtype=jnp.float32)

    raw_params = init_params(k_param, CFG)
    kparams = prepare_params(raw_params, CFG)
    forward = make_forward(kparams, CFG)

    out = jax.block_until_ready(forward(mix))

    assert out.shape == (B, CFG["chout"], T), out.shape
    assert bool(jnp.all(jnp.isfinite(out)))
    print("KERNEL_OK")
</pallas_src>

<mosaic_0001>
module attributes {stable_mosaic.version = 11 : i64} {
  func.func @_forward_kernel(%arg0: i32, %arg1: memref<1x1x256xf32, #tpu.memory_space<vmem>>, %arg2: memref<8x256x68xbf16, #tpu.memory_space<vmem>>, %arg3: memref<8x8xbf16, #tpu.memory_space<vmem>>, %arg4: memref<8x1xf32, #tpu.memory_space<vmem>>, %arg5: memref<16x8xbf16, #tpu.memory_space<vmem>>, %arg6: memref<16x1xf32, #tpu.memory_space<vmem>>, %arg7: memref<8x68x16xbf16, #tpu.memory_space<vmem>>, %arg8: memref<16x64xbf16, #tpu.memory_space<vmem>>, %arg9: memref<16x1xf32, #tpu.memory_space<vmem>>, %arg10: memref<32x16xbf16, #tpu.memory_space<vmem>>, %arg11: memref<32x1xf32, #tpu.memory_space<vmem>>, %arg12: memref<8x16x3xbf16, #tpu.memory_space<vmem>>, %arg13: memref<32x128xbf16, #tpu.memory_space<vmem>>, %arg14: memref<32x1xf32, #tpu.memory_space<vmem>>, %arg15: memref<64x32xbf16, #tpu.memory_space<vmem>>, %arg16: memref<64x1xf32, #tpu.memory_space<vmem>>, %arg17: memref<8x3x16xbf16, #tpu.memory_space<vmem>>, %arg18: memref<64x32xbf16, #tpu.memory_space<vmem>>, %arg19: memref<64x1xf32, #tpu.memory_space<vmem>>, %arg20: memref<16x256xbf16, #tpu.memory_space<vmem>>, %arg21: memref<16x1xf32, #tpu.memory_space<vmem>>, %arg22: memref<8x16x68xbf16, #tpu.memory_space<vmem>>, %arg23: memref<32x16xbf16, #tpu.memory_space<vmem>>, %arg24: memref<32x1xf32, #tpu.memory_space<vmem>>, %arg25: memref<8x128xbf16, #tpu.memory_space<vmem>>, %arg26: memref<8x1xf32, #tpu.memory_space<vmem>>, %arg27: memref<8x16x68xbf16, #tpu.memory_space<vmem>>, %arg28: memref<32x16xbf16, #tpu.memory_space<vmem>>, %arg29: memref<32x1xf32, #tpu.memory_space<vmem>>, %arg30: memref<8x128xbf16, #tpu.memory_space<vmem>>, %arg31: memref<8x1xf32, #tpu.memory_space<vmem>>, %arg32: memref<8x68x276xbf16, #tpu.memory_space<vmem>>, %arg33: memref<16x8xbf16, #tpu.memory_space<vmem>>, %arg34: memref<16x1xf32, #tpu.memory_space<vmem>>, %arg35: memref<1x64xbf16, #tpu.memory_space<vmem>>, %arg36: memref<1x1xf32, #tpu.memory_space<vmem>>, %arg37: memref<1x1x256xf32, #tpu.memory_space<vmem>>) attributes {dimension_semantics = [#tpu.dimension_semantics<parallel>], iteration_bounds = array<i64: 2>, scalar_prefetch = 0 : i64, scratch_operands = 0 : i64, tpu.core_type = #tpu.core_type<tc>, window_params = [{transform_indices = @transform_0, window_bounds = array<i64: 1, 1, 256>}, {pipeline_mode = #tpu.pipeline_mode<synchronous>, transform_indices = @transform_1, window_bounds = array<i64: 8, 256, 68>}, {pipeline_mode = #tpu.pipeline_mode<synchronous>, transform_indices = @transform_2, window_bounds = array<i64: 8, 8>}, {pipeline_mode = #tpu.pipeline_mode<synchronous>, transform_indices = @transform_3, window_bounds = array<i64: 8, 1>}, {pipeline_mode = #tpu.pipeline_mode<synchronous>, transform_indices = @transform_4, window_bounds = array<i64: 16, 8>}, {pipeline_mode = #tpu.pipeline_mode<synchronous>, transform_indices = @transform_5, window_bounds = array<i64: 16, 1>}, {pipeline_mode = #tpu.pipeline_mode<synchronous>, transform_indices = @transform_6, window_bounds = array<i64: 8, 68, 16>}, {pipeline_mode = #tpu.pipeline_mode<synchronous>, transform_indices = @transform_7, window_bounds = array<i64: 16, 64>}, {pipeline_mode = #tpu.pipeline_mode<synchronous>, transform_indices = @transform_8, window_bounds = array<i64: 16, 1>}, {pipeline_mode = #tpu.pipeline_mode<synchronous>, transform_indices = @transform_9, window_bounds = array<i64: 32, 16>}, {pipeline_mode = #tpu.pipeline_mode<synchronous>, transform_indices = @transform_10, window_bounds = array<i64: 32, 1>}, {pipeline_mode = #tpu.pipeline_mode<synchronous>, transform_indices = @transform_11, window_bounds = array<i64: 8, 16, 3>}, {pipeline_mode = #tpu.pipeline_mode<synchronous>, transform_indices = @transform_12, window_bounds = array<i64: 32, 128>}, {pipeline_mode = #tpu.pipeline_mode<synchronous>, transform_indices = @transform_13, window_bounds = array<i64: 32, 1>}, {pipeline_mode = #tpu.pipeline_mode<synchronous>, transform_indices = @transform_14, window_bounds = array<i64: 64, 32>}, {pipeline_mode = #tpu.pipeline_mode<synchronous>, transform_indices = @transform_15, window_bounds = array<i64: 64, 1>}, {pipeline_mode = #tpu.pipeline_mode<synchronous>, transform_indices = @transform_16, window_bounds = array<i64: 8, 3, 16>}, {pipeline_mode = #tpu.pipeline_mode<synchronous>, transform_indices = @transform_17, window_bounds = array<i64: 64, 32>}, {pipeline_mode = #tpu.pipeline_mode<synchronous>, transform_indices = @transform_18, window_bounds = array<i64: 64, 1>}, {pipeline_mode = #tpu.pipeline_mode<synchronous>, transform_indices = @transform_19, window_bounds = array<i64: 16, 256>}, {pipeline_mode = #tpu.pipeline_mode<synchronous>, transform_indices = @transform_20, window_bounds = array<i64: 16, 1>}, {pipeline_mode = #tpu.pipeline_mode<synchronous>, transform_indices = @transform_21, window_bounds = array<i64: 8, 16, 68>}, {pipeline_mode = #tpu.pipeline_mode<synchronous>, transform_indices = @transform_22, window_bounds = array<i64: 32, 16>}, {pipeline_mode = #tpu.pipeline_mode<synchronous>, transform_indices = @transform_23, window_bounds = array<i64: 32, 1>}, {pipeline_mode = #tpu.pipeline_mode<synchronous>, transform_indices = @transform_24, window_bounds = array<i64: 8, 128>}, {pipeline_mode = #tpu.pipeline_mode<synchronous>, transform_indices = @transform_25, window_bounds = array<i64: 8, 1>}, {pipeline_mode = #tpu.pipeline_mode<synchronous>, transform_indices = @transform_26, window_bounds = array<i64: 8, 16, 68>}, {pipeline_mode = #tpu.pipeline_mode<synchronous>, transform_indices = @transform_27, window_bounds = array<i64: 32, 16>}, {pipeline_mode = #tpu.pipeline_mode<synchronous>, transform_indices = @transform_28, window_bounds = array<i64: 32, 1>}, {pipeline_mode = #tpu.pipeline_mode<synchronous>, transform_indices = @transform_29, window_bounds = array<i64: 8, 128>}, {pipeline_mode = #tpu.pipeline_mode<synchronous>, transform_indices = @transform_30, window_bounds = array<i64: 8, 1>}, {pipeline_mode = #tpu.pipeline_mode<synchronous>, transform_indices = @transform_31, window_bounds = array<i64: 8, 68, 276>}, {pipeline_mode = #tpu.pipeline_mode<synchronous>, transform_indices = @transform_32, window_bounds = array<i64: 16, 8>}, {pipeline_mode = #tpu.pipeline_mode<synchronous>, transform_indices = @transform_33, window_bounds = array<i64: 16, 1>}, {pipeline_mode = #tpu.pipeline_mode<synchronous>, transform_indices = @transform_34, window_bounds = array<i64: 1, 64>}, {pipeline_mode = #tpu.pipeline_mode<synchronous>, transform_indices = @transform_35, window_bounds = array<i64: 1, 1>}, {transform_indices = @transform_36, window_bounds = array<i64: 1, 1, 256>}]} {
    %c0 = arith.constant 0 : index
    %c0_0 = arith.constant 0 : index
    %c0_1 = arith.constant 0 : index
    %0 = vector.load %arg1[%c0, %c0_0, %c0_1] : memref<1x1x256xf32, #tpu.memory_space<vmem>>, vector<1x1x256xf32>
    %1 = vector.shape_cast %0 : vector<1x1x256xf32> to vector<1x256xf32>
    %cst = arith.constant dense<0.000000e+00> : vector<256xf32>
    %2 = vector.multi_reduction <add>, %1, %cst [0] : vector<1x256xf32> to vector<256xf32>
    %3 = vector.shape_cast %2 : vector<256xf32> to vector<1x256xf32>
    %cst_2 = arith.constant 1.000000e+00 : f32
    %4 = vector.broadcast %cst_2 : f32 to vector<1x256xf32>
    %5 = arith.divf %3, %4 : vector<1x256xf32>
    %cst_3 = arith.constant dense<0.000000e+00> : vector<1xf32>
    %6 = vector.multi_reduction <add>, %5, %cst_3 [1] : vector<1x256xf32> to vector<1xf32>
    %7 = vector.shape_cast %6 : vector<1xf32> to vector<1x1xf32>
    %cst_4 = arith.constant 2.560000e+02 : f32
    %8 = vector.broadcast %cst_4 : f32 to vector<1x1xf32>
    %9 = arith.divf %7, %8 : vector<1x1xf32>
    %10 = vector.broadcast %9 : vector<1x1xf32> to vector<1x256xf32>
    %11 = arith.subf %5, %10 : vector<1x256xf32>
    %12 = arith.mulf %11, %11 : vector<1x256xf32>
    %cst_5 = arith.constant dense<0.000000e+00> : vector<1xf32>
    %13 = vector.multi_reduction <add>, %12, %cst_5 [1] : vector<1x256xf32> to vector<1xf32>
    %14 = vector.shape_cast %13 : vector<1xf32> to vector<1x1xf32>
    %cst_6 = arith.constant 2.550000e+02 : f32
    %15 = vector.broadcast %cst_6 : f32 to vector<1x1xf32>
    %16 = arith.divf %14, %15 : vector<1x1xf32>
    %17 = math.sqrt %16 : vector<1x1xf32>
    %cst_7 = arith.constant 1.000000e-03 : f32
    %18 = vector.broadcast %cst_7 : f32 to vector<1x1xf32>
    %19 = arith.addf %18, %17 : vector<1x1xf32>
    %20 = vector.broadcast %19 : vector<1x1xf32> to vector<1x256xf32>
    %21 = arith.divf %1, %20 : vector<1x256xf32>
    %22 = arith.truncf %21 : vector<1x256xf32> to vector<1x256xbf16>
    %c0_8 = arith.constant 0 : index
    %c0_9 = arith.constant 0 : index
    %c0_10 = arith.constant 0 : index
    %23 = vector.load %arg2[%c0_8, %c0_9, %c0_10] : memref<8x256x68xbf16, #tpu.memory_space<vmem>>, vector<1x256x68xbf16>
    %24 = vector.shape_cast %23 : vector<1x256x68xbf16> to vector<256x68xbf16>
    %cst_11 = arith.constant dense<0.000000e+00> : vector<1x68xf32>
    %25 = tpu.matmul %22, %24, %cst_11 {dimension_numbers = #tpu.dot_dimension_numbers<[1], [0], [0], [1], [0, 0, 1, 1], [], []>} : vector<1x256xbf16>, vector<256x68xbf16>, vector<1x68xf32> -> vector<1x68xf32>
    %c1 = arith.constant 1 : index
    %c0_12 = arith.constant 0 : index
    %c0_13 = arith.constant 0 : index
    %26 = vector.load %arg2[%c1, %c0_12, %c0_13] : memref<8x256x68xbf16, #tpu.memory_space<vmem>>, vector<1x256x68xbf16>
    %27 = vector.shape_cast %26 : vector<1x256x68xbf16> to vector<256x68xbf16>
    %cst_14 = arith.constant dense<0.000000e+00> : vector<1x68xf32>
    %28 = tpu.matmul %22, %27, %cst_14 {dimension_numbers = #tpu.dot_dimension_numbers<[1], [0], [0], [1], [0, 0, 1, 1], [], []>} : vector<1x256xbf16>, vector<256x68xbf16>, vector<1x68xf32> -> vector<1x68xf32>
    %c2 = arith.constant 2 : index
    %c0_15 = arith.constant 0 : index
    %c0_16 = arith.constant 0 : index
    %29 = vector.load %arg2[%c2, %c0_15, %c0_16] : memref<8x256x68xbf16, #tpu.memory_space<vmem>>, vector<1x256x68xbf16>
    %30 = vector.shape_cast %29 : vector<1x256x68xbf16> to vector<256x68xbf16>
    %cst_17 = arith.constant dense<0.000000e+00> : vector<1x68xf32>
    %31 = tpu.matmul %22, %30, %cst_17 {dimension_numbers = #tpu.dot_dimension_numbers<[1], [0], [0], [1], [0, 0, 1, 1], [], []>} : vector<1x256xbf16>, vector<256x68xbf16>, vector<1x68xf32> -> vector<1x68xf32>
    %c3 = arith.constant 3 : index
    %c0_18 = arith.constant 0 : index
    %c0_19 = arith.constant 0 : index
    %32 = vector.load %arg2[%c3, %c0_18, %c0_19] : memref<8x256x68xbf16, #tpu.memory_space<vmem>>, vector<1x256x68xbf16>
    %33 = vector.shape_cast %32 : vector<1x256x68xbf16> to vector<256x68xbf16>
    %cst_20 = arith.constant dense<0.000000e+00> : vector<1x68xf32>
    %34 = tpu.matmul %22, %33, %cst_20 {dimension_numbers = #tpu.dot_dimension_numbers<[1], [0], [0], [1], [0, 0, 1, 1], [], []>} : vector<1x256xbf16>, vector<256x68xbf16>, vector<1x68xf32> -> vector<1x68xf32>
    %c4 = arith.constant 4 : index
    %c0_21 = arith.constant 0 : index
    %c0_22 = arith.constant 0 : index
    %35 = vector.load %arg2[%c4, %c0_21, %c0_22] : memref<8x256x68xbf16, #tpu.memory_space<vmem>>, vector<1x256x68xbf16>
    %36 = vector.shape_cast %35 : vector<1x256x68xbf16> to vector<256x68xbf16>
    %cst_23 = arith.constant dense<0.000000e+00> : vector<1x68xf32>
    %37 = tpu.matmul %22, %36, %cst_23 {dimension_numbers = #tpu.dot_dimension_numbers<[1], [0], [0], [1], [0, 0, 1, 1], [], []>} : vector<1x256xbf16>, vector<256x68xbf16>, vector<1x68xf32> -> vector<1x68xf32>
    %c5 = arith.constant 5 : index
    %c0_24 = arith.constant 0 : index
    %c0_25 = arith.constant 0 : index
    %38 = vector.load %arg2[%c5, %c0_24, %c0_25] : memref<8x256x68xbf16, #tpu.memory_space<vmem>>, vector<1x256x68xbf16>
    %39 = vector.shape_cast %38 : vector<1x256x68xbf16> to vector<256x68xbf16>
    %cst_26 = arith.constant dense<0.000000e+00> : vector<1x68xf32>
    %40 = tpu.matmul %22, %39, %cst_26 {dimension_numbers = #tpu.dot_dimension_numbers<[1], [0], [0], [1], [0, 0, 1, 1], [], []>} : vector<1x256xbf16>, vector<256x68xbf16>, vector<1x68xf32> -> vector<1x68xf32>
    %c6 = arith.constant 6 : index
    %c0_27 = arith.constant 0 : index
    %c0_28 = arith.constant 0 : index
    %41 = vector.load %arg2[%c6, %c0_27, %c0_28] : memref<8x256x68xbf16, #tpu.memory_space<vmem>>, vector<1x256x68xbf16>
    %42 = vector.shape_cast %41 : vector<1x256x68xbf16> to vector<256x68xbf16>
    %cst_29 = arith.constant dense<0.000000e+00> : vector<1x68xf32>
    %43 = tpu.matmul %22, %42, %cst_29 {dimension_numbers = #tpu.dot_dimension_numbers<[1], [0], [0], [1], [0, 0, 1, 1], [], []>} : vector<1x256xbf16>, vector<256x68xbf16>, vector<1x68xf32> -> vector<1x68xf32>
    %c7 = arith.constant 7 : index
    %c0_30 = arith.constant 0 : index
    %c0_31 = arith.constant 0 : index
    %44 = vector.load %arg2[%c7, %c0_30, %c0_31] : memref<8x256x68xbf16, #tpu.memory_space<vmem>>, vector<1x256x68xbf16>
    %45 = vector.shape_cast %44 : vector<1x256x68xbf16> to vector<256x68xbf16>
    %cst_32 = arith.constant dense<0.000000e+00> : vector<1x68xf32>
    %46 = tpu.matmul %22, %45, %cst_32 {dimension_numbers = #tpu.dot_dimension_numbers<[1], [0], [0], [1], [0, 0, 1, 1], [], []>} : vector<1x256xbf16>, vector<256x68xbf16>, vector<1x68xf32> -> vector<1x68xf32>
    %47 = tpu.iota {dimensions = array<i32: 0>} : vector<8x68xi32>
    %cst_33 = arith.constant 0.000000e+00 : f32
    %48 = vector.broadcast %cst_33 : f32 to vector<8x68xf32>
    %c0_i32 = arith.constant 0 : i32
    %49 = vector.broadcast %c0_i32 : i32 to vector<8x68xi32>
    %50 = arith.cmpi eq, %47, %49 : vector<8x68xi32>
    %51 = vector.shape_cast %25 : vector<1x68xf32> to vector<1x68xf32>
    %52 = vector.broadcast %51 : vector<1x68xf32> to vector<8x68xf32>
    %cst_34 = arith.constant 0.000000e+00 : f32
    %53 = vector.broadcast %cst_34 : f32 to vector<8x68xf32>
    %54 = arith.select %50, %52, %53 : vector<8x68xi1>, vector<8x68xf32>
    %55 = arith.addf %48, %54 : vector<8x68xf32>
    %c1_i32 = arith.constant 1 : i32
    %56 = vector.broadcast %c1_i32 : i32 to vector<8x68xi32>
    %57 = arith.cmpi eq, %47, %56 : vector<8x68xi32>
    %58 = vector.shape_cast %28 : vector<1x68xf32> to vector<1x68xf32>
    %59 = vector.broadcast %58 : vector<1x68xf32> to vector<8x68xf32>
    %cst_35 = arith.constant 0.000000e+00 : f32
    %60 = vector.broadcast %cst_35 : f32 to vector<8x68xf32>
    %61 = arith.select %57, %59, %60 : vector<8x68xi1>, vector<8x68xf32>
    %62 = arith.addf %55, %61 : vector<8x68xf32>
    %c2_i32 = arith.constant 2 : i32
    %63 = vector.broadcast %c2_i32 : i32 to vector<8x68xi32>
    %64 = arith.cmpi eq, %47, %63 : vector<8x68xi32>
    %65 = vector.shape_cast %31 : vector<1x68xf32> to vector<1x68xf32>
    %66 = vector.broadcast %65 : vector<1x68xf32> to vector<8x68xf32>
    %cst_36 = arith.constant 0.000000e+00 : f32
    %67 = vector.broadcast %cst_36 : f32 to vector<8x68xf32>
    %68 = arith.select %64, %66, %67 : vector<8x68xi1>, vector<8x68xf32>
    %69 = arith.addf %62, %68 : vector<8x68xf32>
    %c3_i32 = arith.constant 3 : i32
    %70 = vector.broadcast %c3_i32 : i32 to vector<8x68xi32>
    %71 = arith.cmpi eq, %47, %70 : vector<8x68xi32>
    %72 = vector.shape_cast %34 : vector<1x68xf32> to vector<1x68xf32>
    %73 = vector.broadcast %72 : vector<1x68xf32> to vector<8x68xf32>
    %cst_37 = arith.constant 0.000000e+00 : f32
    %74 = vector.broadcast %cst_37 : f32 to vector<8x68xf32>
    %75 = arith.select %71, %73, %74 : vector<8x68xi1>, vector<8x68xf32>
    %76 = arith.addf %69, %75 : vector<8x68xf32>
    %c4_i32 = arith.constant 4 : i32
    %77 = vector.broadcast %c4_i32 : i32 to vector<8x68xi32>
    %78 = arith.cmpi eq, %47, %77 : vector<8x68xi32>
    %79 = vector.shape_cast %37 : vector<1x68xf32> to vector<1x68xf32>
    %80 = vector.broadcast %79 : vector<1x68xf32> to vector<8x68xf32>
    %cst_38 = arith.constant 0.000000e+00 : f32
    %81 = vector.broadcast %cst_38 : f32 to vector<8x68xf32>
    %82 = arith.select %78, %80, %81 : vector<8x68xi1>, vector<8x68xf32>
    %83 = arith.addf %76, %82 : vector<8x68xf32>
    %c5_i32 = arith.constant 5 : i32
    %84 = vector.broadcast %c5_i32 : i32 to vector<8x68xi32>
    %85 = arith.cmpi eq, %47, %84 : vector<8x68xi32>
    %86 = vector.shape_cast %40 : vector<1x68xf32> to vector<1x68xf32>
    %87 = vector.broadcast %86 : vector<1x68xf32> to vector<8x68xf32>
    %cst_39 = arith.constant 0.000000e+00 : f32
    %88 = vector.broadcast %cst_39 : f32 to vector<8x68xf32>
    %89 = arith.select %85, %87, %88 : vector<8x68xi1>, vector<8x68xf32>
    %90 = arith.addf %83, %89 : vector<8x68xf32>
    %c6_i32 = arith.constant 6 : i32
    %91 = vector.broadcast %c6_i32 : i32 to vector<8x68xi32>
    %92 = arith.cmpi eq, %47, %91 : vector<8x68xi32>
    %93 = vector.shape_cast %43 : vector<1x68xf32> to vector<1x68xf32>
    %94 = vector.broadcast %93 : vector<1x68xf32> to vector<8x68xf32>
    %cst_40 = arith.constant 0.000000e+00 : f32
    %95 = vector.broadcast %cst_40 : f32 to vector<8x68xf32>
    %96 = arith.select %92, %94, %95 : vector<8x68xi1>, vector<8x68xf32>
    %97 = arith.addf %90, %96 : vector<8x68xf32>
    %c7_i32 = arith.constant 7 : i32
    %98 = vector.broadcast %c7_i32 : i32 to vector<8x68xi32>
    %99 = arith.cmpi eq, %47, %98 : vector<8x68xi32>
    %100 = vector.shape_cast %46 : vector<1x68xf32> to vector<1x68xf32>
    %101 = vector.broadcast %100 : vector<1x68xf32> to vector<8x68xf32>
    %cst_41 = arith.constant 0.000000e+00 : f32
    %102 = vector.broadcast %cst_41 : f32 to vector<8x68xf32>
    %103 = arith.select %99, %101, %102 : vector<8x68xi1>, vector<8x68xf32>
    %104 = arith.addf %97, %103 : vector<8x68xf32>
    %105 = arith.truncf %104 : vector<8x68xf32> to vector<8x68xbf16>
    %c0_42 = arith.constant 0 : index
    %c0_43 = arith.constant 0 : index
    %106 = vector.load %arg3[%c0_42, %c0_43] : memref<8x8xbf16, #tpu.memory_space<vmem>>, vector<8x8xbf16>
    %cst_44 = arith.constant dense<0.000000e+00> : vector<8x68xf32>
    %107 = tpu.matmul %106, %105, %cst_44 {dimension_numbers = #tpu.dot_dimension_numbers<[1], [0], [0], [1], [0, 0, 1, 1], [], []>} : vector<8x8xbf16>, vector<8x68xbf16>, vector<8x68xf32> -> vector<8x68xf32>
    %c0_45 = arith.constant 0 : index
    %c0_46 = arith.constant 0 : index
    %108 = vector.load %arg4[%c0_45, %c0_46] : memref<8x1xf32, #tpu.memory_space<vmem>>, vector<8x1xf32>
    %109 = vector.broadcast %108 : vector<8x1xf32> to vector<8x68xf32>
    %110 = arith.addf %107, %109 : vector<8x68xf32>
    %cst_47 = arith.constant 0.000000e+00 : f32
    %111 = vector.broadcast %cst_47 : f32 to vector<8x68xf32>
    %112 = arith.maximumf %110, %111 : vector<8x68xf32>
    %c0_48 = arith.constant 0 : index
    %c0_49 = arith.constant 0 : index
    %113 = vector.load %arg5[%c0_48, %c0_49] : memref<16x8xbf16, #tpu.memory_space<vmem>>, vector<16x8xbf16>
    %114 = arith.truncf %112 : vector<8x68xf32> to vector<8x68xbf16>
    %cst_50 = arith.constant dense<0.000000e+00> : vector<16x68xf32>
    %115 = tpu.matmul %113, %114, %cst_50 {dimension_numbers = #tpu.dot_dimension_numbers<[1], [0], [0], [1], [0, 0, 1, 1], [], []>} : vector<16x8xbf16>, vector<8x68xbf16>, vector<16x68xf32> -> vector<16x68xf32>
    %c0_51 = arith.constant 0 : index
    %c0_52 = arith.constant 0 : index
    %116 = vector.load %arg6[%c0_51, %c0_52] : memref<16x1xf32, #tpu.memory_space<vmem>>, vector<16x1xf32>
    %117 = vector.broadcast %116 : vector<16x1xf32> to vector<16x68xf32>
    %118 = arith.addf %115, %117 : vector<16x68xf32>
    %119 = vector.extract_strided_slice %118 {offsets = [0, 0], sizes = [8, 68], strides = [1, 1]} : vector<16x68xf32> to vector<8x68xf32>
    %120 = vector.extract_strided_slice %118 {offsets = [8, 0], sizes = [8, 68], strides = [1, 1]} : vector<16x68xf32> to vector<8x68xf32>
    %121 = arith.negf %120 : vector<8x68xf32>
    %122 = math.exp %121 : vector<8x68xf32>
    %cst_53 = arith.constant 1.000000e+00 : f32
    %123 = vector.broadcast %cst_53 : f32 to vector<8x68xf32>
    %124 = arith.addf %123, %122 : vector<8x68xf32>
    %125 = arith.divf %123, %124 : vector<8x68xf32>
    %126 = arith.mulf %119, %125 : vector<8x68xf32>
    %127 = arith.truncf %126 : vector<8x68xf32> to vector<8x68xbf16>
    %c0_54 = arith.constant 0 : index
    %c0_55 = arith.constant 0 : index
    %c0_56 = arith.constant 0 : index
    %128 = vector.load %arg7[%c0_54, %c0_55, %c0_56] : memref<8x68x16xbf16, #tpu.memory_space<vmem>>, vector<1x68x16xbf16>
    %129 = vector.shape_cast %128 : vector<1x68x16xbf16> to vector<68x16xbf16>
    %cst_57 = arith.constant dense<0.000000e+00> : vector<8x16xf32>
    %130 = tpu.matmul %127, %129, %cst_57 {dimension_numbers = #tpu.dot_dimension_numbers<[1], [0], [0], [1], [0, 0, 1, 1], [], []>} : vector<8x68xbf16>, vector<68x16xbf16>, vector<8x16xf32> -> vector<8x16xf32>
    %c1_58 = arith.constant 1 : index
    %c0_59 = arith.constant 0 : index
    %c0_60 = arith.constant 0 : index
    %131 = vector.load %arg7[%c1_58, %c0_59, %c0_60] : memref<8x68x16xbf16, #tpu.memory_space<vmem>>, vector<1x68x16xbf16>
    %132 = vector.shape_cast %131 : vector<1x68x16xbf16> to vector<68x16xbf16>
    %cst_61 = arith.constant dense<0.000000e+00> : vector<8x16xf32>
    %133 = tpu.matmul %127, %132, %cst_61 {dimension_numbers = #tpu.dot_dimension_numbers<[1], [0], [0], [1], [0, 0, 1, 1], [], []>} : vector<8x68xbf16>, vector<68x16xbf16>, vector<8x16xf32> -> vector<8x16xf32>
    %c2_62 = arith.constant 2 : index
    %c0_63 = arith.constant 0 : index
    %c0_64 = arith.constant 0 : index
    %134 = vector.load %arg7[%c2_62, %c0_63, %c0_64] : memref<8x68x16xbf16, #tpu.memory_space<vmem>>, vector<1x68x16xbf16>
    %135 = vector.shape_cast %134 : vector<1x68x16xbf16> to vector<68x16xbf16>
    %cst_65 = arith.constant dense<0.000000e+00> : vector<8x16xf32>
    %136 = tpu.matmul %127, %135, %cst_65 {dimension_numbers = #tpu.dot_dimension_numbers<[1], [0], [0], [1], [0, 0, 1, 1], [], []>} : vector<8x68xbf16>, vector<68x16xbf16>, vector<8x16xf32> -> vector<8x16xf32>
    %c3_66 = arith.constant 3 : index
    %c0_67 = arith.constant 0 : index
    %c0_68 = arith.constant 0 : index
    %137 = vector.load %arg7[%c3_66, %c0_67, %c0_68] : memref<8x68x16xbf16, #tpu.memory_space<vmem>>, vector<1x68x16xbf16>
    %138 = vector.shape_cast %137 : vector<1x68x16xbf16> to vector<68x16xbf16>
    %cst_69 = arith.constant dense<0.000000e+00> : vector<8x16xf32>
    %139 = tpu.matmul %127, %138, %cst_69 {dimension_numbers = #tpu.dot_dimension_numbers<[1], [0], [0], [1], [0, 0, 1, 1], [], []>} : vector<8x68xbf16>, vector<68x16xbf16>, vector<8x16xf32> -> vector<8x16xf32>
    %c4_70 = arith.constant 4 : index
    %c0_71 = arith.constant 0 : index
    %c0_72 = arith.constant 0 : index
    %140 = vector.load %arg7[%c4_70, %c0_71, %c0_72] : memref<8x68x16xbf16, #tpu.memory_space<vmem>>, vector<1x68x16xbf16>
    %141 = vector.shape_cast %140 : vector<1x68x16xbf16> to vector<68x16xbf16>
    %cst_73 = arith.constant dense<0.000000e+00> : vector<8x16xf32>
    %142 = tpu.matmul %127, %141, %cst_73 {dimension_numbers = #tpu.dot_dimension_numbers<[1], [0], [0], [1], [0, 0, 1, 1], [], []>} : vector<8x68xbf16>, vector<68x16xbf16>, vector<8x16xf32> -> vector<8x16xf32>
    %c5_74 = arith.constant 5 : index
    %c0_75 = arith.constant 0 : index
    %c0_76 = arith.constant 0 : index
    %143 = vector.load %arg7[%c5_74, %c0_75, %c0_76] : memref<8x68x16xbf16, #tpu.memory_space<vmem>>, vector<1x68x16xbf16>
    %144 = vector.shape_cast %143 : vector<1x68x16xbf16> to vector<68x16xbf16>
    %cst_77 = arith.constant dense<0.000000e+00> : vector<8x16xf32>
    %145 = tpu.matmul %127, %144, %cst_77 {dimension_numbers = #tpu.dot_dimension_numbers<[1], [0], [0], [1], [0, 0, 1, 1], [], []>} : vector<8x68xbf16>, vector<68x16xbf16>, vector<8x16xf32> -> vector<8x16xf32>
    %c6_78 = arith.constant 6 : index
    %c0_79 = arith.constant 0 : index
    %c0_80 = arith.constant 0 : index
    %146 = vector.load %arg7[%c6_78, %c0_79, %c0_80] : memref<8x68x16xbf16, #tpu.memory_space<vmem>>, vector<1x68x16xbf16>
    %147 = vector.shape_cast %146 : vector<1x68x16xbf16> to vector<68x16xbf16>
    %cst_81 = arith.constant dense<0.000000e+00> : vector<8x16xf32>
    %148 = tpu.matmul %127, %147, %cst_81 {dimension_numbers = #tpu.dot_dimension_numbers<[1], [0], [0], [1], [0, 0, 1, 1], [], []>} : vector<8x68xbf16>, vector<68x16xbf16>, vector<8x16xf32> -> vector<8x16xf32>
    %c7_82 = arith.constant 7 : index
    %c0_83 = arith.constant 0 : index
    %c0_84 = arith.constant 0 : index
    %149 = vector.load %arg7[%c7_82, %c0_83, %c0_84] : memref<8x68x16xbf16, #tpu.memory_space<vmem>>, vector<1x68x16xbf16>
    %150 = vector.shape_cast %149 : vector<1x68x16xbf16> to vector<68x16xbf16>
    %cst_85 = arith.constant dense<0.000000e+00> : vector<8x16xf32>
    %151 = tpu.matmul %127, %150, %cst_85 {dimension_numbers = #tpu.dot_dimension_numbers<[1], [0], [0], [1], [0, 0, 1, 1], [], []>} : vector<8x68xbf16>, vector<68x16xbf16>, vector<8x16xf32> -> vector<8x16xf32>
    %152 = arith.truncf %130 : vector<8x16xf32> to vector<8x16xbf16>
    %153 = arith.truncf %133 : vector<8x16xf32> to vector<8x16xbf16>
    %154 = arith.truncf %136 : vector<8x16xf32> to vector<8x16xbf16>
    %155 = arith.truncf %139 : vector<8x16xf32> to vector<8x16xbf16>
    %156 = arith.truncf %142 : vector<8x16xf32> to vector<8x16xbf16>
    %157 = arith.truncf %145 : vector<8x16xf32> to vector<8x16xbf16>
    %158 = arith.truncf %148 : vector<8x16xf32> to vector<8x16xbf16>
    %159 = arith.truncf %151 : vector<8x16xf32> to vector<8x16xbf16>
    %160 = tpu.concatenate %152, %153, %154, %155, %156, %157, %158, %159 in 0 : vector<8x16xbf16>, vector<8x16xbf16>, vector<8x16xbf16>, vector<8x16xbf16>, vector<8x16xbf16>, vector<8x16xbf16>, vector<8x16xbf16>, vector<8x16xbf16> -> vector<64x16xbf16>
    %c0_86 = arith.constant 0 : index
    %c0_87 = arith.constant 0 : index
    %161 = vector.load %arg8[%c0_86, %c0_87] : memref<16x64xbf16, #tpu.memory_space<vmem>>, vector<16x64xbf16>
    %cst_88 = arith.constant dense<0.000000e+00> : vector<16x16xf32>
    %162 = tpu.matmul %161, %160, %cst_88 {dimension_numbers = #tpu.dot_dimension_numbers<[1], [0], [0], [1], [0, 0, 1, 1], [], []>} : vector<16x64xbf16>, vector<64x16xbf16>, vector<16x16xf32> -> vector<16x16xf32>
    %c0_89 = arith.constant 0 : index
    %c0_90 = arith.constant 0 : index
    %163 = vector.load %arg9[%c0_89, %c0_90] : memref<16x1xf32, #tpu.memory_space<vmem>>, vector<16x1xf32>
    %164 = vector.broadcast %163 : vector<16x1xf32> to vector<16x16xf32>
    %165 = arith.addf %162, %164 : vector<16x16xf32>
    %cst_91 = arith.constant 0.000000e+00 : f32
    %166 = vector.broadcast %cst_91 : f32 to vector<16x16xf32>
    %167 = arith.maximumf %165, %166 : vector<16x16xf32>
    %c0_92 = arith.constant 0 : index
    %c0_93 = arith.constant 0 : index
    %168 = vector.load %arg10[%c0_92, %c0_93] : memref<32x16xbf16, #tpu.memory_space<vmem>>, vector<32x16xbf16>
    %169 = arith.truncf %167 : vector<16x16xf32> to vector<16x16xbf16>
    %cst_94 = arith.constant dense<0.000000e+00> : vector<32x16xf32>
    %170 = tpu.matmul %168, %169, %cst_94 {dimension_numbers = #tpu.dot_dimension_numbers<[1], [0], [0], [1], [0, 0, 1, 1], [], []>} : vector<32x16xbf16>, vector<16x16xbf16>, vector<32x16xf32> -> vector<32x16xf32>
    %c0_95 = arith.constant 0 : index
    %c0_96 = arith.constant 0 : index
    %171 = vector.load %arg11[%c0_95, %c0_96] : memref<32x1xf32, #tpu.memory_space<vmem>>, vector<32x1xf32>
    %172 = vector.broadcast %171 : vector<32x1xf32> to vector<32x16xf32>
    %173 = arith.addf %170, %172 : vector<32x16xf32>
    %174 = vector.extract_strided_slice %173 {offsets = [0, 0], sizes = [16, 16], strides = [1, 1]} : vector<32x16xf32> to vector<16x16xf32>
    %175 = vector.extract_strided_slice %173 {offsets = [16, 0], sizes = [16, 16], strides = [1, 1]} : vector<32x16xf32> to vector<16x16xf32>
    %176 = arith.negf %175 : vector<16x16xf32>
    %177 = math.exp %176 : vector<16x16xf32>
    %cst_97 = arith.constant 1.000000e+00 : f32
    %178 = vector.broadcast %cst_97 : f32 to vector<16x16xf32>
    %179 = arith.addf %178, %177 : vector<16x16xf32>
    %180 = arith.divf %178, %179 : vector<16x16xf32>
    %181 = arith.mulf %174, %180 : vector<16x16xf32>
    %182 = arith.truncf %181 : vector<16x16xf32> to vector<16x16xbf16>
    %c0_98 = arith.constant 0 : index
    %c0_99 = arith.constant 0 : index
    %c0_100 = arith.constant 0 : index
    %183 = vector.load %arg12[%c0_98, %c0_99, %c0_100] : memref<8x16x3xbf16, #tpu.memory_space<vmem>>, vector<1x16x3xbf16>
    %184 = vector.shape_cast %183 : vector<1x16x3xbf16> to vector<16x3xbf16>
    %cst_101 = arith.constant dense<0.000000e+00> : vector<16x3xf32>
    %185 = tpu.matmul %182, %184, %cst_101 {dimension_numbers = #tpu.dot_dimension_numbers<[1], [0], [0], [1], [0, 0, 1, 1], [], []>} : vector<16x16xbf16>, vector<16x3xbf16>, vector<16x3xf32> -> vector<16x3xf32>
    %c1_102 = arith.constant 1 : index
    %c0_103 = arith.constant 0 : index
    %c0_104 = arith.constant 0 : index
    %186 = vector.load %arg12[%c1_102, %c0_103, %c0_104] : memref<8x16x3xbf16, #tpu.memory_space<vmem>>, vector<1x16x3xbf16>
    %187 = vector.shape_cast %186 : vector<1x16x3xbf16> to vector<16x3xbf16>
    %cst_105 = arith.constant dense<0.000000e+00> : vector<16x3xf32>
    %188 = tpu.matmul %182, %187, %cst_105 {dimension_numbers = #tpu.dot_dimension_numbers<[1], [0], [0], [1], [0, 0, 1, 1], [], []>} : vector<16x16xbf16>, vector<16x3xbf16>, vector<16x3xf32> -> vector<16x3xf32>
    %c2_106 = arith.constant 2 : index
    %c0_107 = arith.constant 0 : index
    %c0_108 = arith.constant 0 : index
    %189 = vector.load %arg12[%c2_106, %c0_107, %c0_108] : memref<8x16x3xbf16, #tpu.memory_space<vmem>>, vector<1x16x3xbf16>
    %190 = vector.shape_cast %189 : vector<1x16x3xbf16> to vector<16x3xbf16>
    %cst_109 = arith.constant dense<0.000000e+00> : vector<16x3xf32>
    %191 = tpu.matmul %182, %190, %cst_109 {dimension_numbers = #tpu.dot_dimension_numbers<[1], [0], [0], [1], [0, 0, 1, 1], [], []>} : vector<16x16xbf16>, vector<16x3xbf16>, vector<16x3xf32> -> vector<16x3xf32>
    %c3_110 = arith.constant 3 : index
    %c0_111 = arith.constant 0 : index
    %c0_112 = arith.constant 0 : index
    %192 = vector.load %arg12[%c3_110, %c0_111, %c0_112] : memref<8x16x3xbf16, #tpu.memory_space<vmem>>, vector<1x16x3xbf16>
    %193 = vector.shape_cast %192 : vector<1x16x3xbf16> to vector<16x3xbf16>
    %cst_113 = arith.constant dense<0.000000e+00> : vector<16x3xf32>
    %194 = tpu.matmul %182, %193, %cst_113 {dimension_numbers = #tpu.dot_dimension_numbers<[1], [0], [0], [1], [0, 0, 1, 1], [], []>} : vector<16x16xbf16>, vector<16x3xbf16>, vector<16x3xf32> -> vector<16x3xf32>
    %c4_114 = arith.constant 4 : index
    %c0_115 = arith.constant 0 : index
    %c0_116 = arith.constant 0 : index
    %195 = vector.load %arg12[%c4_114, %c0_115, %c0_116] : memref<8x16x3xbf16, #tpu.memory_space<vmem>>, vector<1x16x3xbf16>
    %196 = vector.shape_cast %195 : vector<1x16x3xbf16> to vector<16x3xbf16>
    %cst_117 = arith.constant dense<0.000000e+00> : vector<16x3xf32>
    %197 = tpu.matmul %182, %196, %cst_117 {dimension_numbers = #tpu.dot_dimension_numbers<[1], [0], [0], [1], [0, 0, 1, 1], [], []>} : vector<16x16xbf16>, vector<16x3xbf16>, vector<16x3xf32> -> vector<16x3xf32>
    %c5_118 = arith.constant 5 : index
    %c0_119 = arith.constant 0 : index
    %c0_120 = arith.constant 0 : index
    %198 = vector.load %arg12[%c5_118, %c0_119, %c0_120] : memref<8x16x3xbf16, #tpu.memory_space<vmem>>, vector<1x16x3xbf16>
    %199 = vector.shape_cast %198 : vector<1x16x3xbf16> to vector<16x3xbf16>
    %cst_121 = arith.constant dense<0.000000e+00> : vector<16x3xf32>
    %200 = tpu.matmul %182, %199, %cst_121 {dimension_numbers = #tpu.dot_dimension_numbers<[1], [0], [0], [1], [0, 0, 1, 1], [], []>} : vector<16x16xbf16>, vector<16x3xbf16>, vector<16x3xf32> -> vector<16x3xf32>
    %c6_122 = arith.constant 6 : index
    %c0_123 = arith.constant 0 : index
    %c0_124 = arith.constant 0 : index
    %201 = vector.load %arg12[%c6_122, %c0_123, %c0_124] : memref<8x16x3xbf16, #tpu.memory_space<vmem>>, vector<1x16x3xbf16>
    %202 = vector.shape_cast %201 : vector<1x16x3xbf16> to vector<16x3xbf16>
    %cst_125 = arith.constant dense<0.000000e+00> : vector<16x3xf32>
    %203 = tpu.matmul %182, %202, %cst_125 {dimension_numbers = #tpu.dot_dimension_numbers<[1], [0], [0], [1], [0, 0, 1, 1], [], []>} : vector<16x16xbf16>, vector<16x3xbf16>, vector<16x3xf32> -> vector<16x3xf32>
    %c7_126 = arith.constant 7 : index
    %c0_127 = arith.constant 0 : index
    %c0_128 = arith.constant 0 : index
    %204 = vector.load %arg12[%c7_126, %c0_127, %c0_128] : memref<8x16x3xbf16, #tpu.memory_space<vmem>>, vector<1x16x3xbf16>
    %205 = vector.shape_cast %204 : vector<1x16x3xbf16> to vector<16x3xbf16>
    %cst_129 = arith.constant dense<0.000000e+00> : vector<16x3xf32>
    %206 = tpu.matmul %182, %205, %cst_129 {dimension_numbers = #tpu.dot_dimension_numbers<[1], [0], [0], [1], [0, 0, 1, 1], [], []>} : vector<16x16xbf16>, vector<16x3xbf16>, vector<16x3xf32> -> vector<16x3xf32>
    %207 = arith.truncf %185 : vector<16x3xf32> to vector<16x3xbf16>
    %208 = arith.truncf %188 : vector<16x3xf32> to vector<16x3xbf16>
    %209 = arith.truncf %191 : vector<16x3xf32> to vector<16x3xbf16>
    %210 = arith.truncf %194 : vector<16x3xf32> to vector<16x3xbf16>
    %211 = arith.truncf %197 : vector<16x3xf32> to vector<16x3xbf16>
    %212 = arith.truncf %200 : vector<16x3xf32> to vector<16x3xbf16>
    %213 = arith.truncf %203 : vector<16x3xf32> to vector<16x3xbf16>
    %214 = arith.truncf %206 : vector<16x3xf32> to vector<16x3xbf16>
    %215 = tpu.concatenate %207, %208, %209, %210, %211, %212, %213, %214 in 0 : vector<16x3xbf16>, vector<16x3xbf16>, vector<16x3xbf16>, vector<16x3xbf16>, vector<16x3xbf16>, vector<16x3xbf16>, vector<16x3xbf16>, vector<16x3xbf16> -> vector<128x3xbf16>
    %c0_130 = arith.constant 0 : index
    %c0_131 = arith.constant 0 : index
    %216 = vector.load %arg13[%c0_130, %c0_131] : memref<32x128xbf16, #tpu.memory_space<vmem>>, vector<32x128xbf16>
    %cst_132 = arith.constant dense<0.000000e+00> : vector<32x3xf32>
    %217 = tpu.matmul %216, %215, %cst_132 {dimension_numbers = #tpu.dot_dimension_numbers<[1], [0], [0], [1], [0, 0, 1, 1], [], []>} : vector<32x128xbf16>, vector<128x3xbf16>, vector<32x3xf32> -> vector<32x3xf32>
    %c0_133 = arith.constant 0 : index
    %c0_134 = arith.constant 0 : index
    %218 = vector.load %arg14[%c0_133, %c0_134] : memref<32x1xf32, #tpu.memory_space<vmem>>, vector<32x1xf32>
    %219 = vector.broadcast %218 : vector<32x1xf32> to vector<32x3xf32>
    %220 = arith.addf %217, %219 : vector<32x3xf32>
    %cst_135 = arith.constant 0.000000e+00 : f32
    %221 = vector.broadcast %cst_135 : f32 to vector<32x3xf32>
    %222 = arith.maximumf %220, %221 : vector<32x3xf32>
    %c0_136 = arith.constant 0 : index
    %c0_137 = arith.constant 0 : index
    %223 = vector.load %arg15[%c0_136, %c0_137] : memref<64x32xbf16, #tpu.memory_space<vmem>>, vector<64x32xbf16>
    %224 = arith.truncf %222 : vector<32x3xf32> to vector<32x3xbf16>
    %cst_138 = arith.constant dense<0.000000e+00> : vector<64x3xf32>
    %225 = tpu.matmul %223, %224, %cst_138 {dimension_numbers = #tpu.dot_dimension_numbers<[1], [0], [0], [1], [0, 0, 1, 1], [], []>} : vector<64x32xbf16>, vector<32x3xbf16>, vector<64x3xf32> -> vector<64x3xf32>
    %c0_139 = arith.constant 0 : index
    %c0_140 = arith.constant 0 : index
    %226 = vector.load %arg16[%c0_139, %c0_140] : memref<64x1xf32, #tpu.memory_space<vmem>>, vector<64x1xf32>
    %227 = vector.broadcast %226 : vector<64x1xf32> to vector<64x3xf32>
    %228 = arith.addf %225, %227 : vector<64x3xf32>
    %229 = vector.extract_strided_slice %228 {offsets = [0, 0], sizes = [32, 3], strides = [1, 1]} : vector<64x3xf32> to vector<32x3xf32>
    %230 = vector.extract_strided_slice %228 {offsets = [32, 0], sizes = [32, 3], strides = [1, 1]} : vector<64x3xf32> to vector<32x3xf32>
    %231 = arith.negf %230 : vector<32x3xf32>
    %232 = math.exp %231 : vector<32x3xf32>
    %cst_141 = arith.constant 1.000000e+00 : f32
    %233 = vector.broadcast %cst_141 : f32 to vector<32x3xf32>
    %234 = arith.addf %233, %232 : vector<32x3xf32>
    %235 = arith.divf %233, %234 : vector<32x3xf32>
    %236 = arith.mulf %229, %235 : vector<32x3xf32>
    %cst_142 = arith.constant 0.000000e+00 : f32
    %237 = vector.broadcast %cst_142 : f32 to vector<32x3xf32>
    %238 = arith.addf %236, %237 : vector<32x3xf32>
    %c0_143 = arith.constant 0 : index
    %c0_144 = arith.constant 0 : index
    %239 = vector.load %arg18[%c0_143, %c0_144] : memref<64x32xbf16, #tpu.memory_space<vmem>>, vector<64x32xbf16>
    %240 = arith.truncf %238 : vector<32x3xf32> to vector<32x3xbf16>
    %cst_145 = arith.constant dense<0.000000e+00> : vector<64x3xf32>
    %241 = tpu.matmul %239, %240, %cst_145 {dimension_numbers = #tpu.dot_dimension_numbers<[1], [0], [0], [1], [0, 0, 1, 1], [], []>} : vector<64x32xbf16>, vector<32x3xbf16>, vector<64x3xf32> -> vector<64x3xf32>
    %c0_146 = arith.constant 0 : index
    %c0_147 = arith.constant 0 : index
    %242 = vector.load %arg19[%c0_146, %c0_147] : memref<64x1xf32, #tpu.memory_space<vmem>>, vector<64x1xf32>
    %243 = vector.broadcast %242 : vector<64x1xf32> to vector<64x3xf32>
    %244 = arith.addf %241, %243 : vector<64x3xf32>
    %245 = vector.extract_strided_slice %244 {offsets = [0, 0], sizes = [32, 3], strides = [1, 1]} : vector<64x3xf32> to vector<32x3xf32>
    %246 = vector.extract_strided_slice %244 {offsets = [32, 0], sizes = [32, 3], strides = [1, 1]} : vector<64x3xf32> to vector<32x3xf32>
    %247 = arith.negf %246 : vector<32x3xf32>
    %248 = math.exp %247 : vector<32x3xf32>
    %cst_148 = arith.constant 1.000000e+00 : f32
    %249 = vector.broadcast %cst_148 : f32 to vector<32x3xf32>
    %250 = arith.addf %249, %248 : vector<32x3xf32>
    %251 = arith.divf %249, %250 : vector<32x3xf32>
    %252 = arith.mulf %245, %251 : vector<32x3xf32>
    %253 = arith.truncf %252 : vector<32x3xf32> to vector<32x3xbf16>
    %c0_149 = arith.constant 0 : index
    %c0_150 = arith.constant 0 : index
    %c0_151 = arith.constant 0 : index
    %254 = vector.load %arg17[%c0_149, %c0_150, %c0_151] : memref<8x3x16xbf16, #tpu.memory_space<vmem>>, vector<1x3x16xbf16>
    %255 = vector.shape_cast %254 : vector<1x3x16xbf16> to vector<3x16xbf16>
    %cst_152 = arith.constant dense<0.000000e+00> : vector<32x16xf32>
    %256 = tpu.matmul %253, %255, %cst_152 {dimension_numbers = #tpu.dot_dimension_numbers<[1], [0], [0], [1], [0, 0, 1, 1], [], []>} : vector<32x3xbf16>, vector<3x16xbf16>, vector<32x16xf32> -> vector<32x16xf32>
    %257 = arith.truncf %256 : vector<32x16xf32> to vector<32x16xbf16>
    %c1_153 = arith.constant 1 : index
    %c0_154 = arith.constant 0 : index
    %c0_155 = arith.constant 0 : index
    %258 = vector.load %arg17[%c1_153, %c0_154, %c0_155] : memref<8x3x16xbf16, #tpu.memory_space<vmem>>, vector<1x3x16xbf16>
    %259 = vector.shape_cast %258 : vector<1x3x16xbf16> to vector<3x16xbf16>
    %cst_156 = arith.constant dense<0.000000e+00> : vector<32x16xf32>
    %260 = tpu.matmul %253, %259, %cst_156 {dimension_numbers = #tpu.dot_dimension_numbers<[1], [0], [0], [1], [0, 0, 1, 1], [], []>} : vector<32x3xbf16>, vector<3x16xbf16>, vector<32x16xf32> -> vector<32x16xf32>
    %261 = arith.truncf %260 : vector<32x16xf32> to vector<32x16xbf16>
    %c2_157 = arith.constant 2 : index
    %c0_158 = arith.constant 0 : index
    %c0_159 = arith.constant 0 : index
    %262 = vector.load %arg17[%c2_157, %c0_158, %c0_159] : memref<8x3x16xbf16, #tpu.memory_space<vmem>>, vector<1x3x16xbf16>
    %263 = vector.shape_cast %262 : vector<1x3x16xbf16> to vector<3x16xbf16>
    %cst_160 = arith.constant dense<0.000000e+00> : vector<32x16xf32>
    %264 = tpu.matmul %253, %263, %cst_160 {dimension_numbers = #tpu.dot_dimension_numbers<[1], [0], [0], [1], [0, 0, 1, 1], [], []>} : vector<32x3xbf16>, vector<3x16xbf16>, vector<32x16xf32> -> vector<32x16xf32>
    %265 = arith.truncf %264 : vector<32x16xf32> to vector<32x16xbf16>
    %c3_161 = arith.constant 3 : index
    %c0_162 = arith.constant 0 : index
    %c0_163 = arith.constant 0 : index
    %266 = vector.load %arg17[%c3_161, %c0_162, %c0_163] : memref<8x3x16xbf16, #tpu.memory_space<vmem>>, vector<1x3x16xbf16>
    %267 = vector.shape_cast %266 : vector<1x3x16xbf16> to vector<3x16xbf16>
    %cst_164 = arith.constant dense<0.000000e+00> : vector<32x16xf32>
    %268 = tpu.matmul %253, %267, %cst_164 {dimension_numbers = #tpu.dot_dimension_numbers<[1], [0], [0], [1], [0, 0, 1, 1], [], []>} : vector<32x3xbf16>, vector<3x16xbf16>, vector<32x16xf32> -> vector<32x16xf32>
    %269 = arith.truncf %268 : vector<32x16xf32> to vector<32x16xbf16>
    %c4_165 = arith.constant 4 : index
    %c0_166 = arith.constant 0 : index
    %c0_167 = arith.constant 0 : index
    %270 = vector.load %arg17[%c4_165, %c0_166, %c0_167] : memref<8x3x16xbf16, #tpu.memory_space<vmem>>, vector<1x3x16xbf16>
    %271 = vector.shape_cast %270 : vector<1x3x16xbf16> to vector<3x16xbf16>
    %cst_168 = arith.constant dense<0.000000e+00> : vector<32x16xf32>
    %272 = tpu.matmul %253, %271, %cst_168 {dimension_numbers = #tpu.dot_dimension_numbers<[1], [0], [0], [1], [0, 0, 1, 1], [], []>} : vector<32x3xbf16>, vector<3x16xbf16>, vector<32x16xf32> -> vector<32x16xf32>
    %273 = arith.truncf %272 : vector<32x16xf32> to vector<32x16xbf16>
    %c5_169 = arith.constant 5 : index
    %c0_170 = arith.constant 0 : index
    %c0_171 = arith.constant 0 : index
    %274 = vector.load %arg17[%c5_169, %c0_170, %c0_171] : memref<8x3x16xbf16, #tpu.memory_space<vmem>>, vector<1x3x16xbf16>
    %275 = vector.shape_cast %274 : vector<1x3x16xbf16> to vector<3x16xbf16>
    %cst_172 = arith.constant dense<0.000000e+00> : vector<32x16xf32>
    %276 = tpu.matmul %253, %275, %cst_172 {dimension_numbers = #tpu.dot_dimension_numbers<[1], [0], [0], [1], [0, 0, 1, 1], [], []>} : vector<32x3xbf16>, vector<3x16xbf16>, vector<32x16xf32> -> vector<32x16xf32>
    %277 = arith.truncf %276 : vector<32x16xf32> to vector<32x16xbf16>
    %c6_173 = arith.constant 6 : index
    %c0_174 = arith.constant 0 : index
    %c0_175 = arith.constant 0 : index
    %278 = vector.load %arg17[%c6_173, %c0_174, %c0_175] : memref<8x3x16xbf16, #tpu.memory_space<vmem>>, vector<1x3x16xbf16>
    %279 = vector.shape_cast %278 : vector<1x3x16xbf16> to vector<3x16xbf16>
    %cst_176 = arith.constant dense<0.000000e+00> : vector<32x16xf32>
    %280 = tpu.matmul %253, %279, %cst_176 {dimension_numbers = #tpu.dot_dimension_numbers<[1], [0], [0], [1], [0, 0, 1, 1], [], []>} : vector<32x3xbf16>, vector<3x16xbf16>, vector<32x16xf32> -> vector<32x16xf32>
    %281 = arith.truncf %280 : vector<32x16xf32> to vector<32x16xbf16>
    %c7_177 = arith.constant 7 : index
    %c0_178 = arith.constant 0 : index
    %c0_179 = arith.constant 0 : index
    %282 = vector.load %arg17[%c7_177, %c0_178, %c0_179] : memref<8x3x16xbf16, #tpu.memory_space<vmem>>, vector<1x3x16xbf16>
    %283 = vector.shape_cast %282 : vector<1x3x16xbf16> to vector<3x16xbf16>
    %cst_180 = arith.constant dense<0.000000e+00> : vector<32x16xf32>
    %284 = tpu.matmul %253, %283, %cst_180 {dimension_numbers = #tpu.dot_dimension_numbers<[1], [0], [0], [1], [0, 0, 1, 1], [], []>} : vector<32x3xbf16>, vector<3x16xbf16>, vector<32x16xf32> -> vector<32x16xf32>
    %285 = arith.truncf %284 : vector<32x16xf32> to vector<32x16xbf16>
    %286 = tpu.concatenate %257, %261, %265, %269, %273, %277, %281, %285 in 0 : vector<32x16xbf16>, vector<32x16xbf16>, vector<32x16xbf16>, vector<32x16xbf16>, vector<32x16xbf16>, vector<32x16xbf16>, vector<32x16xbf16>, vector<32x16xbf16> -> vector<256x16xbf16>
    %c0_181 = arith.constant 0 : index
    %c0_182 = arith.constant 0 : index
    %287 = vector.load %arg20[%c0_181, %c0_182] : memref<16x256xbf16, #tpu.memory_space<vmem>>, vector<16x256xbf16>
    %cst_183 = arith.constant dense<0.000000e+00> : vector<16x16xf32>
    %288 = tpu.matmul %287, %286, %cst_183 {dimension_numbers = #tpu.dot_dimension_numbers<[1], [0], [0], [1], [0, 0, 1, 1], [], []>} : vector<16x256xbf16>, vector<256x16xbf16>, vector<16x16xf32> -> vector<16x16xf32>
    %c0_184 = arith.constant 0 : index
    %c0_185 = arith.constant 0 : index
    %289 = vector.load %arg21[%c0_184, %c0_185] : memref<16x1xf32, #tpu.memory_space<vmem>>, vector<16x1xf32>
    %290 = vector.broadcast %289 : vector<16x1xf32> to vector<16x16xf32>
    %291 = arith.addf %288, %290 : vector<16x16xf32>
    %cst_186 = arith.constant 0.000000e+00 : f32
    %292 = vector.broadcast %cst_186 : f32 to vector<16x16xf32>
    %293 = arith.maximumf %291, %292 : vector<16x16xf32>
    %cst_187 = arith.constant 0.000000e+00 : f32
    %294 = vector.broadcast %cst_187 : f32 to vector<16x16xf32>
    %295 = arith.addf %294, %181 : vector<16x16xf32>
    %c0_188 = arith.constant 0 : index
    %c0_189 = arith.constant 0 : index
    %296 = vector.load %arg23[%c0_188, %c0_189] : memref<32x16xbf16, #tpu.memory_space<vmem>>, vector<32x16xbf16>
    %297 = arith.truncf %181 : vector<16x16xf32> to vector<16x16xbf16>
    %cst_190 = arith.constant dense<0.000000e+00> : vector<32x16xf32>
    %298 = tpu.matmul %296, %297, %cst_190 {dimension_numbers = #tpu.dot_dimension_numbers<[1], [0], [0], [1], [0, 0, 1, 1], [], []>} : vector<32x16xbf16>, vector<16x16xbf16>, vector<32x16xf32> -> vector<32x16xf32>
    %c0_191 = arith.constant 0 : index
    %c0_192 = arith.constant 0 : index
    %299 = vector.load %arg24[%c0_191, %c0_192] : memref<32x1xf32, #tpu.memory_space<vmem>>, vector<32x1xf32>
    %300 = vector.broadcast %299 : vector<32x1xf32> to vector<32x16xf32>
    %301 = arith.addf %298, %300 : vector<32x16xf32>
    %302 = vector.extract_strided_slice %301 {offsets = [0, 0], sizes = [16, 16], strides = [1, 1]} : vector<32x16xf32> to vector<16x16xf32>
    %303 = vector.extract_strided_slice %301 {offsets = [16, 0], sizes = [16, 16], strides = [1, 1]} : vector<32x16xf32> to vector<16x16xf32>
    %304 = arith.negf %303 : vector<16x16xf32>
    %305 = math.exp %304 : vector<16x16xf32>
    %cst_193 = arith.constant 1.000000e+00 : f32
    %306 = vector.broadcast %cst_193 : f32 to vector<16x16xf32>
    %307 = arith.addf %306, %305 : vector<16x16xf32>
    %308 = arith.divf %306, %307 : vector<16x16xf32>
    %309 = arith.mulf %302, %308 : vector<16x16xf32>
    %310 = arith.truncf %309 : vector<16x16xf32> to vector<16x16xbf16>
    %c0_194 = arith.constant 0 : index
    %c0_195 = arith.constant 0 : index
    %c0_196 = arith.constant 0 : index
    %311 = vector.load %arg22[%c0_194, %c0_195, %c0_196] : memref<8x16x68xbf16, #tpu.memory_space<vmem>>, vector<1x16x68xbf16>
    %312 = vector.shape_cast %311 : vector<1x16x68xbf16> to vector<16x68xbf16>
    %cst_197 = arith.constant dense<0.000000e+00> : vector<16x68xf32>
    %313 = tpu.matmul %310, %312, %cst_197 {dimension_numbers = #tpu.dot_dimension_numbers<[1], [0], [0], [1], [0, 0, 1, 1], [], []>} : vector<16x16xbf16>, vector<16x68xbf16>, vector<16x68xf32> -> vector<16x68xf32>
    %314 = arith.truncf %313 : vector<16x68xf32> to vector<16x68xbf16>
    %c1_198 = arith.constant 1 : index
    %c0_199 = arith.constant 0 : index
    %c0_200 = arith.constant 0 : index
    %315 = vector.load %arg22[%c1_198, %c0_199, %c0_200] : memref<8x16x68xbf16, #tpu.memory_space<vmem>>, vector<1x16x68xbf16>
    %316 = vector.shape_cast %315 : vector<1x16x68xbf16> to vector<16x68xbf16>
    %cst_201 = arith.constant dense<0.000000e+00> : vector<16x68xf32>
    %317 = tpu.matmul %310, %316, %cst_201 {dimension_numbers = #tpu.dot_dimension_numbers<[1], [0], [0], [1], [0, 0, 1, 1], [], []>} : vector<16x16xbf16>, vector<16x68xbf16>, vector<16x68xf32> -> vector<16x68xf32>
    %318 = arith.truncf %317 : vector<16x68xf32> to vector<16x68xbf16>
    %c2_202 = arith.constant 2 : index
    %c0_203 = arith.constant 0 : index
    %c0_204 = arith.constant 0 : index
    %319 = vector.load %arg22[%c2_202, %c0_203, %c0_204] : memref<8x16x68xbf16, #tpu.memory_space<vmem>>, vector<1x16x68xbf16>
    %320 = vector.shape_cast %319 : vector<1x16x68xbf16> to vector<16x68xbf16>
    %cst_205 = arith.constant dense<0.000000e+00> : vector<16x68xf32>
    %321 = tpu.matmul %310, %320, %cst_205 {dimension_numbers = #tpu.dot_dimension_numbers<[1], [0], [0], [1], [0, 0, 1, 1], [], []>} : vector<16x16xbf16>, vector<16x68xbf16>, vector<16x68xf32> -> vector<16x68xf32>
    %322 = arith.truncf %321 : vector<16x68xf32> to vector<16x68xbf16>
    %c3_206 = arith.constant 3 : index
    %c0_207 = arith.constant 0 : index
    %c0_208 = arith.constant 0 : index
    %323 = vector.load %arg22[%c3_206, %c0_207, %c0_208] : memref<8x16x68xbf16, #tpu.memory_space<vmem>>, vector<1x16x68xbf16>
    %324 = vector.shape_cast %323 : vector<1x16x68xbf16> to vector<16x68xbf16>
    %cst_209 = arith.constant dense<0.000000e+00> : vector<16x68xf32>
    %325 = tpu.matmul %310, %324, %cst_209 {dimension_numbers = #tpu.dot_dimension_numbers<[1], [0], [0], [1], [0, 0, 1, 1], [], []>} : vector<16x16xbf16>, vector<16x68xbf16>, vector<16x68xf32> -> vector<16x68xf32>
    %326 = arith.truncf %325 : vector<16x68xf32> to vector<16x68xbf16>
    %c4_210 = arith.constant 4 : index
    %c0_211 = arith.constant 0 : index
    %c0_212 = arith.constant 0 : index
    %327 = vector.load %arg22[%c4_210, %c0_211, %c0_212] : memref<8x16x68xbf16, #tpu.memory_space<vmem>>, vector<1x16x68xbf16>
    %328 = vector.shape_cast %327 : vector<1x16x68xbf16> to vector<16x68xbf16>
    %cst_213 = arith.constant dense<0.000000e+00> : vector<16x68xf32>
    %329 = tpu.matmul %310, %328, %cst_213 {dimension_numbers = #tpu.dot_dimension_numbers<[1], [0], [0], [1], [0, 0, 1, 1], [], []>} : vector<16x16xbf16>, vector<16x68xbf16>, vector<16x68xf32> -> vector<16x68xf32>
    %330 = arith.truncf %329 : vector<16x68xf32> to vector<16x68xbf16>
    %c5_214 = arith.constant 5 : index
    %c0_215 = arith.constant 0 : index
    %c0_216 = arith.constant 0 : index
    %331 = vector.load %arg22[%c5_214, %c0_215, %c0_216] : memref<8x16x68xbf16, #tpu.memory_space<vmem>>, vector<1x16x68xbf16>
    %332 = vector.shape_cast %331 : vector<1x16x68xbf16> to vector<16x68xbf16>
    %cst_217 = arith.constant dense<0.000000e+00> : vector<16x68xf32>
    %333 = tpu.matmul %310, %332, %cst_217 {dimension_numbers = #tpu.dot_dimension_numbers<[1], [0], [0], [1], [0, 0, 1, 1], [], []>} : vector<16x16xbf16>, vector<16x68xbf16>, vector<16x68xf32> -> vector<16x68xf32>
    %334 = arith.truncf %333 : vector<16x68xf32> to vector<16x68xbf16>
    %c6_218 = arith.constant 6 : index
    %c0_219 = arith.constant 0 : index
    %c0_220 = arith.constant 0 : index
    %335 = vector.load %arg22[%c6_218, %c0_219, %c0_220] : memref<8x16x68xbf16, #tpu.memory_space<vmem>>, vector<1x16x68xbf16>
    %336 = vector.shape_cast %335 : vector<1x16x68xbf16> to vector<16x68xbf16>
    %cst_221 = arith.constant dense<0.000000e+00> : vector<16x68xf32>
    %337 = tpu.matmul %310, %336, %cst_221 {dimension_numbers = #tpu.dot_dimension_numbers<[1], [0], [0], [1], [0, 0, 1, 1], [], []>} : vector<16x16xbf16>, vector<16x68xbf16>, vector<16x68xf32> -> vector<16x68xf32>
    %338 = arith.truncf %337 : vector<16x68xf32> to vector<16x68xbf16>
    %c7_222 = arith.constant 7 : index
    %c0_223 = arith.constant 0 : index
    %c0_224 = arith.constant 0 : index
    %339 = vector.load %arg22[%c7_222, %c0_223, %c0_224] : memref<8x16x68xbf16, #tpu.memory_space<vmem>>, vector<1x16x68xbf16>
    %340 = vector.shape_cast %339 : vector<1x16x68xbf16> to vector<16x68xbf16>
    %cst_225 = arith.constant dense<0.000000e+00> : vector<16x68xf32>
    %341 = tpu.matmul %310, %340, %cst_225 {dimension_numbers = #tpu.dot_dimension_numbers<[1], [0], [0], [1], [0, 0, 1, 1], [], []>} : vector<16x16xbf16>, vector<16x68xbf16>, vector<16x68xf32> -> vector<16x68xf32>
    %342 = arith.truncf %341 : vector<16x68xf32> to vector<16x68xbf16>
    %343 = tpu.concatenate %314, %318, %322, %326, %330, %334, %338, %342 in 0 : vector<16x68xbf16>, vector<16x68xbf16>, vector<16x68xbf16>, vector<16x68xbf16>, vector<16x68xbf16>, vector<16x68xbf16>, vector<16x68xbf16>, vector<16x68xbf16> -> vector<128x68xbf16>
    %c0_226 = arith.constant 0 : index
    %c0_227 = arith.constant 0 : index
    %344 = vector.load %arg25[%c0_226, %c0_227] : memref<8x128xbf16, #tpu.memory_space<vmem>>, vector<8x128xbf16>
    %cst_228 = arith.constant dense<0.000000e+00> : vector<8x68xf32>
    %345 = tpu.matmul %344, %343, %cst_228 {dimension_numbers = #tpu.dot_dimension_numbers<[1], [0], [0], [1], [0, 0, 1, 1], [], []>} : vector<8x128xbf16>, vector<128x68xbf16>, vector<8x68xf32> -> vector<8x68xf32>
    %c0_229 = arith.constant 0 : index
    %c0_230 = arith.constant 0 : index
    %346 = vector.load %arg26[%c0_229, %c0_230] : memref<8x1xf32, #tpu.memory_space<vmem>>, vector<8x1xf32>
    %347 = vector.broadcast %346 : vector<8x1xf32> to vector<8x68xf32>
    %348 = arith.addf %345, %347 : vector<8x68xf32>
    %cst_231 = arith.constant 0.000000e+00 : f32
    %349 = vector.broadcast %cst_231 : f32 to vector<8x68xf32>
    %350 = arith.maximumf %348, %349 : vector<8x68xf32>
    %351 = arith.addf %293, %295 : vector<16x16xf32>
    %c0_232 = arith.constant 0 : index
    %c0_233 = arith.constant 0 : index
    %352 = vector.load %arg28[%c0_232, %c0_233] : memref<32x16xbf16, #tpu.memory_space<vmem>>, vector<32x16xbf16>
    %353 = arith.truncf %351 : vector<16x16xf32> to vector<16x16xbf16>
    %cst_234 = arith.constant dense<0.000000e+00> : vector<32x16xf32>
    %354 = tpu.matmul %352, %353, %cst_234 {dimension_numbers = #tpu.dot_dimension_numbers<[1], [0], [0], [1], [0, 0, 1, 1], [], []>} : vector<32x16xbf16>, vector<16x16xbf16>, vector<32x16xf32> -> vector<32x16xf32>
    %c0_235 = arith.constant 0 : index
    %c0_236 = arith.constant 0 : index
    %355 = vector.load %arg29[%c0_235, %c0_236] : memref<32x1xf32, #tpu.memory_space<vmem>>, vector<32x1xf32>
    %356 = vector.broadcast %355 : vector<32x1xf32> to vector<32x16xf32>
    %357 = arith.addf %354, %356 : vector<32x16xf32>
    %358 = vector.extract_strided_slice %357 {offsets = [0, 0], sizes = [16, 16], strides = [1, 1]} : vector<32x16xf32> to vector<16x16xf32>
    %359 = vector.extract_strided_slice %357 {offsets = [16, 0], sizes = [16, 16], strides = [1, 1]} : vector<32x16xf32> to vector<16x16xf32>
    %360 = arith.negf %359 : vector<16x16xf32>
    %361 = math.exp %360 : vector<16x16xf32>
    %cst_237 = arith.constant 1.000000e+00 : f32
    %362 = vector.broadcast %cst_237 : f32 to vector<16x16xf32>
    %363 = arith.addf %362, %361 : vector<16x16xf32>
    %364 = arith.divf %362, %363 : vector<16x16xf32>
    %365 = arith.mulf %358, %364 : vector<16x16xf32>
    %366 = arith.truncf %365 : vector<16x16xf32> to vector<16x16xbf16>
    %c0_238 = arith.constant 0 : index
    %c0_239 = arith.constant 0 : index
    %c0_240 = arith.constant 0 : index
    %367 = vector.load %arg27[%c0_238, %c0_239, %c0_240] : memref<8x16x68xbf16, #tpu.memory_space<vmem>>, vector<1x16x68xbf16>
    %368 = vector.shape_cast %367 : vector<1x16x68xbf16> to vector<16x68xbf16>
    %cst_241 = arith.constant dense<0.000000e+00> : vector<16x68xf32>
    %369 = tpu.matmul %366, %368, %cst_241 {dimension_numbers = #tpu.dot_dimension_numbers<[1], [0], [0], [1], [0, 0, 1, 1], [], []>} : vector<16x16xbf16>, vector<16x68xbf16>, vector<16x68xf32> -> vector<16x68xf32>
    %370 = arith.truncf %369 : vector<16x68xf32> to vector<16x68xbf16>
    %c1_242 = arith.constant 1 : index
    %c0_243 = arith.constant 0 : index
    %c0_244 = arith.constant 0 : index
    %371 = vector.load %arg27[%c1_242, %c0_243, %c0_244] : memref<8x16x68xbf16, #tpu.memory_space<vmem>>, vector<1x16x68xbf16>
    %372 = vector.shape_cast %371 : vector<1x16x68xbf16> to vector<16x68xbf16>
    %cst_245 = arith.constant dense<0.000000e+00> : vector<16x68xf32>
    %373 = tpu.matmul %366, %372, %cst_245 {dimension_numbers = #tpu.dot_dimension_numbers<[1], [0], [0], [1], [0, 0, 1, 1], [], []>} : vector<16x16xbf16>, vector<16x68xbf16>, vector<16x68xf32> -> vector<16x68xf32>
    %374 = arith.truncf %373 : vector<16x68xf32> to vector<16x68xbf16>
    %c2_246 = arith.constant 2 : index
    %c0_247 = arith.constant 0 : index
    %c0_248 = arith.constant 0 : index
    %375 = vector.load %arg27[%c2_246, %c0_247, %c0_248] : memref<8x16x68xbf16, #tpu.memory_space<vmem>>, vector<1x16x68xbf16>
    %376 = vector.shape_cast %375 : vector<1x16x68xbf16> to vector<16x68xbf16>
    %cst_249 = arith.constant dense<0.000000e+00> : vector<16x68xf32>
    %377 = tpu.matmul %366, %376, %cst_249 {dimension_numbers = #tpu.dot_dimension_numbers<[1], [0], [0], [1], [0, 0, 1, 1], [], []>} : vector<16x16xbf16>, vector<16x68xbf16>, vector<16x68xf32> -> vector<16x68xf32>
    %378 = arith.truncf %377 : vector<16x68xf32> to vector<16x68xbf16>
    %c3_250 = arith.constant 3 : index
    %c0_251 = arith.constant 0 : index
    %c0_252 = arith.constant 0 : index
    %379 = vector.load %arg27[%c3_250, %c0_251, %c0_252] : memref<8x16x68xbf16, #tpu.memory_space<vmem>>, vector<1x16x68xbf16>
    %380 = vector.shape_cast %379 : vector<1x16x68xbf16> to vector<16x68xbf16>
    %cst_253 = arith.constant dense<0.000000e+00> : vector<16x68xf32>
    %381 = tpu.matmul %366, %380, %cst_253 {dimension_numbers = #tpu.dot_dimension_numbers<[1], [0], [0], [1], [0, 0, 1, 1], [], []>} : vector<16x16xbf16>, vector<16x68xbf16>, vector<16x68xf32> -> vector<16x68xf32>
    %382 = arith.truncf %381 : vector<16x68xf32> to vector<16x68xbf16>
    %c4_254 = arith.constant 4 : index
    %c0_255 = arith.constant 0 : index
    %c0_256 = arith.constant 0 : index
    %383 = vector.load %arg27[%c4_254, %c0_255, %c0_256] : memref<8x16x68xbf16, #tpu.memory_space<vmem>>, vector<1x16x68xbf16>
    %384 = vector.shape_cast %383 : vector<1x16x68xbf16> to vector<16x68xbf16>
    %cst_257 = arith.constant dense<0.000000e+00> : vector<16x68xf32>
    %385 = tpu.matmul %366, %384, %cst_257 {dimension_numbers = #tpu.dot_dimension_numbers<[1], [0], [0], [1], [0, 0, 1, 1], [], []>} : vector<16x16xbf16>, vector<16x68xbf16>, vector<16x68xf32> -> vector<16x68xf32>
    %386 = arith.truncf %385 : vector<16x68xf32> to vector<16x68xbf16>
    %c5_258 = arith.constant 5 : index
    %c0_259 = arith.constant 0 : index
    %c0_260 = arith.constant 0 : index
    %387 = vector.load %arg27[%c5_258, %c0_259, %c0_260] : memref<8x16x68xbf16, #tpu.memory_space<vmem>>, vector<1x16x68xbf16>
    %388 = vector.shape_cast %387 : vector<1x16x68xbf16> to vector<16x68xbf16>
    %cst_261 = arith.constant dense<0.000000e+00> : vector<16x68xf32>
    %389 = tpu.matmul %366, %388, %cst_261 {dimension_numbers = #tpu.dot_dimension_numbers<[1], [0], [0], [1], [0, 0, 1, 1], [], []>} : vector<16x16xbf16>, vector<16x68xbf16>, vector<16x68xf32> -> vector<16x68xf32>
    %390 = arith.truncf %389 : vector<16x68xf32> to vector<16x68xbf16>
    %c6_262 = arith.constant 6 : index
    %c0_263 = arith.constant 0 : index
    %c0_264 = arith.constant 0 : index
    %391 = vector.load %arg27[%c6_262, %c0_263, %c0_264] : memref<8x16x68xbf16, #tpu.memory_space<vmem>>, vector<1x16x68xbf16>
    %392 = vector.shape_cast %391 : vector<1x16x68xbf16> to vector<16x68xbf16>
    %cst_265 = arith.constant dense<0.000000e+00> : vector<16x68xf32>
    %393 = tpu.matmul %366, %392, %cst_265 {dimension_numbers = #tpu.dot_dimension_numbers<[1], [0], [0], [1], [0, 0, 1, 1], [], []>} : vector<16x16xbf16>, vector<16x68xbf16>, vector<16x68xf32> -> vector<16x68xf32>
    %394 = arith.truncf %393 : vector<16x68xf32> to vector<16x68xbf16>
    %c7_266 = arith.constant 7 : index
    %c0_267 = arith.constant 0 : index
    %c0_268 = arith.constant 0 : index
    %395 = vector.load %arg27[%c7_266, %c0_267, %c0_268] : memref<8x16x68xbf16, #tpu.memory_space<vmem>>, vector<1x16x68xbf16>
    %396 = vector.shape_cast %395 : vector<1x16x68xbf16> to vector<16x68xbf16>
    %cst_269 = arith.constant dense<0.000000e+00> : vector<16x68xf32>
    %397 = tpu.matmul %366, %396, %cst_269 {dimension_numbers = #tpu.dot_dimension_numbers<[1], [0], [0], [1], [0, 0, 1, 1], [], []>} : vector<16x16xbf16>, vector<16x68xbf16>, vector<16x68xf32> -> vector<16x68xf32>
    %398 = arith.truncf %397 : vector<16x68xf32> to vector<16x68xbf16>
    %399 = tpu.concatenate %370, %374, %378, %382, %386, %390, %394, %398 in 0 : vector<16x68xbf16>, vector<16x68xbf16>, vector<16x68xbf16>, vector<16x68xbf16>, vector<16x68xbf16>, vector<16x68xbf16>, vector<16x68xbf16>, vector<16x68xbf16> -> vector<128x68xbf16>
    %c0_270 = arith.constant 0 : index
    %c0_271 = arith.constant 0 : index
    %400 = vector.load %arg30[%c0_270, %c0_271] : memref<8x128xbf16, #tpu.memory_space<vmem>>, vector<8x128xbf16>
    %cst_272 = arith.constant dense<0.000000e+00> : vector<8x68xf32>
    %401 = tpu.matmul %400, %399, %cst_272 {dimension_numbers = #tpu.dot_dimension_numbers<[1], [0], [0], [1], [0, 0, 1, 1], [], []>} : vector<8x128xbf16>, vector<128x68xbf16>, vector<8x68xf32> -> vector<8x68xf32>
    %c0_273 = arith.constant 0 : index
    %c0_274 = arith.constant 0 : index
    %402 = vector.load %arg31[%c0_273, %c0_274] : memref<8x1xf32, #tpu.memory_space<vmem>>, vector<8x1xf32>
    %403 = vector.broadcast %402 : vector<8x1xf32> to vector<8x68xf32>
    %404 = arith.addf %401, %403 : vector<8x68xf32>
    %cst_275 = arith.constant 0.000000e+00 : f32
    %405 = vector.broadcast %cst_275 : f32 to vector<8x68xf32>
    %406 = arith.maximumf %404, %405 : vector<8x68xf32>
    %cst_276 = arith.constant 0.000000e+00 : f32
    %407 = vector.broadcast %cst_276 : f32 to vector<8x68xf32>
    %408 = arith.addf %407, %126 : vector<8x68xf32>
    %409 = arith.addf %408, %350 : vector<8x68xf32>
    %410 = arith.addf %406, %409 : vector<8x68xf32>
    %c0_277 = arith.constant 0 : index
    %c0_278 = arith.constant 0 : index
    %411 = vector.load %arg33[%c0_277, %c0_278] : memref<16x8xbf16, #tpu.memory_space<vmem>>, vector<16x8xbf16>
    %412 = arith.truncf %410 : vector<8x68xf32> to vector<8x68xbf16>
    %cst_279 = arith.constant dense<0.000000e+00> : vector<16x68xf32>
    %413 = tpu.matmul %411, %412, %cst_279 {dimension_numbers = #tpu.dot_dimension_numbers<[1], [0], [0], [1], [0, 0, 1, 1], [], []>} : vector<16x8xbf16>, vector<8x68xbf16>, vector<16x68xf32> -> vector<16x68xf32>
    %c0_280 = arith.constant 0 : index
    %c0_281 = arith.constant 0 : index
    %414 = vector.load %arg34[%c0_280, %c0_281] : memref<16x1xf32, #tpu.memory_space<vmem>>, vector<16x1xf32>
    %415 = vector.broadcast %414 : vector<16x1xf32> to vector<16x68xf32>
    %416 = arith.addf %413, %415 : vector<16x68xf32>
    %417 = vector.extract_strided_slice %416 {offsets = [0, 0], sizes = [8, 68], strides = [1, 1]} : vector<16x68xf32> to vector<8x68xf32>
    %418 = vector.extract_strided_slice %416 {offsets = [8, 0], sizes = [8, 68], strides = [1, 1]} : vector<16x68xf32> to vector<8x68xf32>
    %419 = arith.negf %418 : vector<8x68xf32>
    %420 = math.exp %419 : vector<8x68xf32>
    %cst_282 = arith.constant 1.000000e+00 : f32
    %421 = vector.broadcast %cst_282 : f32 to vector<8x68xf32>
    %422 = arith.addf %421, %420 : vector<8x68xf32>
    %423 = arith.divf %421, %422 : vector<8x68xf32>
    %424 = arith.mulf %417, %423 : vector<8x68xf32>
    %425 = arith.truncf %424 : vector<8x68xf32> to vector<8x68xbf16>
    %c0_283 = arith.constant 0 : index
    %c0_284 = arith.constant 0 : index
    %c0_285 = arith.constant 0 : index
    %426 = vector.load %arg32[%c0_283, %c0_284, %c0_285] : memref<8x68x276xbf16, #tpu.memory_space<vmem>>, vector<1x68x276xbf16>
    %427 = vector.shape_cast %426 : vector<1x68x276xbf16> to vector<68x276xbf16>
    %cst_286 = arith.constant dense<0.000000e+00> : vector<8x276xf32>
    %428 = tpu.matmul %425, %427, %cst_286 {dimension_numbers = #tpu.dot_dimension_numbers<[1], [0], [0], [1], [0, 0, 1, 1], [], []>} : vector<8x68xbf16>, vector<68x276xbf16>, vector<8x276xf32> -> vector<8x276xf32>
    %429 = arith.truncf %428 : vector<8x276xf32> to vector<8x276xbf16>
    %c1_287 = arith.constant 1 : index
    %c0_288 = arith.constant 0 : index
    %c0_289 = arith.constant 0 : index
    %430 = vector.load %arg32[%c1_287, %c0_288, %c0_289] : memref<8x68x276xbf16, #tpu.memory_space<vmem>>, vector<1x68x276xbf16>
    %431 = vector.shape_cast %430 : vector<1x68x276xbf16> to vector<68x276xbf16>
    %cst_290 = arith.constant dense<0.000000e+00> : vector<8x276xf32>
    %432 = tpu.matmul %425, %431, %cst_290 {dimension_numbers = #tpu.dot_dimension_numbers<[1], [0], [0], [1], [0, 0, 1, 1], [], []>} : vector<8x68xbf16>, vector<68x276xbf16>, vector<8x276xf32> -> vector<8x276xf32>
    %433 = arith.truncf %432 : vector<8x276xf32> to vector<8x276xbf16>
    %c2_291 = arith.constant 2 : index
    %c0_292 = arith.constant 0 : index
    %c0_293 = arith.constant 0 : index
    %434 = vector.load %arg32[%c2_291, %c0_292, %c0_293] : memref<8x68x276xbf16, #tpu.memory_space<vmem>>, vector<1x68x276xbf16>
    %435 = vector.shape_cast %434 : vector<1x68x276xbf16> to vector<68x276xbf16>
    %cst_294 = arith.constant dense<0.000000e+00> : vector<8x276xf32>
    %436 = tpu.matmul %425, %435, %cst_294 {dimension_numbers = #tpu.dot_dimension_numbers<[1], [0], [0], [1], [0, 0, 1, 1], [], []>} : vector<8x68xbf16>, vector<68x276xbf16>, vector<8x276xf32> -> vector<8x276xf32>
    %437 = arith.truncf %436 : vector<8x276xf32> to vector<8x276xbf16>
    %c3_295 = arith.constant 3 : index
    %c0_296 = arith.constant 0 : index
    %c0_297 = arith.constant 0 : index
    %438 = vector.load %arg32[%c3_295, %c0_296, %c0_297] : memref<8x68x276xbf16, #tpu.memory_space<vmem>>, vector<1x68x276xbf16>
    %439 = vector.shape_cast %438 : vector<1x68x276xbf16> to vector<68x276xbf16>
    %cst_298 = arith.constant dense<0.000000e+00> : vector<8x276xf32>
    %440 = tpu.matmul %425, %439, %cst_298 {dimension_numbers = #tpu.dot_dimension_numbers<[1], [0], [0], [1], [0, 0, 1, 1], [], []>} : vector<8x68xbf16>, vector<68x276xbf16>, vector<8x276xf32> -> vector<8x276xf32>
    %441 = arith.truncf %440 : vector<8x276xf32> to vector<8x276xbf16>
    %c4_299 = arith.constant 4 : index
    %c0_300 = arith.constant 0 : index
    %c0_301 = arith.constant 0 : index
    %442 = vector.load %arg32[%c4_299, %c0_300, %c0_301] : memref<8x68x276xbf16, #tpu.memory_space<vmem>>, vector<1x68x276xbf16>
    %443 = vector.shape_cast %442 : vector<1x68x276xbf16> to vector<68x276xbf16>
    %cst_302 = arith.constant dense<0.000000e+00> : vector<8x276xf32>
    %444 = tpu.matmul %425, %443, %cst_302 {dimension_numbers = #tpu.dot_dimension_numbers<[1], [0], [0], [1], [0, 0, 1, 1], [], []>} : vector<8x68xbf16>, vector<68x276xbf16>, vector<8x276xf32> -> vector<8x276xf32>
    %445 = arith.truncf %444 : vector<8x276xf32> to vector<8x276xbf16>
    %c5_303 = arith.constant 5 : index
    %c0_304 = arith.constant 0 : index
    %c0_305 = arith.constant 0 : index
    %446 = vector.load %arg32[%c5_303, %c0_304, %c0_305] : memref<8x68x276xbf16, #tpu.memory_space<vmem>>, vector<1x68x276xbf16>
    %447 = vector.shape_cast %446 : vector<1x68x276xbf16> to vector<68x276xbf16>
    %cst_306 = arith.constant dense<0.000000e+00> : vector<8x276xf32>
    %448 = tpu.matmul %425, %447, %cst_306 {dimension_numbers = #tpu.dot_dimension_numbers<[1], [0], [0], [1], [0, 0, 1, 1], [], []>} : vector<8x68xbf16>, vector<68x276xbf16>, vector<8x276xf32> -> vector<8x276xf32>
    %449 = arith.truncf %448 : vector<8x276xf32> to vector<8x276xbf16>
    %c6_307 = arith.constant 6 : index
    %c0_308 = arith.constant 0 : index
    %c0_309 = arith.constant 0 : index
    %450 = vector.load %arg32[%c6_307, %c0_308, %c0_309] : memref<8x68x276xbf16, #tpu.memory_space<vmem>>, vector<1x68x276xbf16>
    %451 = vector.shape_cast %450 : vector<1x68x276xbf16> to vector<68x276xbf16>
    %cst_310 = arith.constant dense<0.000000e+00> : vector<8x276xf32>
    %452 = tpu.matmul %425, %451, %cst_310 {dimension_numbers = #tpu.dot_dimension_numbers<[1], [0], [0], [1], [0, 0, 1, 1], [], []>} : vector<8x68xbf16>, vector<68x276xbf16>, vector<8x276xf32> -> vector<8x276xf32>
    %453 = arith.truncf %452 : vector<8x276xf32> to vector<8x276xbf16>
    %c7_311 = arith.constant 7 : index
    %c0_312 = arith.constant 0 : index
    %c0_313 = arith.constant 0 : index
    %454 = vector.load %arg32[%c7_311, %c0_312, %c0_313] : memref<8x68x276xbf16, #tpu.memory_space<vmem>>, vector<1x68x276xbf16>
    %455 = vector.shape_cast %454 : vector<1x68x276xbf16> to vector<68x276xbf16>
    %cst_314 = arith.constant dense<0.000000e+00> : vector<8x276xf32>
    %456 = tpu.matmul %425, %455, %cst_314 {dimension_numbers = #tpu.dot_dimension_numbers<[1], [0], [0], [1], [0, 0, 1, 1], [], []>} : vector<8x68xbf16>, vector<68x276xbf16>, vector<8x276xf32> -> vector<8x276xf32>
    %457 = arith.truncf %456 : vector<8x276xf32> to vector<8x276xbf16>
    %458 = tpu.concatenate %429, %433, %437, %441, %445, %449, %453, %457 in 0 : vector<8x276xbf16>, vector<8x276xbf16>, vector<8x276xbf16>, vector<8x276xbf16>, vector<8x276xbf16>, vector<8x276xbf16>, vector<8x276xbf16>, vector<8x276xbf16> -> vector<64x276xbf16>
    %c0_315 = arith.constant 0 : index
    %c0_316 = arith.constant 0 : index
    %459 = vector.load %arg35[%c0_315, %c0_316] : memref<1x64xbf16, #tpu.memory_space<vmem>>, vector<1x64xbf16>
    %cst_317 = arith.constant dense<0.000000e+00> : vector<1x276xf32>
    %460 = tpu.matmul %459, %458, %cst_317 {dimension_numbers = #tpu.dot_dimension_numbers<[1], [0], [0], [1], [0, 0, 1, 1], [], []>} : vector<1x64xbf16>, vector<64x276xbf16>, vector<1x276xf32> -> vector<1x276xf32>
    %c0_318 = arith.constant 0 : index
    %c0_319 = arith.constant 0 : index
    %461 = vector.load %arg36[%c0_318, %c0_319] : memref<1x1xf32, #tpu.memory_space<vmem>>, vector<1x1xf32>
    %462 = vector.broadcast %461 : vector<1x1xf32> to vector<1x276xf32>
    %463 = arith.addf %460, %462 : vector<1x276xf32>
    %464 = vector.extract_strided_slice %463 {offsets = [0, 0], sizes = [1, 256], strides = [1, 1]} : vector<1x276xf32> to vector<1x256xf32>
    %465 = vector.broadcast %17 : vector<1x1xf32> to vector<1x256xf32>
    %466 = arith.mulf %465, %464 : vector<1x256xf32>
    %c0_320 = arith.constant 0 : index
    %c0_321 = arith.constant 0 : index
    %c0_322 = arith.constant 0 : index
    %467 = vector.load %arg37[%c0_320, %c0_321, %c0_322] : memref<1x1x256xf32, #tpu.memory_space<vmem>>, vector<1x1x256xf32>
    %468 = vector.shape_cast %467 : vector<1x1x256xf32> to vector<1x256xf32>
    %469 = vector.shape_cast %466 : vector<1x256xf32> to vector<1x1x256xf32>
    tpu.vector_store %arg37[%c0_320, %c0_321, %c0_322], %469 {strides = array<i32>} : memref<1x1x256xf32, #tpu.memory_space<vmem>>, vector<1x1x256xf32>,
    return
  }
  func.func @transform_0(%arg0: i32) -> (i32, i32, i32) {
    %c0_i32 = arith.constant 0 : i32
    %c0_i32_0 = arith.constant 0 : i32
    %c0_i32_1 = arith.constant 0 : i32
    return %arg0, %c0_i32, %c0_i32_0 : i32, i32, i32
  }
  func.func @transform_1(%arg0: i32) -> (i32, i32, i32) {
    %c0_i32 = arith.constant 0 : i32
    %c0_i32_0 = arith.constant 0 : i32
    %c0_i32_1 = arith.constant 0 : i32
    %c0_i32_2 = arith.constant 0 : i32
    return %c0_i32, %c0_i32_0, %c0_i32_1 : i32, i32, i32
  }
  func.func @transform_2(%arg0: i32) -> (i32, i32) {
    %c0_i32 = arith.constant 0 : i32
    %c0_i32_0 = arith.constant 0 : i32
    %c0_i32_1 = arith.constant 0 : i32
    return %c0_i32, %c0_i32_0 : i32, i32
  }
  func.func @transform_3(%arg0: i32) -> (i32, i32) {
    %c0_i32 = arith.constant 0 : i32
    %c0_i32_0 = arith.constant 0 : i32
    %c0_i32_1 = arith.constant 0 : i32
    return %c0_i32, %c0_i32_0 : i32, i32
  }
  func.func @transform_4(%arg0: i32) -> (i32, i32) {
    %c0_i32 = arith.constant 0 : i32
    %c0_i32_0 = arith.constant 0 : i32
    %c0_i32_1 = arith.constant 0 : i32
    return %c0_i32, %c0_i32_0 : i32, i32
  }
  func.func @transform_5(%arg0: i32) -> (i32, i32) {
    %c0_i32 = arith.constant 0 : i32
    %c0_i32_0 = arith.constant 0 : i32
    %c0_i32_1 = arith.constant 0 : i32
    return %c0_i32, %c0_i32_0 : i32, i32
  }
  func.func @transform_6(%arg0: i32) -> (i32, i32, i32) {
    %c0_i32 = arith.constant 0 : i32
    %c0_i32_0 = arith.constant 0 : i32
    %c0_i32_1 = arith.constant 0 : i32
    %c0_i32_2 = arith.constant 0 : i32
    return %c0_i32, %c0_i32_0, %c0_i32_1 : i32, i32, i32
  }
  func.func @transform_7(%arg0: i32) -> (i32, i32) {
    %c0_i32 = arith.constant 0 : i32
    %c0_i32_0 = arith.constant 0 : i32
    %c0_i32_1 = arith.constant 0 : i32
    return %c0_i32, %c0_i32_0 : i32, i32
  }
  func.func @transform_8(%arg0: i32) -> (i32, i32) {
    %c0_i32 = arith.constant 0 : i32
    %c0_i32_0 = arith.constant 0 : i32
    %c0_i32_1 = arith.constant 0 : i32
    return %c0_i32, %c0_i32_0 : i32, i32
  }
  func.func @transform_9(%arg0: i32) -> (i32, i32) {
    %c0_i32 = arith.constant 0 : i32
    %c0_i32_0 = arith.constant 0 : i32
    %c0_i32_1 = arith.constant 0 : i32
    return %c0_i32, %c0_i32_0 : i32, i32
  }
  func.func @transform_10(%arg0: i32) -> (i32, i32) {
    %c0_i32 = arith.constant 0 : i32
    %c0_i32_0 = arith.constant 0 : i32
    %c0_i32_1 = arith.constant 0 : i32
    return %c0_i32, %c0_i32_0 : i32, i32
  }
  func.func @transform_11(%arg0: i32) -> (i32, i32, i32) {
    %c0_i32 = arith.constant 0 : i32
    %c0_i32_0 = arith.constant 0 : i32
    %c0_i32_1 = arith.constant 0 : i32
    %c0_i32_2 = arith.constant 0 : i32
    return %c0_i32, %c0_i32_0, %c0_i32_1 : i32, i32, i32
  }
  func.func @transform_12(%arg0: i32) -> (i32, i32) {
    %c0_i32 = arith.constant 0 : i32
    %c0_i32_0 = arith.constant 0 : i32
    %c0_i32_1 = arith.constant 0 : i32
    return %c0_i32, %c0_i32_0 : i32, i32
  }
  func.func @transform_13(%arg0: i32) -> (i32, i32) {
    %c0_i32 = arith.constant 0 : i32
    %c0_i32_0 = arith.constant 0 : i32
    %c0_i32_1 = arith.constant 0 : i32
    return %c0_i32, %c0_i32_0 : i32, i32
  }
  func.func @transform_14(%arg0: i32) -> (i32, i32) {
    %c0_i32 = arith.constant 0 : i32
    %c0_i32_0 = arith.constant 0 : i32
    %c0_i32_1 = arith.constant 0 : i32
    return %c0_i32, %c0_i32_0 : i32, i32
  }
  func.func @transform_15(%arg0: i32) -> (i32, i32) {
    %c0_i32 = arith.constant 0 : i32
    %c0_i32_0 = arith.constant 0 : i32
    %c0_i32_1 = arith.constant 0 : i32
    return %c0_i32, %c0_i32_0 : i32, i32
  }
  func.func @transform_16(%arg0: i32) -> (i32, i32, i32) {
    %c0_i32 = arith.constant 0 : i32
    %c0_i32_0 = arith.constant 0 : i32
    %c0_i32_1 = arith.constant 0 : i32
    %c0_i32_2 = arith.constant 0 : i32
    return %c0_i32, %c0_i32_0, %c0_i32_1 : i32, i32, i32
  }
  func.func @transform_17(%arg0: i32) -> (i32, i32) {
    %c0_i32 = arith.constant 0 : i32
    %c0_i32_0 = arith.constant 0 : i32
    %c0_i32_1 = arith.constant 0 : i32
    return %c0_i32, %c0_i32_0 : i32, i32
  }
  func.func @transform_18(%arg0: i32) -> (i32, i32) {
    %c0_i32 = arith.constant 0 : i32
    %c0_i32_0 = arith.constant 0 : i32
    %c0_i32_1 = arith.constant 0 : i32
    return %c0_i32, %c0_i32_0 : i32, i32
  }
  func.func @transform_19(%arg0: i32) -> (i32, i32) {
    %c0_i32 = arith.constant 0 : i32
    %c0_i32_0 = arith.constant 0 : i32
    %c0_i32_1 = arith.constant 0 : i32
    return %c0_i32, %c0_i32_0 : i32, i32
  }
  func.func @transform_20(%arg0: i32) -> (i32, i32) {
    %c0_i32 = arith.constant 0 : i32
    %c0_i32_0 = arith.constant 0 : i32
    %c0_i32_1 = arith.constant 0 : i32
    return %c0_i32, %c0_i32_0 : i32, i32
  }
  func.func @transform_21(%arg0: i32) -> (i32, i32, i32) {
    %c0_i32 = arith.constant 0 : i32
    %c0_i32_0 = arith.constant 0 : i32
    %c0_i32_1 = arith.constant 0 : i32
    %c0_i32_2 = arith.constant 0 : i32
    return %c0_i32, %c0_i32_0, %c0_i32_1 : i32, i32, i32
  }
  func.func @transform_22(%arg0: i32) -> (i32, i32) {
    %c0_i32 = arith.constant 0 : i32
    %c0_i32_0 = arith.constant 0 : i32
    %c0_i32_1 = arith.constant 0 : i32
    return %c0_i32, %c0_i32_0 : i32, i32
  }
  func.func @transform_23(%arg0: i32) -> (i32, i32) {
    %c0_i32 = arith.constant 0 : i32
    %c0_i32_0 = arith.constant 0 : i32
    %c0_i32_1 = arith.constant 0 : i32
    return %c0_i32, %c0_i32_0 : i32, i32
  }
  func.func @transform_24(%arg0: i32) -> (i32, i32) {
    %c0_i32 = arith.constant 0 : i32
    %c0_i32_0 = arith.constant 0 : i32
    %c0_i32_1 = arith.constant 0 : i32
    return %c0_i32, %c0_i32_0 : i32, i32
  }
  func.func @transform_25(%arg0: i32) -> (i32, i32) {
    %c0_i32 = arith.constant 0 : i32
    %c0_i32_0 = arith.constant 0 : i32
    %c0_i32_1 = arith.constant 0 : i32
    return %c0_i32, %c0_i32_0 : i32, i32
  }
  func.func @transform_26(%arg0: i32) -> (i32, i32, i32) {
    %c0_i32 = arith.constant 0 : i32
    %c0_i32_0 = arith.constant 0 : i32
    %c0_i32_1 = arith.constant 0 : i32
    %c0_i32_2 = arith.constant 0 : i32
    return %c0_i32, %c0_i32_0, %c0_i32_1 : i32, i32, i32
  }
  func.func @transform_27(%arg0: i32) -> (i32, i32) {
    %c0_i32 = arith.constant 0 : i32
    %c0_i32_0 = arith.constant 0 : i32
    %c0_i32_1 = arith.constant 0 : i32
    return %c0_i32, %c0_i32_0 : i32, i32
  }
  func.func @transform_28(%arg0: i32) -> (i32, i32) {
    %c0_i32 = arith.constant 0 : i32
    %c0_i32_0 = arith.constant 0 : i32
    %c0_i32_1 = arith.constant 0 : i32
    return %c0_i32, %c0_i32_0 : i32, i32
  }
  func.func @transform_29(%arg0: i32) -> (i32, i32) {
    %c0_i32 = arith.constant 0 : i32
    %c0_i32_0 = arith.constant 0 : i32
    %c0_i32_1 = arith.constant 0 : i32
    return %c0_i32, %c0_i32_0 : i32, i32
  }
  func.func @transform_30(%arg0: i32) -> (i32, i32) {
    %c0_i32 = arith.constant 0 : i32
    %c0_i32_0 = arith.constant 0 : i32
    %c0_i32_1 = arith.constant 0 : i32
    return %c0_i32, %c0_i32_0 : i32, i32
  }
  func.func @transform_31(%arg0: i32) -> (i32, i32, i32) {
    %c0_i32 = arith.constant 0 : i32
    %c0_i32_0 = arith.constant 0 : i32
    %c0_i32_1 = arith.constant 0 : i32
    %c0_i32_2 = arith.constant 0 : i32
    return %c0_i32, %c0_i32_0, %c0_i32_1 : i32, i32, i32
  }
  func.func @transform_32(%arg0: i32) -> (i32, i32) {
    %c0_i32 = arith.constant 0 : i32
    %c0_i32_0 = arith.constant 0 : i32
    %c0_i32_1 = arith.constant 0 : i32
    return %c0_i32, %c0_i32_0 : i32, i32
  }
  func.func @transform_33(%arg0: i32) -> (i32, i32) {
    %c0_i32 = arith.constant 0 : i32
    %c0_i32_0 = arith.constant 0 : i32
    %c0_i32_1 = arith.constant 0 : i32
    return %c0_i32, %c0_i32_0 : i32, i32
  }
  func.func @transform_34(%arg0: i32) -> (i32, i32) {
    %c0_i32 = arith.constant 0 : i32
    %c0_i32_0 = arith.constant 0 : i32
    %c0_i32_1 = arith.constant 0 : i32
    return %c0_i32, %c0_i32_0 : i32, i32
  }
  func.func @transform_35(%arg0: i32) -> (i32, i32) {
    %c0_i32 = arith.constant 0 : i32
    %c0_i32_0 = arith.constant 0 : i32
    %c0_i32_1 = arith.constant 0 : i32
    return %c0_i32, %c0_i32_0 : i32, i32
  }
  func.func @transform_36(%arg0: i32) -> (i32, i32, i32) {
    %c0_i32 = arith.constant 0 : i32
    %c0_i32_0 = arith.constant 0 : i32
    %c0_i32_1 = arith.constant 0 : i32
    return %arg0, %c0_i32, %c0_i32_0 : i32, i32, i32
  }
}

</mosaic_0001>

<bundles_post_ra>
// kernel: forward.1
= control target key start
LH: loop header
LB: loop body
LE: loop exit
PB: predicated region body
PF: predicated region fallthrough
CT: control target
= control target key end

     0   :  { %s10869_s6 = smov 1   ;;  %s10870_s10 = smov 2   ;;  %s11959_s0 = inlined_call_operand.smem [shape: u32[37], index: -1, kind: input, shape index: {}] }
   0x1   :  { %s10956_s5 = sld [smem:[%s11959_s0]]   ;;  %s10871_s14 = smov 3  }
   0x2   :  { %s10961_s9 = sld [smem:[%s11959_s0 + %s10869_s6]]   ;;  %s10872_s18 = smov 4  }
   0x3   :  { %s10966_s13 = sld [smem:[%s11959_s0 + %s10870_s10]]   ;;  %s10873_s22 = smov 5  }
   0x4   :  { %s10971_s17 = sld [smem:[%s11959_s0 + %s10871_s14]]   ;;  %s10874_s26 = smov 6  }
   0x5   :  { %s10976_s21 = sld [smem:[%s11959_s0 + %s10872_s18]]   ;;  %s10875_s30 = smov 7  }
   0x6   :  { %s10981_s25 = sld [smem:[%s11959_s0 + %s10873_s22]]   ;;  %s10876_s4 = smov 8  }
   0x7   :  { %11977 = sst [smem:[#allocation65_spill]] %s10956_s5  ;;  %s10877_s10 = smov 9  }
   0x8   :  { %11978 = sst [smem:[#allocation66_spill]] %s10961_s9  ;;  %s10878_s15 = smov 10  }
   0x9   :  { %11979 = sst [smem:[#allocation67_spill]] %s10966_s13  ;;  %s10879_s20 = smov 11  }
   0xa   :  { %11980 = sst [smem:[#allocation68_spill]] %s10971_s17  ;;  %s10881_s1 = smov 13  }
   0xb   :  { %11981 = sst [smem:[#allocation69_spill]] %s10976_s21  ;;  %s10882_s7 = smov 14  }
   0xc   :  { %11982 = sst [smem:[#allocation70_spill]] %s10981_s25  ;;  %s10884_s22 = smov 16  }
   0xd   :  { %s10986_s29 = sld [smem:[%s11959_s0 + %s10874_s26]]   ;;  %s10880_s26 = smov 12  }
   0xe   :  { %s10991_s3 = sld [smem:[%s11959_s0 + %s10875_s30]]   ;;  %s10885_s28 = smov 17  }
   0xf   :  { %s10996_s8 = sld [smem:[%s11959_s0 + %s10876_s4]]   ;;  %s10904_s23 = smov 36  }
  0x10   :  { %s11001_s14 = sld [smem:[%s11959_s0 + %s10877_s10]]  }
  0x11   :  { %s11006_s19 = sld [smem:[%s11959_s0 + %s10878_s15]]   ;;  %s10883_s15 = smov 15  }
  0x12   :  { %s11011_s24 = sld [smem:[%s11959_s0 + %s10879_s20]]  }
  0x13   :  { %s11016_s30 = sld [smem:[%s11959_s0 + %s10880_s26]]  }
  0x14   :  { %11983 = sst [smem:[#allocation71_spill]] %s10991_s3 }
  0x15   :  { %11984 = sst [smem:[#allocation72_spill]] %s10996_s8 }
  0x16   :  { %11985 = sst [smem:[#allocation73_spill]] %s11001_s14 }
  0x17   :  { %s11021_s6 = sld [smem:[%s11959_s0 + %s10881_s1]]  }
  0x18   :  { %11986 = sst [smem:[#allocation74_spill]] %s11011_s24 }
  0x19   :  { %s11026_s12 = sld [smem:[%s11959_s0 + %s10882_s7]]   ;;  %s10886_s7 = smov 18  }
  0x1a   :  { %s11031_s20 = sld [smem:[%s11959_s0 + %s10883_s15]]   ;;  %s10887_s15 = smov 19  }
  0x1b   :  { %s11036_s27 = sld [smem:[%s11959_s0 + %s10884_s22]]   ;;  %s10888_s22 = smov 20  }
  0x1c   :  { %s11041_s4 = sld [smem:[%s11959_s0 + %s10885_s28]]   ;;  %s10889_s28 = smov 21  }
  0x1d   :  { %11987 = sst [smem:[#allocation75_spill]] %s11021_s6 }
  0x1e   :  { %s11046_s5 = sld [smem:[%s11959_s0 + %s10886_s7]]   ;;  %s10890_s7 = smov 22  }
  0x1f   :  { %11988 = sst [smem:[#allocation76_spill]] %s11026_s12 }
  0x20   :  { %11989 = sst [smem:[#allocation77_spill]] %s11031_s20 }
  0x21   :  { %s11051_s20 = sld [smem:[%s11959_s0 + %s10887_s15]]   ;;  %s10891_s15 = smov 23  }
  0x22   :  { %11990 = sst [smem:[#allocation78_spill]] %s11041_s4 }
  0x23   :  { %s11056_s6 = sld [smem:[%s11959_s0 + %s10888_s22]]   ;;  %s10892_s22 = smov 24  }
  0x24   :  { %11991 = sst [smem:[#allocation79_spill]] %s11046_s5 }
  0x25   :  { %s11061_s4 = sld [smem:[%s11959_s0 + %s10889_s28]]   ;;  %s10893_s28 = smov 25  }
  0x26   :  { %s11066_s24 = sld [smem:[%s11959_s0 + %s10890_s7]]   ;;  %s10894_s7 = smov 26  }
  0x27   :  { %11992 = sst [smem:[#allocation80_spill]] %s11051_s20 }
  0x28   :  { %s11071_s20 = sld [smem:[%s11959_s0 + %s10891_s15]]   ;;  %s10895_s15 = smov 27  }
  0x29   :  { %s11076_s14 = sld [smem:[%s11959_s0 + %s10892_s22]]   ;;  %s10896_s22 = smov 28  }
  0x2a   :  { %s11086_s3 = sld [smem:[%s11959_s0 + %s10894_s7]]   ;;  %s10898_s7 = smov 30  }
  0x2b   :  { %11993 = sst [smem:[#allocation81_spill]] %s11061_s4 }
  0x2c   :  { %s11081_s4 = sld [smem:[%s11959_s0 + %s10893_s28]]   ;;  %s10897_s28 = smov 29  }
  0x2d   :  { %s11096_s25 = sld [smem:[%s11959_s0 + %s10896_s22]]   ;;  %s10900_s22 = smov 32  }
  0x2e   :  { %11994 = sst [smem:[#allocation82_spill]] %s11071_s20 }
  0x2f   :  { %s11091_s20 = sld [smem:[%s11959_s0 + %s10895_s15]]   ;;  %s10899_s15 = smov 31  }
  0x30   :  { %11996 = sst [smem:[#allocation84_spill]] %s11086_s3 }
  0x31   :  { %s11106_s17 = sld [smem:[%s11959_s0 + %s10898_s7]]   ;;  %s10902_s7 = smov 34  }
  0x32   :  { %11995 = sst [smem:[#allocation83_spill]] %s11081_s4 }
  0x33   :  { %11998 = sst [smem:[#allocation86_spill]] %s11096_s25 }
  0x34   :  { %s11101_s4 = sld [smem:[%s11959_s0 + %s10897_s28]]   ;;  %s10901_s28 = smov 33  }
  0x35   :  { %11997 = sst [smem:[#allocation85_spill]] %s11091_s20 }
  0x36   :  { %s11111_s20 = sld [smem:[%s11959_s0 + %s10899_s15]]   ;;  %s10903_s15 = smov 35  }
  0x37   :  { %s11116_s25 = sld [smem:[%s11959_s0 + %s10900_s22]]  }
  0x38   :  { %s11126_s9 = sld [smem:[%s11959_s0 + %s10902_s7]]  }
  0x3a   :  { %11999 = sst [smem:[#allocation87_spill]] %s11101_s4 }
  0x3b   :  { %s11121_s4 = sld [smem:[%s11959_s0 + %s10901_s28]]  }
  0x3c   :  { %12000 = sst [smem:[#allocation88_spill]] %s11111_s20 }
  0x3d   :  { %12001 = sst [smem:[#allocation89_spill]] %s11116_s25 }
  0x3e   :  { %s7938_s20 = sld [smem:[%s11959_s0 + %s10903_s15]]  }
  0x3f   :  { %s11134_s25 = sld [smem:[%s11959_s0 + %s10904_s23]]  }
  0x44   :  { %v78_v0 = vstv %s7938_s20 }
  0x45   :  { %79 = vst [vmem:[#allocation2] sm:$0x1] %v78_v0 }
  0x46   :  { %80 = vsyncpa [#allocation4], 0 }
  0x47   :  { %81 = vsyncpa [#allocation7], 0 }
  0x48   :  { %82 = vsyncpa [#allocation10], 0 }
  0x49   :  { %83 = vsyncpa [#allocation13], 0 }
  0x4a   :  { %84 = vsyncpa [#allocation16], 0 }
  0x4b   :  { %85 = vsyncpa [#allocation19], 0 }
  0x4c   :  { %86 = vsyncpa [#allocation22], 0 }
  0x4d   :  { %87 = vsyncpa [#allocation25], 0 }
  0x4e   :  { %88 = vsyncpa [#allocation28], 0 }
  0x4f   :  { %89 = vsyncpa [#allocation31], 0 }
  0x50   :  { %90 = vsyncpa [#allocation34], 0 }
  0x51   :  { %91 = vsyncpa [#allocation37], 0 }
  0x52   :  { %92 = vsyncpa [#allocation40], 0 }
  0x53   :  { %93 = vsyncpa [#allocation43], 0 }
  0x54   :  { %94 = vsyncpa [#allocation46], 0 }
  0x55   :  { %95 = vsyncpa [#allocation5], 0 }
  0x56   :  { %97 = vsyncpa [#allocation5 + $0x1], 0  ;;  %s11136_s0 = smov 0   ;;  %s11138_s20 = smov 0  }
  0x57   :  { %s11140_s28 = smov 0   ;;  %s11142_s1 = smov 0  }
  0x58 LB: > { %12002 = sst [smem:[#allocation90_spill]] %s10855_s0  ;;  %s11157_s2 = sadd.s32 4294967295, %s10867_s1   ;;  %s10867_s1 = sphi %s11142_s1, %s12074_s1   ;;  %s10863_s28 = sphi %s11140_s28, %s12076_s28   ;;  %s10859_s20 = sphi %s11138_s20, %s12078_s20   ;;  %s10855_s0 = sphi %s11136_s0, %s12077_s0  }
  0x59   : > { %12003 = sst [smem:[#allocation91_spill]] %s10863_s28  ;;  %s7941_s7 = sadd.s32 4294967294, %s10867_s1  }
  0x5a   : > { %s11161_s10 = sadd.s32 1, %s10867_s1   ;;  %s871_s11 = sadd.s32 1, %s10863_s28 }
  0x5b   : > { %12004 = sst [smem:[#allocation92_spill]] %s11161_s10  ;;  %s868_s15 = ssub.s32 %s10867_s1, %s11161_s10 }
  0x5c   : > { %p881_p0 = scmp.ne.s32.totalorder %s10863_s28, %s10859_s20  ;;  %p869_p1 = scmp.eq.s32.totalorder %s868_s15, 0 }
  0x5d   : > { %p882_p2 = scmp.eq.s32.totalorder %s11157_s2, 1  ;;  %p887_p3 = scmp.ne.s32.totalorder %s10859_s20, %s10855_s0 }
  0x5e   : > { %p888_p4 = scmp.eq.s32.totalorder %s7941_s7, 1  ;;  %p7942_p7 = scmp.ge.s32.totalorder %s10867_s1, 1 }
  0x5f   : > { %s11172_s16 = scalar_select %p869_p1, %s10863_s28, %s871_s11  }
  0x60   : > { %p11174_p5 = por %p882_p2, %p881_p0  ;;  %p11178_p6 = por %p888_p4, %p887_p3 }
  0x61   : > { %12005 = sst [smem:[#allocation93_spill]] %s11172_s16  ;;  %p895_p8 = scmp.lt.s32.totalorder %s10867_s1, 3 }
  0x62   : > { %s12006_s18 = scalar_select %p11174_p5, 1, 0 }
  0x63   : > { %s12007_s23 = scalar_select %p11178_p6, 1, 0 }
  0x64   : > { %p11965_p9 = scmp.eq.s32.totalorder %s11157_s2, 0  ;;  %p11185_p10 = pnand %p7942_p7, %p895_p8 }
  0x65   : > { %12008 = sst [smem:[#allocation94_spill]] %s12007_s23  ;;  %s10905_s26 = smov [#allocation6]  }
  0x66   : > { %s12009_s22 = scalar_select %p11185_p10, 1, 0 }
  0x67   : > { %s921_s7 = sshll.u32 %s10905_s26, 4  ;;  %p9335_p11 = pneg %p11185_p10  ;;  %s922_s7 = int_to_ptr.vmem [resolvable:$true] %s921_s7 }
  0x68   : > { %s10906_s15 = smov [#allocation9]   ;;  %s10907_s28 = smov [#allocation12]  }
  0x69   : > { %p11193_p12 = pnand %p11965_p9, %p9335_p11  ;;  %s942_s16 = sshll.u32 %s10906_s15, 4  ;;  %s943_s16 = int_to_ptr.vmem [resolvable:$true] %s942_s16 }
  0x6a   : > { %s968_s10 = sshll.u32 %s10907_s28, 4  ;;  %s10004_s26 = scalar_lea.vmem %s922_s7, 64  ;;  %s969_s10 = int_to_ptr.vmem [resolvable:$true] %s968_s10 }
  0x6b   : > { %p11199_p13 = pneg %p11193_p12  ;;  %p10005_p0 = scmp.ne.s32.totalorder %s922_s7, %s10004_s26 }
  0x6c   : > { %p10012_p3 = scmp.lt.s32.totalorder %s922_s7, %s922_s7  ;;  %p10013_p4 = scmp.lt.s32.totalorder %s10004_s26, %s10004_s26 }
  0x6d   : > { %p10007_p1 = pnand %p10005_p0, %p11199_p13 }
  0x6e   : > { %p10014_p7 = por %p10013_p4, %p10012_p3 }
  0x6f   : > { %p10008_p2 = pneg %p10007_p1 }
  0x71   : > { %p10015_p8 = pnand %p10014_p7, %p10008_p2 }
  0x73   : > { %10018 = shalt.err (!%p10015_p8)
}
  0x74   : > { %s12012_s13 = sld [smem:[#allocation67_spill]]  ;;  %s10030_s28 = scalar_lea.vmem %s943_s16, 128 }
  0x75   : > { %p10031_p11 = scmp.ne.s32.totalorder %s943_s16, %s10030_s28  ;;  %p10038_p5 = scmp.lt.s32.totalorder %s943_s16, %s943_s16 }
  0x76   : > { %p10039_p10 = scmp.lt.s32.totalorder %s10030_s28, %s10030_s28 }
  0x77   : > { %p10033_p9 = pnand %p10031_p11, %p11199_p13 }
  0x78   : > { %p10040_p0 = por %p10039_p10, %p10038_p5 }
  0x79   : > { %p10034_p6 = pneg %p10033_p9 }
  0x7a   : > { %9341 = dma.hbm_to_vmem [thread:$0]  (!%p11193_p12), %s12012_s13, 64, %s922_s7, [#allocation7]  }
  0x7b   : > { %p10041_p1 = pnand %p10040_p0, %p10034_p6 }
  0x7d   : > { %10044 = shalt.err (!%p10041_p1)
}
  0x7e   : > { %s11969_s15 = smov 64   ;;  %s12013_s21 = sld [smem:[#allocation69_spill]] }
  0x7f   : > { %s11971_s26 = smov 4   ;;  %s10056_s7 = scalar_lea.vmem %s969_s10, 4608 }
  0x80   : > { %p10057_p2 = scmp.ne.s32.totalorder %s969_s10, %s10056_s7  ;;  %p10064_p4 = scmp.lt.s32.totalorder %s969_s10, %s969_s10 }
  0x81   : > { %p10065_p5 = scmp.lt.s32.totalorder %s10056_s7, %s10056_s7 }
  0x82   : > { %p10059_p9 = pnand %p10057_p2, %p11199_p13 }
  0x83   : > { %p10066_p6 = por %p10065_p5, %p10064_p4 }
  0x84   : > { %9347 = dma.hbm_to_vmem [thread:$0]  (!%p11193_p12), %s12013_s21, 128, %s943_s16, [#allocation10], %s11969_s15, %s11969_s15, %s11971_s26  }
  0x85   : > { %p10060_p3 = pneg %p10059_p9 }
  0x87   : > { %p10067_p10 = pnand %p10066_p6, %p10060_p3 }
  0x89   : > { %10070 = shalt.err (!%p10067_p10)
}
  0x8a   : > { %9353 = dma.hbm_to_vmem [thread:$0]  (!%p11193_p12), %s10986_s29, 4608, %s969_s10, [#allocation13], %s11969_s15, %s11969_s15, %s11971_s26  }
  0x8b   : > { %s10910_s16 = smov [#allocation15]   ;;  %s10911_s13 = smov [#allocation18]  }
  0x8c   : > { %s994_s28 = sshll.u32 %s10910_s16, 4  ;;  %s1020_s21 = sshll.u32 %s10911_s13, 4  ;;  %s995_s28 = int_to_ptr.vmem [resolvable:$true] %s994_s28  ;;  %s1021_s21 = int_to_ptr.vmem [resolvable:$true] %s1020_s21 }
  0x8d   : > { %s10082_s0 = scalar_lea.vmem %s995_s28, 256  ;;  %p10090_p0 = scmp.lt.s32.totalorder %s995_s28, %s995_s28 }
  0x8e   : > { %p10083_p7 = scmp.ne.s32.totalorder %s995_s28, %s10082_s0  ;;  %p10091_p1 = scmp.lt.s32.totalorder %s10082_s0, %s10082_s0 }
  0x90   : > { %p10085_p8 = pnand %p10083_p7, %p11199_p13  ;;  %p10092_p2 = por %p10091_p1, %p10090_p0 }
  0x92   : > { %p10086_p11 = pneg %p10085_p8 }
  0x94   : > { %p10093_p9 = pnand %p10092_p2, %p10086_p11 }
  0x96   : > { %10096 = shalt.err (!%p10093_p9)
}
  0x97   : > { %s11973_s7 = smov 128   ;;  %s12014_s8 = sld [smem:[#allocation72_spill]] }
  0x98   : > { %s11975_s10 = smov 8   ;;  %s10108_s13 = scalar_lea.vmem %s1021_s21, 512 }
  0x99   : > { %p10109_p3 = scmp.ne.s32.totalorder %s1021_s21, %s10108_s13  ;;  %p10116_p6 = scmp.lt.s32.totalorder %s1021_s21, %s1021_s21 }
  0x9a   : > { %p10117_p10 = scmp.lt.s32.totalorder %s10108_s13, %s10108_s13 }
  0x9b   : > { %p10111_p4 = pnand %p10109_p3, %p11199_p13 }
  0x9c   : > { %p10118_p7 = por %p10117_p10, %p10116_p6 }
  0x9d   : > { %9359 = dma.hbm_to_vmem [thread:$0]  (!%p11193_p12), %s12014_s8, 256, %s995_s28, [#allocation16], %s11973_s7, %s11973_s7, %s11975_s10  }
  0x9e   : > { %p10112_p5 = pneg %p10111_p4 }
  0xa0   : > { %p10119_p8 = pnand %p10118_p7, %p10112_p5 }
  0xa2   : > { %10122 = shalt.err (!%p10119_p8)
}
  0xa3   : > { %9365 = dma.hbm_to_vmem [thread:$0]  (!%p11193_p12), %s11006_s19, 512, %s1021_s21, [#allocation19], %s11973_s7, %s11973_s7, %s11975_s10  }
  0xa4   : > { %s10914_s0 = smov [#allocation21]   ;;  %s10915_s28 = smov [#allocation24]  }
  0xa5   : > { %s1046_s16 = sshll.u32 %s10914_s0, 4  ;;  %s1072_s15 = sshll.u32 %s10915_s28, 4  ;;  %s1047_s16 = int_to_ptr.vmem [resolvable:$true] %s1046_s16  ;;  %s1073_s15 = int_to_ptr.vmem [resolvable:$true] %s1072_s15 }
  0xa6   : > { %s10134_s26 = scalar_lea.vmem %s1047_s16, 256  ;;  %p10142_p2 = scmp.lt.s32.totalorder %s1047_s16, %s1047_s16 }
  0xa7   : > { %p10135_p11 = scmp.ne.s32.totalorder %s1047_s16, %s10134_s26  ;;  %p10143_p9 = scmp.lt.s32.totalorder %s10134_s26, %s10134_s26 }
  0xa9   : > { %p10137_p0 = pnand %p10135_p11, %p11199_p13  ;;  %p10144_p3 = por %p10143_p9, %p10142_p2 }
  0xab   : > { %p10138_p1 = pneg %p10137_p0 }
  0xad   : > { %p10145_p4 = pnand %p10144_p3, %p10138_p1 }
  0xaf   : > { %10148 = shalt.err (!%p10145_p4)
}
  0xb0   : > { %s12015_s13 = smov 4   ;;  %s12016_s8 = smov 64  }
  0xb1   : > { %9371 = dma.hbm_to_vmem [thread:$0]  (!%p11193_p12), %s11016_s30, 256, %s1047_s16, [#allocation22], %s12016_s8, %s12016_s8, %s12015_s13  }
  0xb2   : > { %s10160_s21 = scalar_lea.vmem %s1073_s15, 512  ;;  %p10168_p7 = scmp.lt.s32.totalorder %s1073_s15, %s1073_s15 }
  0xb3   : > { %p10161_p5 = scmp.ne.s32.totalorder %s1073_s15, %s10160_s21  ;;  %p10169_p8 = scmp.lt.s32.totalorder %s10160_s21, %s10160_s21 }
  0xb5   : > { %p10163_p6 = pnand %p10161_p5, %p11199_p13  ;;  %p10170_p11 = por %p10169_p8, %p10168_p7 }
  0xb7   : > { %p10164_p10 = pneg %p10163_p6 }
  0xb9   : > { %p10171_p0 = pnand %p10170_p11, %p10164_p10 }
  0xbb   : > { %10174 = shalt.err (!%p10171_p0)
}
  0xbc   : > { %s12017_s12 = sld [smem:[#allocation76_spill]]  ;;  %s10916_s26 = smov [#allocation27]  }
  0xbd   : > { %s1098_s0 = sshll.u32 %s10916_s26, 4  ;;  %s1099_s0 = int_to_ptr.vmem [resolvable:$true] %s1098_s0 }
  0xbe   : > { %s10186_s16 = scalar_lea.vmem %s1099_s0, 256  ;;  %p10194_p3 = scmp.lt.s32.totalorder %s1099_s0, %s1099_s0 }
  0xbf   : > { %p10187_p1 = scmp.ne.s32.totalorder %s1099_s0, %s10186_s16  ;;  %p10195_p4 = scmp.lt.s32.totalorder %s10186_s16, %s10186_s16 }
  0xc1   : > { %p10189_p2 = pnand %p10187_p1, %p11199_p13  ;;  %p10196_p5 = por %p10195_p4, %p10194_p3 }
  0xc2   : > { %9377 = dma.hbm_to_vmem [thread:$0]  (!%p11193_p12), %s12017_s12, 512, %s1073_s15, [#allocation25], %s12016_s8, %s12016_s8, %s12015_s13  }
  0xc3   : > { %p10190_p9 = pneg %p10189_p2 }
  0xc5   : > { %p10197_p6 = pnand %p10196_p5, %p10190_p9 }
  0xc7   : > { %10200 = shalt.err (!%p10197_p6)
}
  0xc8   : > { %s10917_s28 = smov 32   ;;  %s10918_s21 = smov 2  }
  0xc9   : > { %9383 = dma.hbm_to_vmem [thread:$0]  (!%p11193_p12), %s11036_s27, 256, %s1099_s0, [#allocation28], %s10917_s28, %s10917_s28, %s10918_s21  }
  0xca   : > { %s10919_s15 = smov [#allocation30]   ;;  %s10920_s7 = smov [#allocation33]  }
  0xcb   : > { %s1124_s26 = sshll.u32 %s10919_s15, 4  ;;  %s1150_s10 = sshll.u32 %s10920_s7, 4  ;;  %s1125_s26 = int_to_ptr.vmem [resolvable:$true] %s1124_s26  ;;  %s1151_s10 = int_to_ptr.vmem [resolvable:$true] %s1150_s10 }
  0xcc   : > { %s10212_s12 = scalar_lea.vmem %s1125_s26, 1024  ;;  %p10220_p11 = scmp.lt.s32.totalorder %s1125_s26, %s1125_s26 }
  0xcd   : > { %p10213_p10 = scmp.ne.s32.totalorder %s1125_s26, %s10212_s12  ;;  %p10221_p0 = scmp.lt.s32.totalorder %s10212_s12, %s10212_s12 }
  0xcf   : > { %p10215_p7 = pnand %p10213_p10, %p11199_p13  ;;  %p10222_p1 = por %p10221_p0, %p10220_p11 }
  0xd1   : > { %p10216_p8 = pneg %p10215_p7 }
  0xd3   : > { %p10223_p2 = pnand %p10222_p1, %p10216_p8 }
  0xd5   : > { %10226 = shalt.err (!%p10223_p2)
}
  0xd6   : > { %s12018_s16 = smov 8   ;;  %s12019_s0 = smov 128  }
  0xd7   : > { %s12020_s5 = sld [smem:[#allocation79_spill]]  ;;  %s10238_s7 = scalar_lea.vmem %s1151_s10, 256 }
  0xd8   : > { %p10239_p9 = scmp.ne.s32.totalorder %s1151_s10, %s10238_s7  ;;  %p10246_p5 = scmp.lt.s32.totalorder %s1151_s10, %s1151_s10 }
  0xd9   : > { %p10247_p6 = scmp.lt.s32.totalorder %s10238_s7, %s10238_s7 }
  0xda   : > { %p10241_p3 = pnand %p10239_p9, %p11199_p13 }
  0xdb   : > { %p10248_p10 = por %p10247_p6, %p10246_p5 }
  0xdc   : > { %p10242_p4 = pneg %p10241_p3 }
  0xdd   : > { %9389 = dma.hbm_to_vmem [thread:$0]  (!%p11193_p12), %s12020_s5, 1024, %s1125_s26, [#allocation31], %s12019_s0, %s12019_s0, %s12018_s16  }
  0xde   : > { %p10249_p7 = pnand %p10248_p10, %p10242_p4 }
  0xe0   : > { %10252 = shalt.err (!%p10249_p7)
}
  0xe1   : > { %9395 = dma.hbm_to_vmem [thread:$0]  (!%p11193_p12), %s11056_s6, 256, %s1151_s10, [#allocation34], %s12019_s0, %s12019_s0, %s12018_s16  }
  0xe2   : > { %s10921_s12 = smov [#allocation36]   ;;  %s10922_s21 = smov [#allocation39]  }
  0xe3   : > { %s1176_s28 = sshll.u32 %s10921_s12, 4  ;;  %s1203_s15 = sshll.u32 %s10922_s21, 4  ;;  %s1177_s28 = int_to_ptr.vmem [resolvable:$true] %s1176_s28  ;;  %s1204_s15 = int_to_ptr.vmem [resolvable:$true] %s1203_s15 }
  0xe4   : > { %s10264_s26 = scalar_lea.vmem %s1177_s28, 256  ;;  %p10272_p1 = scmp.lt.s32.totalorder %s1177_s28, %s1177_s28 }
  0xe5   : > { %p10265_p8 = scmp.ne.s32.totalorder %s1177_s28, %s10264_s26  ;;  %p10273_p2 = scmp.lt.s32.totalorder %s10264_s26, %s10264_s26 }
  0xe7   : > { %p10267_p11 = pnand %p10265_p8, %p11199_p13  ;;  %p10274_p9 = por %p10273_p2, %p10272_p1 }
  0xe9   : > { %p10268_p0 = pneg %p10267_p11 }
  0xeb   : > { %p10275_p3 = pnand %p10274_p9, %p10268_p0 }
  0xed   : > { %10278 = shalt.err (!%p10275_p3)
}
  0xee   : > { %9401 = dma.hbm_to_vmem [thread:$0]  (!%p11193_p12), %s11066_s24, 256, %s1177_s28, [#allocation37], %s12016_s8, %s12016_s8, %s12015_s13  }
  0xef   : > { %s10290_s10 = scalar_lea.vmem %s1204_s15, 64  ;;  %p10298_p10 = scmp.lt.s32.totalorder %s1204_s15, %s1204_s15 }
  0xf0   : > { %p10291_p4 = scmp.ne.s32.totalorder %s1204_s15, %s10290_s10  ;;  %p10299_p7 = scmp.lt.s32.totalorder %s10290_s10, %s10290_s10 }
  0xf2   : > { %p10293_p5 = pnand %p10291_p4, %p11199_p13  ;;  %p10300_p8 = por %p10299_p7, %p10298_p10 }
  0xf4   : > { %p10294_p6 = pneg %p10293_p5 }
  0xf6   : > { %p10301_p11 = pnand %p10300_p8, %p10294_p6 }
  0xf8   : > { %10304 = shalt.err (!%p10301_p11)
}
  0xf9   : > { %9407 = dma.hbm_to_vmem [thread:$0]  (!%p11193_p12), %s11076_s14, 64, %s1204_s15, [#allocation40]  }
  0xfa   : > { %s10923_s7 = smov [#allocation42]   ;;  %s10924_s21 = smov [#allocation45]  }
  0xfb   : > { %s1224_s12 = sshll.u32 %s10923_s7, 4  ;;  %s1257_s26 = sshll.u32 %s10924_s21, 4  ;;  %s1225_s12 = int_to_ptr.vmem [resolvable:$true] %s1224_s12  ;;  %s1258_s26 = int_to_ptr.vmem [resolvable:$true] %s1257_s26 }
  0xfc   : > { %s10316_s28 = scalar_lea.vmem %s1225_s12, 1024  ;;  %p10324_p9 = scmp.lt.s32.totalorder %s1225_s12, %s1225_s12 }
  0xfd   : > { %p10317_p0 = scmp.ne.s32.totalorder %s1225_s12, %s10316_s28  ;;  %p10325_p3 = scmp.lt.s32.totalorder %s10316_s28, %s10316_s28 }
  0xff   : > { %p10319_p1 = pnand %p10317_p0, %p11199_p13  ;;  %p10326_p4 = por %p10325_p3, %p10324_p9 }
 0x101   : > { %p10320_p2 = pneg %p10319_p1 }
 0x103   : > { %p10327_p5 = pnand %p10326_p4, %p10320_p2 }
 0x105   : > { %10330 = shalt.err (!%p10327_p5)
}
 0x106   : > { %s12021_s3 = sld [smem:[#allocation84_spill]]  ;;  %s10342_s15 = scalar_lea.vmem %s1258_s26, 128 }
 0x107   : > { %p10343_p6 = scmp.ne.s32.totalorder %s1258_s26, %s10342_s15  ;;  %p10350_p8 = scmp.lt.s32.totalorder %s1258_s26, %s1258_s26 }
 0x108   : > { %p10351_p11 = scmp.lt.s32.totalorder %s10342_s15, %s10342_s15 }
 0x109   : > { %p10345_p10 = pnand %p10343_p6, %p11199_p13 }
 0x10a   : > { %p10352_p0 = por %p10351_p11, %p10350_p8 }
 0x10b   : > { %p10346_p7 = pneg %p10345_p10 }
 0x10c   : > { %9413 = dma.hbm_to_vmem [thread:$0]  (!%p11193_p12), %s12021_s3, 1024, %s1225_s12, [#allocation43], %s12016_s8, %s12016_s8, %s12015_s13  }
 0x10d   : > { %p10353_p1 = pnand %p10352_p0, %p10346_p7 }
 0x10f   : > { %10356 = shalt.err (!%p10353_p1)
}
 0x110   : > { %9419 = dma.hbm_to_vmem [thread:$0]  (!%p11193_p12), %s11106_s17, 128, %s1258_s26, [#allocation46]  }
 0x111   : > { %s10925_s10 = smov [#allocation3]   ;;  %s10926_s21 = smov [#allocation8]  }
 0x112   : > { %s907_s7 = sshll.u32 %s10925_s10, 4  ;;  %s932_s28 = sshll.u32 %s10926_s21, 4  ;;  %s908_s7 = int_to_ptr.vmem [resolvable:$true] %s907_s7  ;;  %s933_s28 = int_to_ptr.vmem [resolvable:$true] %s932_s28 }
 0x113   : > { %s10368_s12 = scalar_lea.vmem %s908_s7, 16384  ;;  %p10376_p4 = scmp.lt.s32.totalorder %s908_s7, %s908_s7 }
 0x114   : > { %p10369_p2 = scmp.ne.s32.totalorder %s908_s7, %s10368_s12  ;;  %p10377_p5 = scmp.lt.s32.totalorder %s10368_s12, %s10368_s12 }
 0x116   : > { %p10371_p9 = pnand %p10369_p2, %p11199_p13  ;;  %p10378_p6 = por %p10377_p5, %p10376_p4 }
 0x118   : > { %p10372_p3 = pneg %p10371_p9 }
 0x11a   : > { %p10379_p10 = pnand %p10378_p6, %p10372_p3 }
 0x11c   : > { %10382 = shalt.err (!%p10379_p10)
}
 0x11d   : > { %s12022_s26 = sld [smem:[#allocation66_spill]]  ;;  %s10394_s15 = scalar_lea.vmem %s933_s28, 128 }
 0x11e   : > { %p10395_p7 = scmp.ne.s32.totalorder %s933_s28, %s10394_s15  ;;  %p10402_p0 = scmp.lt.s32.totalorder %s933_s28, %s933_s28 }
 0x11f   : > { %p10403_p1 = scmp.lt.s32.totalorder %s10394_s15, %s10394_s15 }
 0x120   : > { %p10397_p8 = pnand %p10395_p7, %p11199_p13 }
 0x121   : > { %p10404_p2 = por %p10403_p1, %p10402_p0 }
 0x122   : > { %p10398_p11 = pneg %p10397_p8 }
 0x123   : > { %9338 = dma.hbm_to_vmem [thread:$0]  (!%p11193_p12), %s12022_s26, 16384, %s908_s7, [#allocation4], %s12016_s8, %s12016_s8, %s12015_s13  }
 0x124   : > { %p10405_p9 = pnand %p10404_p2, %p10398_p11 }
 0x126   : > { %10408 = shalt.err (!%p10405_p9)
}
 0x127   : > { %s12023_s10 = sld [smem:[#allocation68_spill]]  ;;  %s10927_s21 = smov [#allocation11]  }
 0x128   : > { %s955_s12 = sshll.u32 %s10927_s21, 4  ;;  %s10928_s3 = smov [#allocation14]   ;;  %s956_s12 = int_to_ptr.vmem [resolvable:$true] %s955_s12 }
 0x129   : > { %s981_s5 = sshll.u32 %s10928_s3, 4  ;;  %s10420_s7 = scalar_lea.vmem %s956_s12, 256  ;;  %s982_s5 = int_to_ptr.vmem [resolvable:$true] %s981_s5 }
 0x12a   : > { %p10421_p3 = scmp.ne.s32.totalorder %s956_s12, %s10420_s7  ;;  %p10428_p6 = scmp.lt.s32.totalorder %s956_s12, %s956_s12 }
 0x12b   : > { %p10429_p10 = scmp.lt.s32.totalorder %s10420_s7, %s10420_s7 }
 0x12c   : > { %p10423_p4 = pnand %p10421_p3, %p11199_p13 }
 0x12d   : > { %9344 = dma.hbm_to_vmem [thread:$0]  (!%p11193_p12), %s12023_s10, 128, %s933_s28, [#allocation7]  }
 0x12e   : > { %p10424_p5 = pneg %p10423_p4  ;;  %p10430_p7 = por %p10429_p10, %p10428_p6 }
 0x130   : > { %p10431_p8 = pnand %p10430_p7, %p10424_p5 }
 0x132   : > { %10434 = shalt.err (!%p10431_p8)
}
 0x133   : > { %s12024_s28 = sld [smem:[#allocation70_spill]]  ;;  %s10446_s3 = scalar_lea.vmem %s982_s5, 128 }
 0x134   : > { %p10447_p11 = scmp.ne.s32.totalorder %s982_s5, %s10446_s3  ;;  %p10454_p2 = scmp.lt.s32.totalorder %s982_s5, %s982_s5 }
 0x135   : > { %p10455_p9 = scmp.lt.s32.totalorder %s10446_s3, %s10446_s3 }
 0x136   : > { %p10449_p0 = pnand %p10447_p11, %p11199_p13 }
 0x137   : > { %p10456_p3 = por %p10455_p9, %p10454_p2 }
 0x138   : > { %p10450_p1 = pneg %p10449_p0 }
 0x139   : > { %9350 = dma.hbm_to_vmem [thread:$0]  (!%p11193_p12), %s12024_s28, 256, %s956_s12, [#allocation10], %s12019_s0, %s12019_s0, %s12018_s16  }
 0x13a   : > { %p10457_p4 = pnand %p10456_p3, %p10450_p1 }
 0x13c   : > { %10460 = shalt.err (!%p10457_p4)
}
 0x13d   : > { %s12025_s26 = sld [smem:[#allocation71_spill]]  ;;  %s10929_s15 = smov [#allocation17]  }
 0x13e   : > { %s1007_s10 = sshll.u32 %s10929_s15, 4  ;;  %s10930_s21 = smov [#allocation20]   ;;  %s1008_s10 = int_to_ptr.vmem [resolvable:$true] %s1007_s10 }
 0x13f   : > { %s1033_s12 = sshll.u32 %s10930_s21, 4  ;;  %s10472_s7 = scalar_lea.vmem %s1008_s10, 256  ;;  %s1034_s12 = int_to_ptr.vmem [resolvable:$true] %s1033_s12 }
 0x140   : > { %p10473_p5 = scmp.ne.s32.totalorder %s1008_s10, %s10472_s7  ;;  %p10480_p7 = scmp.lt.s32.totalorder %s1008_s10, %s1008_s10 }
 0x141   : > { %p10481_p8 = scmp.lt.s32.totalorder %s10472_s7, %s10472_s7 }
 0x142   : > { %p10475_p6 = pnand %p10473_p5, %p11199_p13 }
 0x143   : > { %9356 = dma.hbm_to_vmem [thread:$0]  (!%p11193_p12), %s12025_s26, 128, %s982_s5, [#allocation13], %s12016_s8, %s12016_s8, %s12015_s13  }
 0x144   : > { %p10476_p10 = pneg %p10475_p6  ;;  %p10482_p11 = por %p10481_p8, %p10480_p7 }
 0x146   : > { %p10483_p0 = pnand %p10482_p11, %p10476_p10 }
 0x148   : > { %10486 = shalt.err (!%p10483_p0)
}
 0x149   : > { %s12026_s5 = sld [smem:[#allocation73_spill]]  ;;  %s10498_s28 = scalar_lea.vmem %s1034_s12, 1024 }
 0x14a   : > { %p10499_p1 = scmp.ne.s32.totalorder %s1034_s12, %s10498_s28  ;;  %p10506_p3 = scmp.lt.s32.totalorder %s1034_s12, %s1034_s12 }
 0x14b   : > { %p10507_p4 = scmp.lt.s32.totalorder %s10498_s28, %s10498_s28 }
 0x14c   : > { %p10501_p2 = pnand %p10499_p1, %p11199_p13 }
 0x14d   : > { %p10508_p5 = por %p10507_p4, %p10506_p3 }
 0x14e   : > { %p10502_p9 = pneg %p10501_p2 }
 0x14f   : > { %9362 = dma.hbm_to_vmem [thread:$0]  (!%p11193_p12), %s12026_s5, 256, %s1008_s10, [#allocation16], %s12016_s8, %s12016_s8, %s12015_s13  }
 0x150   : > { %p10509_p6 = pnand %p10508_p5, %p10502_p9 }
 0x152   : > { %10512 = shalt.err (!%p10509_p6)
}
 0x153   : > { %s12027_s3 = sld [smem:[#allocation74_spill]]  ;;  %s10931_s26 = smov [#allocation23]  }
 0x154   : > { %s1059_s15 = sshll.u32 %s10931_s26, 4  ;;  %s10932_s10 = smov [#allocation26]   ;;  %s1060_s15 = int_to_ptr.vmem [resolvable:$true] %s1059_s15 }
 0x155   : > { %s1085_s21 = sshll.u32 %s10932_s10, 4  ;;  %s10524_s7 = scalar_lea.vmem %s1060_s15, 512  ;;  %s1086_s21 = int_to_ptr.vmem [resolvable:$true] %s1085_s21 }
 0x156   : > { %p10525_p10 = scmp.ne.s32.totalorder %s1060_s15, %s10524_s7  ;;  %p10532_p11 = scmp.lt.s32.totalorder %s1060_s15, %s1060_s15 }
 0x157   : > { %p10533_p0 = scmp.lt.s32.totalorder %s10524_s7, %s10524_s7 }
 0x158   : > { %p10527_p7 = pnand %p10525_p10, %p11199_p13 }
 0x159   : > { %9368 = dma.hbm_to_vmem [thread:$0]  (!%p11193_p12), %s12027_s3, 1024, %s1034_s12, [#allocation19], %s12016_s8, %s12016_s8, %s12015_s13  }
 0x15a   : > { %p10528_p8 = pneg %p10527_p7  ;;  %p10534_p1 = por %p10533_p0, %p10532_p11 }
 0x15c   : > { %p10535_p2 = pnand %p10534_p1, %p10528_p8 }
 0x15e   : > { %10538 = shalt.err (!%p10535_p2)
}
 0x15f   : > { %s12028_s12 = sld [smem:[#allocation75_spill]]  ;;  %s10550_s5 = scalar_lea.vmem %s1086_s21, 1024 }
 0x160   : > { %p10551_p9 = scmp.ne.s32.totalorder %s1086_s21, %s10550_s5  ;;  %p10558_p5 = scmp.lt.s32.totalorder %s1086_s21, %s1086_s21 }
 0x161   : > { %p10559_p6 = scmp.lt.s32.totalorder %s10550_s5, %s10550_s5 }
 0x162   : > { %p10553_p3 = pnand %p10551_p9, %p11199_p13 }
 0x163   : > { %p10560_p10 = por %p10559_p6, %p10558_p5 }
 0x164   : > { %p10554_p4 = pneg %p10553_p3 }
 0x165   : > { %9374 = dma.hbm_to_vmem [thread:$0]  (!%p11193_p12), %s12028_s12, 512, %s1060_s15, [#allocation22], %s12019_s0, %s12019_s0, %s12018_s16  }
 0x166   : > { %p10561_p7 = pnand %p10560_p10, %p10554_p4 }
 0x168   : > { %10564 = shalt.err (!%p10561_p7)
}
 0x169   : > { %s12029_s28 = sld [smem:[#allocation77_spill]]  ;;  %s10933_s3 = smov [#allocation29]  }
 0x16a   : > { %s1111_s26 = sshll.u32 %s10933_s3, 4  ;;  %s10934_s15 = smov [#allocation32]   ;;  %s1112_s26 = int_to_ptr.vmem [resolvable:$true] %s1111_s26 }
 0x16b   : > { %s1137_s10 = sshll.u32 %s10934_s15, 4  ;;  %s10576_s7 = scalar_lea.vmem %s1112_s26, 512  ;;  %s1138_s10 = int_to_ptr.vmem [resolvable:$true] %s1137_s10 }
 0x16c   : > { %p10577_p8 = scmp.ne.s32.totalorder %s1112_s26, %s10576_s7  ;;  %p10584_p1 = scmp.lt.s32.totalorder %s1112_s26, %s1112_s26 }
 0x16d   : > { %p10585_p2 = scmp.lt.s32.totalorder %s10576_s7, %s10576_s7 }
 0x16e   : > { %p10579_p11 = pnand %p10577_p8, %p11199_p13 }
 0x16f   : > { %9380 = dma.hbm_to_vmem [thread:$0]  (!%p11193_p12), %s12029_s28, 1024, %s1086_s21, [#allocation25], %s12019_s0, %s12019_s0, %s12018_s16  }
 0x170   : > { %p10580_p0 = pneg %p10579_p11  ;;  %p10586_p9 = por %p10585_p2, %p10584_p1 }
 0x172   : > { %p10587_p3 = pnand %p10586_p9, %p10580_p0 }
 0x174   : > { %10590 = shalt.err (!%p10587_p3)
}
 0x175   : > { %s12030_s21 = sld [smem:[#allocation78_spill]]  ;;  %s10602_s12 = scalar_lea.vmem %s1138_s10, 256 }
 0x176   : > { %p10603_p4 = scmp.ne.s32.totalorder %s1138_s10, %s10602_s12  ;;  %p10610_p10 = scmp.lt.s32.totalorder %s1138_s10, %s1138_s10 }
 0x177   : > { %p10611_p7 = scmp.lt.s32.totalorder %s10602_s12, %s10602_s12 }
 0x178   : > { %p10605_p5 = pnand %p10603_p4, %p11199_p13 }
 0x179   : > { %p10612_p8 = por %p10611_p7, %p10610_p10 }
 0x17a   : > { %p10606_p6 = pneg %p10605_p5 }
 0x17b   : > { %9386 = dma.hbm_to_vmem [thread:$0]  (!%p11193_p12), %s12030_s21, 512, %s1112_s26, [#allocation28], %s12016_s8, %s12016_s8, %s12015_s13  }
 0x17c   : > { %p10613_p11 = pnand %p10612_p8, %p10606_p6 }
 0x17e   : > { %10616 = shalt.err (!%p10613_p11)
}
 0x17f   : > { %s12031_s5 = sld [smem:[#allocation80_spill]]  ;;  %s10935_s28 = smov [#allocation35]  }
 0x180   : > { %s1163_s3 = sshll.u32 %s10935_s28, 4  ;;  %s10936_s26 = smov [#allocation38]   ;;  %s1164_s3 = int_to_ptr.vmem [resolvable:$true] %s1163_s3 }
 0x181   : > { %s1189_s15 = sshll.u32 %s10936_s26, 4  ;;  %s10628_s7 = scalar_lea.vmem %s1164_s3, 1024  ;;  %s1190_s15 = int_to_ptr.vmem [resolvable:$true] %s1189_s15 }
 0x182   : > { %p10629_p0 = scmp.ne.s32.totalorder %s1164_s3, %s10628_s7  ;;  %p10636_p9 = scmp.lt.s32.totalorder %s1164_s3, %s1164_s3 }
 0x183   : > { %p10637_p3 = scmp.lt.s32.totalorder %s10628_s7, %s10628_s7 }
 0x184   : > { %p10631_p1 = pnand %p10629_p0, %p11199_p13 }
 0x185   : > { %9392 = dma.hbm_to_vmem [thread:$0]  (!%p11193_p12), %s12031_s5, 256, %s1138_s10, [#allocation31], %s12019_s0, %s12019_s0, %s12018_s16  }
 0x186   : > { %p10632_p2 = pneg %p10631_p1  ;;  %p10638_p4 = por %p10637_p3, %p10636_p9 }
 0x188   : > { %p10639_p5 = pnand %p10638_p4, %p10632_p2 }
 0x18a   : > { %10642 = shalt.err (!%p10639_p5)
}
 0x18b   : > { %s12032_s10 = sld [smem:[#allocation81_spill]]  ;;  %s10654_s21 = scalar_lea.vmem %s1190_s15, 512 }
 0x18c   : > { %p10655_p6 = scmp.ne.s32.totalorder %s1190_s15, %s10654_s21  ;;  %p10662_p8 = scmp.lt.s32.totalorder %s1190_s15, %s1190_s15 }
 0x18d   : > { %p10663_p11 = scmp.lt.s32.totalorder %s10654_s21, %s10654_s21 }
 0x18e   : > { %p10657_p10 = pnand %p10655_p6, %p11199_p13 }
 0x18f   : > { %p10664_p0 = por %p10663_p11, %p10662_p8 }
 0x190   : > { %p10658_p7 = pneg %p10657_p10 }
 0x191   : > { %9398 = dma.hbm_to_vmem [thread:$0]  (!%p11193_p12), %s12032_s10, 1024, %s1164_s3, [#allocation34], %s12016_s8, %s12016_s8, %s12015_s13  }
 0x192   : > { %p10665_p1 = pnand %p10664_p0, %p10658_p7 }
 0x194   : > { %10668 = shalt.err (!%p10665_p1)
}
 0x195   : > { %s12033_s12 = sld [smem:[#allocation82_spill]]  ;;  %s10937_s5 = smov [#allocation41]  }
 0x196   : > { %s1214_s28 = sshll.u32 %s10937_s5, 4  ;;  %s10938_s3 = smov [#allocation44]   ;;  %s1215_s28 = int_to_ptr.vmem [resolvable:$true] %s1214_s28 }
 0x197   : > { %s1237_s26 = sshll.u32 %s10938_s3, 4  ;;  %s10680_s7 = scalar_lea.vmem %s1215_s28, 128  ;;  %s1238_s26 = int_to_ptr.vmem [resolvable:$true] %s1237_s26 }
 0x198   : > { %p10681_p2 = scmp.ne.s32.totalorder %s1215_s28, %s10680_s7  ;;  %p10688_p4 = scmp.lt.s32.totalorder %s1215_s28, %s1215_s28 }
 0x199   : > { %p10689_p5 = scmp.lt.s32.totalorder %s10680_s7, %s10680_s7 }
 0x19a   : > { %p10683_p9 = pnand %p10681_p2, %p11199_p13 }
 0x19b   : > { %9404 = dma.hbm_to_vmem [thread:$0]  (!%p11193_p12), %s12033_s12, 512, %s1190_s15, [#allocation37], %s12019_s0, %s12019_s0, %s12018_s16  }
 0x19c   : > { %p10684_p3 = pneg %p10683_p9  ;;  %p10690_p6 = por %p10689_p5, %p10688_p4 }
 0x19e   : > { %p10691_p10 = pnand %p10690_p6, %p10684_p3 }
 0x1a0   : > { %10694 = shalt.err (!%p10691_p10)
}
 0x1a1   : > { %s12034_s10 = sld [smem:[#allocation83_spill]]  ;;  %s10706_s16 = scalar_lea.vmem %s1238_s26, 256 }
 0x1a2   : > { %p10707_p7 = scmp.ne.s32.totalorder %s1238_s26, %s10706_s16  ;;  %p10714_p0 = scmp.lt.s32.totalorder %s1238_s26, %s1238_s26 }
 0x1a3   : > { %p10715_p1 = scmp.lt.s32.totalorder %s10706_s16, %s10706_s16 }
 0x1a4   : > { %p10709_p8 = pnand %p10707_p7, %p11199_p13 }
 0x1a5   : > { %p10716_p2 = por %p10715_p1, %p10714_p0 }
 0x1a6   : > { %p10710_p11 = pneg %p10709_p8 }
 0x1a7   : > { %9410 = dma.hbm_to_vmem [thread:$0]  (!%p11193_p12), %s12034_s10, 128, %s1215_s28, [#allocation40]  }
 0x1a8   : > { %p10717_p9 = pnand %p10716_p2, %p10710_p11 }
 0x1aa   : > { %10720 = shalt.err (!%p10717_p9)
}
 0x1ab   : > { %s12035_s0 = sld [smem:[#allocation85_spill]]  ;;  %s10939_s15 = smov [#allocation47]  }
 0x1ac   : > { %s1267_s21 = sshll.u32 %s10939_s15, 4  ;;  %s1268_s21 = int_to_ptr.vmem [resolvable:$true] %s1267_s21 }
 0x1ad   : > { %s10732_s12 = scalar_lea.vmem %s1268_s21, 13824  ;;  %p10740_p6 = scmp.lt.s32.totalorder %s1268_s21, %s1268_s21 }
 0x1ae   : > { %p10733_p3 = scmp.ne.s32.totalorder %s1268_s21, %s10732_s12  ;;  %p10741_p10 = scmp.lt.s32.totalorder %s10732_s12, %s10732_s12 }
 0x1b0   : > { %p10735_p4 = pnand %p10733_p3, %p11199_p13  ;;  %p10742_p7 = por %p10741_p10, %p10740_p6 }
 0x1b1   : > { %9416 = dma.hbm_to_vmem [thread:$0]  (!%p11193_p12), %s12035_s0, 256, %s1238_s26, [#allocation43], %s12016_s8, %s12016_s8, %s12015_s13  }
 0x1b2   : > { %p10736_p5 = pneg %p10735_p4 }
 0x1b4   : > { %p10743_p8 = pnand %p10742_p7, %p10736_p5 }
 0x1b6   : > { %10746 = shalt.err (!%p10743_p8)
}
 0x1b7   : > { %s10940_s5 = smov 192   ;;  %s12036_s28 = sld [smem:[#allocation88_spill]] }
 0x1b8   : > { %s10941_s3 = smov 12   ;;  %p12037_p11 = scmp.ne.s32.totalorder %s12009_s22, 0 }
 0x1b9   : > { %p12038_p0 = scmp.eq.s32.totalorder (!%p12037_p11), %s11157_s2, 0 }
 0x1ba   : > { %1302 = sbr.rel (%p12037_p11) target bundleno = 5154 (0x1422), region = 164 }
 0x1bd   : > { %9422 = dma.hbm_to_vmem [thread:$0]  (!%p11193_p12), %s12036_s28, 13824, %s1268_s21, [#allocation46], %s10940_s5, %s10940_s5, %s10941_s3  }
 0x1bf   : > { %10790 = dma.done.wait (%p12038_p0), [#allocation4], 16384   ;;  %p12039_p13 = pmov %p12038_p0 }
 0x1c0   : > { %p12040_p1 = pmov %p12038_p0 }
 0x1c1   : > { %10792 = vsyncadd (%p12039_p13), [#allocation4], 4294950912 }
 0x1c2   : > { %10794 = dma.done.wait (%p12040_p1), [#allocation7], 192   ;;  %p12041_p2 = pmov %p12038_p0 }
 0x1c3   : > { %p12042_p9 = pmov %p12038_p0 }
 0x1c4   : > { %10796 = vsyncadd (%p12041_p2), [#allocation7], 4294967104 }
 0x1c5   : > { %10798 = dma.done.wait (%p12042_p9), [#allocation10], 384   ;;  %p12043_p12 = pmov %p12038_p0 }
 0x1c6   : > { %p12044_p3 = pmov %p12038_p0 }
 0x1c7   : > { %10800 = vsyncadd (%p12043_p12), [#allocation10], 4294966912 }
 0x1c8   : > { %10802 = dma.done.wait (%p12044_p3), [#allocation13], 4736   ;;  %p12045_p4 = pmov %p12038_p0 }
 0x1c9   : > { %p12046_p5 = pmov %p12038_p0 }
 0x1ca   : > { %10804 = vsyncadd (%p12045_p4), [#allocation13], 4294962560 }
 0x1cb   : > { %10806 = dma.done.wait (%p12046_p5), [#allocation16], 512   ;;  %p12047_p6 = pmov %p12038_p0 }
 0x1cc   : > { %p12048_p10 = pmov %p12038_p0 }
 0x1cd   : > { %10808 = vsyncadd (%p12047_p6), [#allocation16], 4294966784 }
 0x1ce   : > { %10810 = dma.done.wait (%p12048_p10), [#allocation19], 1536   ;;  %p12049_p7 = pmov %p12038_p0 }
 0x1cf   : > { %p12050_p8 = pmov %p12038_p0 }
 0x1d0   : > { %10812 = vsyncadd (%p12049_p7), [#allocation19], 4294965760 }
 0x1d1   : > { %10814 = dma.done.wait (%p12050_p8), [#allocation22], 768   ;;  %p12051_p11 = pmov %p12038_p0 }
 0x1d3   : > { %10816 = vsyncadd (%p12051_p11), [#allocation22], 4294966528 }
 0x1d4   : > { %10818 = dma.done.wait (%p12038_p0), [#allocation25], 1536   ;;  %p12052_p13 = pmov %p12038_p0 }
 0x1d5   : > { %p12053_p1 = pmov %p12038_p0 }
 0x1d6   : > { %10820 = vsyncadd (%p12052_p13), [#allocation25], 4294965760 }
 0x1d7   : > { %10822 = dma.done.wait (%p12053_p1), [#allocation28], 768   ;;  %p12054_p2 = pmov %p12038_p0 }
 0x1d8   : > { %p12055_p9 = pmov %p12038_p0 }
 0x1d9   : > { %10824 = vsyncadd (%p12054_p2), [#allocation28], 4294966528 }
 0x1da   : > { %10826 = dma.done.wait (%p12055_p9), [#allocation31], 1280   ;;  %p12056_p12 = pmov %p12038_p0 }
 0x1db   : > { %p12057_p3 = pmov %p12038_p0 }
 0x1dc   : > { %10828 = vsyncadd (%p12056_p12), [#allocation31], 4294966016 }
 0x1dd   : > { %10830 = dma.done.wait (%p12057_p3), [#allocation34], 1280   ;;  %p12058_p4 = pmov %p12038_p0 }
 0x1de   : > { %p12059_p5 = pmov %p12038_p0 }
 0x1df   : > { %10832 = vsyncadd (%p12058_p4), [#allocation34], 4294966016 }
 0x1e0   : > { %10834 = dma.done.wait (%p12059_p5), [#allocation37], 768   ;;  %p12060_p6 = pmov %p12038_p0 }
 0x1e1   : > { %p12061_p10 = pmov %p12038_p0 }
 0x1e2   : > { %10836 = vsyncadd (%p12060_p6), [#allocation37], 4294966528 }
 0x1e3   : > { %10838 = dma.done.wait (%p12061_p10), [#allocation40], 192   ;;  %p12062_p7 = pmov %p12038_p0 }
 0x1e4   : > { %p12063_p8 = pmov %p12038_p0 }
 0x1e5   : > { %10840 = vsyncadd (%p12062_p7), [#allocation40], 4294967104 }
 0x1e6   : > { %10842 = dma.done.wait (%p12063_p8), [#allocation43], 1280   ;;  %p12064_p11 = pmov %p12038_p0 }
 0x1e8   : > { %10844 = vsyncadd (%p12064_p11), [#allocation43], 4294966016 }
 0x1e9   : > { %10846 = dma.done.wait (%p12038_p0), [#allocation46], 13952   ;;  %p12065_p13 = pmov %p12038_p0 }
 0x1ea   : > { %s12066_s8 = sld [smem:[#allocation65_spill]]  ;;  %p1503_p1 = scmp.lt.s32.totalorder %s11157_s2, 1  ;;  %v1511_v1 = vlaneseq  ;;  %vm1521_vm0 = vcmask 1040384   ;;  %v9598_v21 = vld [vmem:[#allocation3 + $0x78] sm:$0xff]   ;;  %v9602_v25 = vld [vmem:[#allocation3 + $0x70] sm:$0xff]   ;;  %v9606_v29 = vld [vmem:[#allocation3 + $0x68] sm:$0xff]  }
 0x1eb   : > { %10848 = vsyncadd (%p12065_p13), [#allocation46], 4294953344  ;;  %v9599_v22 = vld [vmem:[#allocation3 + $0xf8] sm:$0xff]   ;;  %8403 = vmatprep.subr.bf16.mxu0 %v9598_v21  ;;  %v9603_v26 = vld [vmem:[#allocation3 + $0xf0] sm:$0xff]   ;;  %vm10944_vm3 = vmmov 0   ;;  %s12067_s13 = sld [smem:[#allocation86_spill]] }
 0x1ec   : > { %s1504_s23 = scalar_select %p1503_p1, %s11157_s2, 1  ;;  %v11479_v2 = vshrl.u32 %v1511_v1, 7  ;;  %v9600_v23 = vld [vmem:[#allocation3 + $0x38] sm:$0xff]   ;;  %8425 = vmatprep.subr.bf16.mxu1 %v9599_v22  ;;  %v9604_v27 = vld [vmem:[#allocation3 + $0x30] sm:$0xff]   ;;  %v9607_v30 = vld [vmem:[#allocation3 + $0xe8] sm:$0xff]   ;;  %vm3005_vm12 = vcmask 1043456  }
 0x1ed   : > { %v9601_v24 = vld [vmem:[#allocation3 + $0xb8] sm:$0xff]   ;;  %8404 = vmatpush3.bf16.msra.mxu0 %v9600_v23  ;;  %v9605_v28 = vld [vmem:[#allocation3 + $0xb0] sm:$0xff]   ;;  %v9608_v31 = vld [vmem:[#allocation3 + $0x28] sm:$0xff]   ;;  %vm3001_vm13 = vcmask 64512   ;;  %vm3165_vm14 = vcmask 1041408   ;;  %vm3161_vm15 = vcmask 556032  }
 0x1ee   : > { %s8004_s22 = sshll.u32 %s1504_s23, 1  ;;  %v11482_v3 = vsub.s32 0, %v11479_v2  ;;  %v11485_v4 = vsub.s32 1, %v11479_v2  ;;  %8426 = vmatpush3.bf16.msra.mxu1 %v9601_v24  ;;  %8405 = vmatprep.subr.bf16.mxu0 %v9602_v25  ;;  %v9609_v32 = vld [vmem:[#allocation3 + $0xa8] sm:$0xff]   ;;  %v9610_v33 = vld [vmem:[#allocation3 + $0x60] sm:$0xff]   ;;  %v9614_v37 = vld [vmem:[#allocation3 + $0x58] sm:$0xff]  }
 0x1ef   : > { %8427 = vmatprep.subr.bf16.mxu1 %v9603_v26  ;;  %v9611_v34 = vld [vmem:[#allocation3 + $0xe0] sm:$0xff]   ;;  %v9615_v38 = vld [vmem:[#allocation3 + $0xd8] sm:$0xff]   ;;  %v9618_v41 = vld [vmem:[#allocation3 + $0x50] sm:$0xff]   ;;  %vm2937_vm4 = vcmp.eq.s32.totalorder %v11479_v2, 0  ;;  %vm2944_vm5 = vcmp.eq.s32.totalorder %v11479_v2, 1  ;;  %vm2951_vm6 = vcmp.eq.s32.totalorder %v11479_v2, 2 }
 0x1f0   : > { %s11488_s11 = scalar_lea.vmem %s12066_s8, %s8004_s22  ;;  %v9612_v35 = vld [vmem:[#allocation3 + $0x20] sm:$0xff]   ;;  %v9616_v39 = vld [vmem:[#allocation3 + $0x18] sm:$0xff]   ;;  %v9619_v42 = vld [vmem:[#allocation3 + $0xd0] sm:$0xff]   ;;  %vm2958_vm7 = vcmp.eq.s32.totalorder %v11479_v2, 3  ;;  %vm2965_vm8 = vcmp.eq.s32.totalorder %v11479_v2, 4  ;;  %vm2972_vm9 = vcmp.eq.s32.totalorder %v11479_v2, 5 }
 0x1f1   : > { %v1508_v5 = vld [vmem:[%s11488_s11] sm:$0x3]  ;;  %8406 = vmatpush3.bf16.msra.mxu0 %v9604_v27  ;;  %v9620_v43 = vld [vmem:[#allocation3 + $0x10] sm:$0xff]   ;;  %v9622_v45 = vld [vmem:[#allocation3 + $0x48] sm:$0xff]   ;;  %vm2979_vm10 = vcmp.eq.s32.totalorder %v11479_v2, 6  ;;  %vm2986_vm11 = vcmp.eq.s32.totalorder %v11479_v2, 7 }
 0x1f2   : > { %v1514_v6 = vrot.slane %v1508_v5, %v11482_v3  ;;  %v1518_v7 = vrot.slane %v1508_v5, %v11485_v4  ;;  %8428 = vmatpush3.bf16.msra.mxu1 %v9605_v28  ;;  %8407 = vmatprep.subr.bf16.mxu0 %v9606_v29  ;;  %v9613_v36 = vld [vmem:[#allocation3 + $0xa0] sm:$0xff]   ;;  %v9617_v40 = vld [vmem:[#allocation3 + $0x98] sm:$0xff]   ;;  %v9621_v44 = vld [vmem:[#allocation3 + $0x90] sm:$0xff]   ;;  %s12068_s26 = sld [smem:[#allocation87_spill]]  ;;  %s1500_s10 = sand.u32 1, %s10859_s20  }
 0x1f3   : > { %8429 = vmatprep.subr.bf16.mxu1 %v9607_v30  ;;  %v9623_v46 = vld [vmem:[#allocation3 + $0xc8] sm:$0xff]   ;;  %v9626_v49 = vld [vmem:[#allocation3 + $0x40] sm:$0xff]   ;;  %v9630_v53 = vld [vmem:[#allocation3 + $0x178] sm:$0xff]   ;;  %s12069_s7 = sld [smem:[#allocation89_spill]]  ;;  %s8003_s16 = sshll.u32 %s1500_s10, 1 }
 0x1f4   : > { %v1522_v8 = vsel %vm1521_vm0, %v1514_v6, 0.0  ;;  %v1523_v9 = vsel %vm1521_vm0, %v1518_v7, 0.0  ;;  %v9624_v47 = vld [vmem:[#allocation3 + $0x8] sm:$0xff]   ;;  %v9627_v50 = vld [vmem:[#allocation3 + $0xc0] sm:$0xff]   ;;  %v9631_v54 = vld [vmem:[#allocation3 + $0x1f8] sm:$0xff]   ;;  %s8402_s0 = sshll.u32 %s11157_s2, 5 }
 0x1f5   : > { %v1524_v10 = vadd.f32 %v1523_v9, %v1522_v8  ;;  %8408 = vmatpush3.bf16.msra.mxu0 %v9608_v31  ;;  %v9625_v48 = vld [vmem:[#allocation3 + $0x88] sm:$0xff]   ;;  %v9628_v51 = vld [vmem:[#allocation3] sm:$0xff]   ;;  %v9646_v24 = vld [vmem:[#allocation3 + $0x158] sm:$0xff]   ;;  %s1502_s15 = scalar_lea.vmem [#allocation48], %s8003_s16  ;;  %s7566_s12 = scalar_lea.hbm %s11134_s25, %s8402_s0 }
 0x1f6   : > { %8430 = vmatpush3.bf16.msra.mxu1 %v9609_v32  ;;  %8409 = vmatprep.subr.bf16.mxu0 %v9610_v33  ;;  %v9629_v52 = vld [vmem:[#allocation3 + $0x80] sm:$0xff]   ;;  %v9647_v25 = vld [vmem:[#allocation3 + $0x1d8] sm:$0xff]   ;;  %v9650_v28 = vld [vmem:[#allocation3 + $0x150] sm:$0xff]   ;;  %s7568_s21 = sshll.u32 %s1502_s15, 4  ;;  %s7554_s5 = scalar_lea.sflag [#allocation5], %s1500_s10  ;;  %s7569_s21 = int_to_ptr.vmem [resolvable:$true] %s7568_s21 }
 0x1f7   : > { %1525 = vadd.xlane.f32.xlu0 %v1524_v10  ;;  %8431 = vmatprep.subr.bf16.mxu1 %v9611_v34  ;;  %v9643_v21 = vld [vmem:[#allocation3 + $0x1e0] sm:$0xff]   ;;  %v9648_v26 = vld [vmem:[#allocation3 + $0x118] sm:$0xff]   ;;  %v9651_v29 = vld [vmem:[#allocation3 + $0x1d0] sm:$0xff]   ;;  %s10747_s28 = scalar_lea.vmem %s7569_s21, 32  ;;  %p12070_p9 = scmp.ne.s32.totalorder %s12006_s18, 0 }
 0x1f8   : > { %v9644_v22 = vld [vmem:[#allocation3 + $0x120] sm:$0xff]   ;;  %v9649_v27 = vld [vmem:[#allocation3 + $0x198] sm:$0xff]   ;;  %v9652_v30 = vld [vmem:[#allocation3 + $0x110] sm:$0xff]   ;;  %p10748_p2 = scmp.ne.s32.totalorder %s7569_s21, %s10747_s28  ;;  %s10947_s3 = smov [#allocation48]  }
 0x1f9   : > { %8410 = vmatpush3.bf16.msra.mxu0 %v9612_v35  ;;  %v9645_v23 = vld [vmem:[#allocation3 + $0x1a0] sm:$0xff]   ;;  %v9653_v31 = vld [vmem:[#allocation3 + $0x190] sm:$0xff]   ;;  %v9654_v32 = vld [vmem:[#allocation3 + $0x148] sm:$0xff]   ;;  %s10751_s8 = sshll.u32 %s10947_s3, 4  ;;  %s10752_s8 = int_to_ptr.vmem [resolvable:$false] %s10751_s8 }
 0x1fa   : > { %8432 = vmatpush3.bf16.msra.mxu1 %v9613_v36  ;;  %8411 = vmatprep.subr.bf16.mxu0 %v9614_v37  ;;  %v9655_v33 = vld [vmem:[#allocation3 + $0x1c8] sm:$0xff]   ;;  %v9658_v36 = vld [vmem:[#allocation3 + $0x140] sm:$0xff]   ;;  %p10749_p12 = pnand %p10748_p2, %p12070_p9  ;;  %s10753_s23 = scalar_lea.vmem %s10752_s8, 64 }
 0x1fb   : > { %8433 = vmatprep.subr.bf16.mxu1 %v9615_v38  ;;  %v9656_v34 = vld [vmem:[#allocation3 + $0x108] sm:$0xff]   ;;  %v9659_v37 = vld [vmem:[#allocation3 + $0x1c0] sm:$0xff]   ;;  %p10754_p4 = scmp.lt.s32.totalorder %s7569_s21, %s10752_s8  ;;  %p10755_p5 = scmp.lt.s32.totalorder %s10753_s23, %s10747_s28 }
 0x1fc   : > { %v9657_v35 = vld [vmem:[#allocation3 + $0x188] sm:$0xff]   ;;  %v9660_v38 = vld [vmem:[#allocation3 + $0x100] sm:$0xff]   ;;  %p10750_p3 = pneg %p10749_p12 }
 0x1fd   : > { %8412 = vmatpush3.bf16.msra.mxu0 %v9616_v39  ;;  %v9661_v39 = vld [vmem:[#allocation3 + $0x180] sm:$0xff]   ;;  %p10756_p6 = por %p10755_p5, %p10754_p4 }
 0x1fe   : > { %8434 = vmatpush3.bf16.msra.mxu1 %v9617_v40  ;;  %8413 = vmatprep.subr.bf16.mxu0 %v9618_v41  ;;  %v9662_v40 = vld [vmem:[#allocation3 + $0x278] sm:$0xff]  }
 0x1ff   : > { %8435 = vmatprep.subr.bf16.mxu1 %v9619_v42  ;;  %v9663_v41 = vld [vmem:[#allocation3 + $0x2f8] sm:$0xff]   ;;  %p10757_p10 = pnand %p10756_p6, %p10750_p3 }
 0x200   : > { %v9664_v42 = vld [vmem:[#allocation3 + $0x238] sm:$0xff]  }
 0x201   : > { %8414 = vmatpush3.bf16.msra.mxu0 %v9620_v43  ;;  %v9665_v43 = vld [vmem:[#allocation3 + $0x2b8] sm:$0xff]  }
 0x202   : > { %8436 = vmatpush3.bf16.msra.mxu1 %v9621_v44  ;;  %8415 = vmatprep.subr.bf16.mxu0 %v9622_v45  ;;  %v9666_v44 = vld [vmem:[#allocation3 + $0x270] sm:$0xff]  }
 0x203   : > { %8437 = vmatprep.subr.bf16.mxu1 %v9623_v46  ;;  %v9667_v45 = vld [vmem:[#allocation3 + $0x2f0] sm:$0xff]  }
 0x204   : > { %v9668_v46 = vld [vmem:[#allocation3 + $0x230] sm:$0xff]  }
 0x205   : > { %8416 = vmatpush3.bf16.msra.mxu0 %v9624_v47  ;;  %v9669_v47 = vld [vmem:[#allocation3 + $0x2b0] sm:$0xff]  }
 0x206   : > { %8438 = vmatpush3.bf16.msra.mxu1 %v9625_v48  ;;  %8417 = vmatprep.subr.bf16.mxu0 %v9626_v49  ;;  %v9670_v48 = vld [vmem:[#allocation3 + $0x268] sm:$0xff]  }
 0x207   : > { %8439 = vmatprep.subr.bf16.mxu1 %v9627_v50  ;;  %v9671_v49 = vld [vmem:[#allocation3 + $0x2e8] sm:$0xff]  }
 0x208   : > { %v9672_v50 = vld [vmem:[#allocation3 + $0x228] sm:$0xff]  }
 0x209   : > { %8418 = vmatpush3.bf16.msra.mxu0 %v9628_v51  ;;  %v9673_v51 = vld [vmem:[#allocation3 + $0x2a8] sm:$0xff]  }
 0x20a   : > { %8440 = vmatpush3.bf16.msra.mxu1 %v9629_v52  ;;  %8447 = vmatprep.subr.bf16.mxu0 %v9630_v53  ;;  %v9674_v52 = vld [vmem:[#allocation3 + $0x260] sm:$0xff]  }
 0x20b   : > { %8469 = vmatprep.subr.bf16.mxu1 %v9631_v54  ;;  %v9675_v53 = vld [vmem:[#allocation3 + $0x2e0] sm:$0xff]  }
 0x20c   : > { %v9676_v54 = vld [vmem:[#allocation3 + $0x220] sm:$0xff]  }
 0x280   : > { %v1526_v11 = vpop.xlane.xlu0 %1525 }
 0x281   : > { %v1528_v12 = vmul.f32 0.00390625, %v1526_v11  ;;  %v9632_v11 = vld [vmem:[#allocation3 + $0x138] sm:$0xff]  }
 0x283   : > { %v1533_v13 = vrot.slane %v1528_v12, %v11482_v3  ;;  %v9633_v12 = vld [vmem:[#allocation3 + $0x1b8] sm:$0xff]  }
 0x285   : > { %v1535_v14 = vsub.f32 %v1508_v5, %v1533_v13  ;;  %v9992_v5 = vld [vmem:[%s11488_s11] sm:$0x3]  ;;  %v9634_v13 = vld [vmem:[#allocation3 + $0x170] sm:$0xff]  }
 0x287   : > { %v1536_v15 = vmul.f32 %v1535_v14, %v1535_v14  ;;  %v9635_v14 = vld [vmem:[#allocation3 + $0x1f0] sm:$0xff]  }
 0x289   : > { %v1541_v16 = vrot.slane %v1536_v15, %v11482_v3  ;;  %v1545_v17 = vrot.slane %v1536_v15, %v11485_v4  ;;  %v9637_v15 = vld [vmem:[#allocation3 + $0x1b0] sm:$0xff]  }
 0x28b   : > { %v1548_v18 = vsel %vm1521_vm0, %v1541_v16, 0.0  ;;  %v1549_v19 = vsel %vm1521_vm0, %v1545_v17, 0.0  ;;  %v9638_v16 = vld [vmem:[#allocation3 + $0x168] sm:$0xff]  }
 0x28c   : > { %v1550_v20 = vadd.f32 %v1549_v19, %v1548_v18  ;;  %v9639_v17 = vld [vmem:[#allocation3 + $0x1e8] sm:$0xff]  }
 0x28d   : > { %v9640_v18 = vld [vmem:[#allocation3 + $0x128] sm:$0xff]  }
 0x28e   : > { %1551 = vadd.xlane.f32.xlu0 %v1550_v20  ;;  %v9641_v19 = vld [vmem:[#allocation3 + $0x1a8] sm:$0xff]   ;;  %v9642_v20 = vld [vmem:[#allocation3 + $0x160] sm:$0xff]  }
 0x317   : > { %v1552_v55 = vpop.xlane.xlu0 %1551 }
 0x318   : > { %v1554_v56 = vmul.f32 0.003921569, %v1552_v55  ;;  %v9677_v55 = vld [vmem:[#allocation3 + $0x2a0] sm:$0xff]  }
 0x31a   : > { %9924 = vrsqrt.f32 %v1554_v56  ;;  %vm1557_vm1 = vcmp.eq.f32.partialorder %v1554_v56, inf  ;;  %v1560_v59 = vand.u32 2147483648, %v1554_v56  ;;  %vm1559_vm2 = vcmp.eq.f32.partialorder %v1554_v56, 0.0 }
 0x327   : > { %v9925_v57 = vpop.eup %9924 }
 0x328   : > { %v1556_v58 = vmul.f32 %v9925_v57, %v1554_v56  ;;  %v9679_v57 = vld [vmem:[#allocation3 + $0x2d8] sm:$0xff]  }
 0x32a   : > { %v1558_v60 = vsel %vm1557_vm1, %v1554_v56, %v1556_v58  ;;  %v9678_v56 = vld [vmem:[#allocation3 + $0x258] sm:$0xff]   ;;  %vm3820_vm1 = vcmask 523264  }
 0x32b   : > { %v11500_v61 = vsel %vm1559_vm2, %v1560_v59, %v1558_v60  ;;  %v9680_v58 = vld [vmem:[#allocation3 + $0x218] sm:$0xff]   ;;  %v9682_v60 = vld [vmem:[#allocation3 + $0x250] sm:$0xff]   ;;  %vm3906_vm2 = vcmask 130048  }
 0x32c   : > { %v1562_v62 = vadd.f32 0.001, %v11500_v61  ;;  %v9681_v59 = vld [vmem:[#allocation3 + $0x298] sm:$0xff]  }
 0x32e   : > { %v1567_v63 = vrot.slane %v1562_v62, %v11482_v3  ;;  %v9683_v62 = vld [vmem:[#allocation3 + $0x2d0] sm:$0xff]  }
 0x330   : > { %9926 = vrcp.f32 %v1567_v63  ;;  %v9684_v63 = vld [vmem:[#allocation3 + $0x210] sm:$0xff]  }
 0x33d   : > { %v9927_v0 = vpop.eup %9926 }
 0x33e   : > { %v1570_v6 = vmul.f32 %v9992_v5, %v9927_v0  ;;  %v9685_v0 = vld [vmem:[#allocation3 + $0x290] sm:$0xff]   ;;  %v9686_v5 = vld [vmem:[#allocation3 + $0x248] sm:$0xff]  }
 0x340   : > { %v1579_v7 = vrot.slane %v1570_v6, %v11485_v4  ;;  %v1575_v8 = vrot.slane %v1570_v6, %v11482_v3  ;;  %v9636_v4 = vld [vmem:[#allocation3 + $0x130] sm:$0xff]   ;;  %v9687_v6 = vld [vmem:[#allocation3 + $0x2c8] sm:$0xff]  }
 0x342   : > { %v11507_v9 = vpack.c.bf16 %v1579_v7, %v1579_v7  ;;  %v11509_v10 = vpack.c.bf16 %v1575_v8, %v1575_v8  ;;  %v9688_v7 = vld [vmem:[#allocation3 + $0x208] sm:$0xff]  }
 0x343   : > { %v9689_v8 = vld [vmem:[#allocation3 + $0x288] sm:$0xff]  }
 0x344   : > { %1744 = vmatprep.mubr.bf16.mxu0 %v11507_v9  ;;  %1913 = vmatprep.mubr.bf16.mxu1 %v11507_v9 }
 0x345   : > { %1745 = vmatmul.mubr.bf16.vlgmr.msra.gmra.mxu0 %v11509_v10  ;;  %1914 = vmatmul.mubr.bf16.vlgmr.msra.gmra.mxu1 %v11509_v10 }
 0x346   : > { %8448 = vmatpush3.bf16.msra.mxu0 %v9632_v11  ;;  %8470 = vmatpush3.bf16.msra.mxu1 %v9633_v12  ;;  %v9690_v11 = vld [vmem:[#allocation3 + $0x240] sm:$0xff]  }
 0x347   : > { %2082 = vmatprep.mubr.bf16.mxu0 %v11507_v9  ;;  %2251 = vmatprep.mubr.bf16.mxu1 %v11507_v9  ;;  %v9691_v12 = vld [vmem:[#allocation3 + $0x2c0] sm:$0xff]  }
 0x348   : > { %8449 = vmatprep.subr.bf16.mxu0 %v9634_v13  ;;  %8471 = vmatprep.subr.bf16.mxu1 %v9635_v14  ;;  %v9692_v13 = vld [vmem:[#allocation3 + $0x200] sm:$0xff]  }
 0x349   : > { %v9693_v14 = vld [vmem:[#allocation3 + $0x280] sm:$0xff]  }
 0x34a   : > { %8450 = vmatpush3.bf16.msra.mxu0 %v9636_v4  ;;  %8472 = vmatpush3.bf16.msra.mxu1 %v9637_v15  ;;  %v9694_v4 = vld [vmem:[#allocation3 + $0x378] sm:$0xff]  }
 0x34b   : > { %8451 = vmatprep.subr.bf16.mxu0 %v9638_v16  ;;  %8473 = vmatprep.subr.bf16.mxu1 %v9639_v17  ;;  %v9695_v15 = vld [vmem:[#allocation3 + $0x3f8] sm:$0xff]  }
 0x34c   : > { %v9696_v16 = vld [vmem:[#allocation3 + $0x338] sm:$0xff]  }
 0x34d   : > { %v9697_v17 = vld [vmem:[#allocation3 + $0x3b8] sm:$0xff]  }
 0x34e   : > { %8452 = vmatpush3.bf16.msra.mxu0 %v9640_v18  ;;  %8474 = vmatpush3.bf16.msra.mxu1 %v9641_v19  ;;  %v9698_v18 = vld [vmem:[#allocation3 + $0x370] sm:$0xff]  }
 0x34f   : > { %8453 = vmatprep.subr.bf16.mxu0 %v9642_v20  ;;  %8475 = vmatprep.subr.bf16.mxu1 %v9643_v21  ;;  %v9699_v19 = vld [vmem:[#allocation3 + $0x3f0] sm:$0xff]  }
 0x350   : > { %v9700_v20 = vld [vmem:[#allocation3 + $0x330] sm:$0xff]  }
 0x351   : > { %v9701_v21 = vld [vmem:[#allocation3 + $0x3b0] sm:$0xff]  }
 0x352   : > { %8454 = vmatpush3.bf16.msra.mxu0 %v9644_v22  ;;  %8476 = vmatpush3.bf16.msra.mxu1 %v9645_v23  ;;  %v9702_v22 = vld [vmem:[#allocation3 + $0x368] sm:$0xff]  }
 0x353   : > { %8455 = vmatprep.subr.bf16.mxu0 %v9646_v24  ;;  %8477 = vmatprep.subr.bf16.mxu1 %v9647_v25  ;;  %v9703_v23 = vld [vmem:[#allocation3 + $0x3e8] sm:$0xff]  }
 0x354   : > { %v9704_v24 = vld [vmem:[#allocation3 + $0x328] sm:$0xff]  }
 0x355   : > { %v9705_v25 = vld [vmem:[#allocation3 + $0x3a8] sm:$0xff]  }
 0x356   : > { %8456 = vmatpush3.bf16.msra.mxu0 %v9648_v26  ;;  %8478 = vmatpush3.bf16.msra.mxu1 %v9649_v27  ;;  %v9706_v26 = vld [vmem:[#allocation3 + $0x360] sm:$0xff]  }
 0x357   : > { %8457 = vmatprep.subr.bf16.mxu0 %v9650_v28  ;;  %8479 = vmatprep.subr.bf16.mxu1 %v9651_v29  ;;  %v9707_v27 = vld [vmem:[#allocation3 + $0x3e0] sm:$0xff]  }
 0x358   : > { %v9708_v28 = vld [vmem:[#allocation3 + $0x320] sm:$0xff]  }
 0x359   : > { %v9709_v29 = vld [vmem:[#allocation3 + $0x3a0] sm:$0xff]  }
 0x35a   : > { %8458 = vmatpush3.bf16.msra.mxu0 %v9652_v30  ;;  %8480 = vmatpush3.bf16.msra.mxu1 %v9653_v31  ;;  %v9710_v30 = vld [vmem:[#allocation3 + $0x358] sm:$0xff]  }
 0x35b   : > { %8459 = vmatprep.subr.bf16.mxu0 %v9654_v32  ;;  %8481 = vmatprep.subr.bf16.mxu1 %v9655_v33  ;;  %v9711_v31 = vld [vmem:[#allocation3 + $0x3d8] sm:$0xff]   ;;  %v9714_v33 = vld [vmem:[#allocation3 + $0x350] sm:$0xff]  }
 0x35c   : > { %v9713_v32 = vld [vmem:[#allocation3 + $0x398] sm:$0xff]  }
 0x35e   : > { %8460 = vmatpush3.bf16.msra.mxu0 %v9656_v34  ;;  %8482 = vmatpush3.bf16.msra.mxu1 %v9657_v35  ;;  %v9715_v34 = vld [vmem:[#allocation3 + $0x3d0] sm:$0xff]  }
 0x35f   : > { %8461 = vmatprep.subr.bf16.mxu0 %v9658_v36  ;;  %8483 = vmatprep.subr.bf16.mxu1 %v9659_v37  ;;  %v9716_v35 = vld [vmem:[#allocation3 + $0x310] sm:$0xff]   ;;  %v9718_v37 = vld [vmem:[#allocation3 + $0x348] sm:$0xff]  }
 0x360   : > { %v9717_v36 = vld [vmem:[#allocation3 + $0x390] sm:$0xff]  }
 0x362   : > { %8462 = vmatpush3.bf16.msra.mxu0 %v9660_v38  ;;  %8484 = vmatpush3.bf16.msra.mxu1 %v9661_v39  ;;  %v9719_v38 = vld [vmem:[#allocation3 + $0x3c8] sm:$0xff]  }
 0x363   : > { %8491 = vmatprep.subr.bf16.mxu0 %v9662_v40  ;;  %8513 = vmatprep.subr.bf16.mxu1 %v9663_v41  ;;  %v9720_v39 = vld [vmem:[#allocation3 + $0x308] sm:$0xff]   ;;  %v9722_v41 = vld [vmem:[#allocation3 + $0x340] sm:$0xff]  }
 0x364   : > { %v9721_v40 = vld [vmem:[#allocation3 + $0x388] sm:$0xff]  }
 0x365   : > { %2083 = vmatmul.mubr.bf16.vlgmr.msra.gmra.mxu0 %v11509_v10  ;;  %2252 = vmatmul.mubr.bf16.vlgmr.msra.gmra.mxu1 %v11509_v10 }
 0x366   : > { %8492 = vmatpush3.bf16.msra.mxu0 %v9664_v42  ;;  %2420 = vmatprep.mubr.bf16.mxu0 %v11507_v9  ;;  %v9723_v42 = vld [vmem:[#allocation3 + $0x3c0] sm:$0xff]  }
 0x367   : > { %8514 = vmatpush3.bf16.msra.mxu1 %v9665_v43  ;;  %2589 = vmatprep.mubr.bf16.mxu1 %v11507_v9  ;;  %v9724_v43 = vld [vmem:[#allocation3 + $0x300] sm:$0xff]  }
 0x368   : > { %8493 = vmatprep.subr.bf16.mxu0 %v9666_v44  ;;  %8515 = vmatprep.subr.bf16.mxu1 %v9667_v45  ;;  %v9725_v44 = vld [vmem:[#allocation3 + $0x380] sm:$0xff]  }
 0x369   : > { %v2995_v45 = vld [vmem:[#allocation8] sm:$0xff] }
 0x36a   : > { %8494 = vmatpush3.bf16.msra.mxu0 %v9668_v46  ;;  %v10942_v46 = vmov 0  }
 0x36b   : > { %8516 = vmatpush3.bf16.msra.mxu1 %v9669_v47  ;;  %8495 = vmatprep.subr.bf16.mxu0 %v9670_v48  ;;  %v3054_v47 = vld [vmem:[#allocation11 + $0x8] sm:$0xff]  ;;  %v3803_v48 = vld [vmem:[#allocation15] sm:$0xff] }
 0x36c   : > { %8517 = vmatprep.subr.bf16.mxu1 %v9671_v49  ;;  %9596 = vset.pattern.permute.xlu1 %v10942_v46  ;;  %v3804_v49 = vld [vmem:[#allocation15 + $0x8] sm:$0xff] }
 0x36d   : > { %9597 = vset.pattern.permute.xlu0 %v10942_v46  ;;  %2998 = vperm.xlu1 %9596, %v2995_v45  }
 0x36e   : > { %8496 = vmatpush3.bf16.msra.mxu0 %v9672_v50  ;;  %v3874_v50 = vld [vmem:[#allocation18 + $0x10] sm:$0xff] }
 0x36f   : > { %8518 = vmatpush3.bf16.msra.mxu1 %v9673_v51  ;;  %8497 = vmatprep.subr.bf16.mxu0 %v9674_v52  ;;  %v3875_v51 = vld [vmem:[#allocation18 + $0x18] sm:$0xff]  ;;  %v3872_v52 = vld [vmem:[#allocation18] sm:$0xff] }
 0x370   : > { %8519 = vmatprep.subr.bf16.mxu1 %v9675_v53  ;;  %v4393_v53 = vld [vmem:[#allocation23 + $0x10] sm:$0xff] }
 0x371   : > { %3062 = vperm.xlu1 %9596, %v3054_v47  }
 0x372   : > { %8498 = vmatpush3.bf16.msra.mxu0 %v9676_v54  ;;  %v10943_v54 = vmov 0.0  }
 0x373   : > { %8520 = vmatpush3.bf16.msra.mxu1 %v9677_v55  ;;  %8499 = vmatprep.subr.bf16.mxu0 %v9678_v56  ;;  %v4394_v55 = vld [vmem:[#allocation23 + $0x18] sm:$0xff]  ;;  %v4391_v56 = vld [vmem:[#allocation23] sm:$0xff] }
 0x374   : > { %8521 = vmatprep.subr.bf16.mxu1 %v9679_v57  ;;  %v4392_v57 = vld [vmem:[#allocation23 + $0x8] sm:$0xff] }
 0x375   : > { %3807 = vperm.xlu1 %9596, %v3803_v48  }
 0x376   : > { %8500 = vmatpush3.bf16.msra.mxu0 %v9680_v58  ;;  %v4496_v58 = vld [vmem:[#allocation26 + $0x30] sm:$0xff] }
 0x377   : > { %8522 = vmatpush3.bf16.msra.mxu1 %v9681_v59  ;;  %8501 = vmatprep.subr.bf16.mxu0 %v9682_v60  ;;  %v4494_v59 = vld [vmem:[#allocation26 + $0x20] sm:$0xff] }
 0x378   : > { %8523 = vmatprep.subr.bf16.mxu1 %v9683_v62 }
 0x379   : > { %3812 = vperm.xlu1 %9596, %v3804_v49  }
 0x37a   : > { %8502 = vmatpush3.bf16.msra.mxu0 %v9684_v63 }
 0x37b   : > { %8524 = vmatpush3.bf16.msra.mxu1 %v9685_v0  ;;  %8503 = vmatprep.subr.bf16.mxu0 %v9686_v5  ;;  %v4492_v5 = vld [vmem:[#allocation26 + $0x10] sm:$0xff] }
 0x37c   : > { %8525 = vmatprep.subr.bf16.mxu1 %v9687_v6 }
 0x37d   : > { %3888 = vperm.xlu1 %9596, %v3874_v50  }
 0x37e   : > { %8504 = vmatpush3.bf16.msra.mxu0 %v9688_v7 }
 0x37f   : > { %8526 = vmatpush3.bf16.msra.mxu1 %v9689_v8  ;;  %8505 = vmatprep.subr.bf16.mxu0 %v9690_v11 }
 0x380   : > { %8527 = vmatprep.subr.bf16.mxu1 %v9691_v12 }
 0x381   : > { %3893 = vperm.xlu1 %9596, %v3875_v51  }
 0x382   : > { %8506 = vmatpush3.bf16.msra.mxu0 %v9692_v13 }
 0x383   : > { %8528 = vmatpush3.bf16.msra.mxu1 %v9693_v14  ;;  %8535 = vmatprep.subr.bf16.mxu0 %v9694_v4 }
 0x384   : > { %8557 = vmatprep.subr.bf16.mxu1 %v9695_v15  ;;  %v4490_v15 = vld [vmem:[#allocation26] sm:$0xff] }
 0x385   : > { %2421 = vmatmul.mubr.bf16.vlgmr.msra.gmra.mxu0 %v11509_v10  ;;  %3878 = vperm.xlu1 %9596, %v3872_v52  }
 0x386   : > { %2590 = vmatmul.mubr.bf16.vlgmr.msra.gmra.mxu1 %v11509_v10  ;;  %8536 = vmatpush3.bf16.msra.mxu0 %v9696_v16 }
 0x387   : > { %2758 = vmatprep.mubr.bf16.mxu0 %v11507_v9  ;;  %8558 = vmatpush3.bf16.msra.mxu1 %v9697_v17 }
 0x388   : > { %2927 = vmatprep.mubr.bf16.mxu1 %v11507_v9  ;;  %8537 = vmatprep.subr.bf16.mxu0 %v9698_v18  ;;  %v9712_v9 = vld [vmem:[#allocation3 + $0x318] sm:$0xff]  }
 0x389   : > { %8559 = vmatprep.subr.bf16.mxu1 %v9699_v19  ;;  %v4682_v19 = vld [vmem:[#allocation30 + $0x20] sm:$0xff] }
 0x38a   : > { %8538 = vmatpush3.bf16.msra.mxu0 %v9700_v20  ;;  %v4684_v20 = vld [vmem:[#allocation30 + $0x30] sm:$0xff] }
 0x38b   : > { %8560 = vmatpush3.bf16.msra.mxu1 %v9701_v21  ;;  %8539 = vmatprep.subr.bf16.mxu0 %v9702_v22  ;;  %v4678_v21 = vld [vmem:[#allocation30] sm:$0xff]  ;;  %v4680_v22 = vld [vmem:[#allocation30 + $0x10] sm:$0xff] }
 0x38c   : > { %8561 = vmatprep.subr.bf16.mxu1 %v9703_v23  ;;  %v5384_v23 = vld [vmem:[#allocation38 + $0x10] sm:$0xff] }
 0x38e   : > { %8540 = vmatpush3.bf16.msra.mxu0 %v9704_v24  ;;  %v5382_v24 = vld [vmem:[#allocation38] sm:$0xff] }
 0x38f   : > { %8562 = vmatpush3.bf16.msra.mxu1 %v9705_v25  ;;  %8541 = vmatprep.subr.bf16.mxu0 %v9706_v26 }
 0x390   : > { %8563 = vmatprep.subr.bf16.mxu1 %v9707_v27 }
 0x392   : > { %8542 = vmatpush3.bf16.msra.mxu0 %v9708_v28 }
 0x393   : > { %8564 = vmatpush3.bf16.msra.mxu1 %v9709_v29  ;;  %8543 = vmatprep.subr.bf16.mxu0 %v9710_v30  ;;  %v5311_v29 = vld [vmem:[#allocation33] sm:$0xff] }
 0x394   : > { %8565 = vmatprep.subr.bf16.mxu1 %v9711_v31 }
 0x396   : > { %8544 = vmatpush3.bf16.msra.mxu0 %v9712_v9 }
 0x397   : > { %8566 = vmatpush3.bf16.msra.mxu1 %v9713_v32  ;;  %8545 = vmatprep.subr.bf16.mxu0 %v9714_v33  ;;  %v5953_v33 = vld [vmem:[%s12067_s13 + $0x10] sm:$0xff] }
 0x398   : > { %8567 = vmatprep.subr.bf16.mxu1 %v9715_v34  ;;  %v5951_v34 = vld [vmem:[%s12067_s13] sm:$0xff] }
 0x39a   : > { %8546 = vmatpush3.bf16.msra.mxu0 %v9716_v35  ;;  %v5897_v35 = vld [vmem:[#allocation41] sm:$0xff] }
 0x39b   : > { %8568 = vmatpush3.bf16.msra.mxu1 %v9717_v36  ;;  %8547 = vmatprep.subr.bf16.mxu0 %v9718_v37  ;;  %v6520_v36 = vld [vmem:[%s11121_s4 + $0x8] sm:$0xff]  ;;  %v7474_v37 = vld [vmem:[#allocation2] sm:$0x1] }
 0x39c   : > { %8569 = vmatprep.subr.bf16.mxu1 %v9719_v38 }
 0x39e   : > { %8548 = vmatpush3.bf16.msra.mxu0 %v9720_v39 }
 0x39f   : > { %8570 = vmatpush3.bf16.msra.mxu1 %v9721_v40  ;;  %8549 = vmatprep.subr.bf16.mxu0 %v9722_v41 }
 0x3a0   : > { %8571 = vmatprep.subr.bf16.mxu1 %v9723_v42 }
 0x3a2   : > { %8550 = vmatpush3.bf16.msra.mxu0 %v9724_v43 }
 0x3a3   : > { %8572 = vmatpush3.bf16.msra.mxu1 %v9725_v44  ;;  %8781 = vmatprep.subr.bf16.mxu0 %v10943_v54 }
 0x3a4   : > { %8787 = vmatprep.subr.bf16.mxu1 %v10943_v54 }
 0x3a5   : > { %2759 = vmatmul.mubr.bf16.vlgmr.msra.gmra.mxu0 %v11509_v10 }
 0x3a6   : > { %2928 = vmatmul.mubr.bf16.vlgmr.msra.gmra.mxu1 %v11509_v10  ;;  %v3873_v10 = vld [vmem:[#allocation18 + $0x8] sm:$0xff]  ;;  %8783 = vmatprep.mubr.msk.bf16.mxu0 %vm10944_vm3, %v10943_v54 }
 0x3a7   : > { %3883 = vperm.xlu1 %9596, %v3873_v10   ;;  %8789 = vmatprep.mubr.msk.bf16.mxu1 %vm10944_vm3, %v10943_v54 }
 0x3ab   : > { %4407 = vperm.xlu1 %9596, %v4393_v53  }
 0x3af   : > { %4412 = vperm.xlu1 %9596, %v4394_v55  }
 0x3b3   : > { %4397 = vperm.xlu1 %9596, %v4391_v56  }
 0x3b7   : > { %4402 = vperm.xlu1 %9596, %v4392_v57  }
 0x3bb   : > { %4530 = vperm.xlu1 %9596, %v4496_v58  }
 0x3bf   : > { %4520 = vperm.xlu1 %9596, %v4494_v59  }
 0x3c3   : > { %4510 = vperm.xlu1 %9596, %v4492_v5  }
 0x3c7   : > { %4500 = vperm.xlu1 %9596, %v4490_v15  }
 0x3cb   : > { %4708 = vperm.xlu1 %9596, %v4682_v19  }
 0x3cf   : > { %4718 = vperm.xlu1 %9596, %v4684_v20  }
 0x3d3   : > { %4688 = vperm.xlu1 %9596, %v4678_v21  }
 0x3d7   : > { %4698 = vperm.xlu1 %9596, %v4680_v22  }
 0x3db   : > { %5398 = vperm.xlu1 %9596, %v5384_v23   ;;  %v2994_v23 = vld [vmem:[#allocation6] sm:$0xf] }
 0x3df   : > { %5388 = vperm.xlu1 %9596, %v5382_v24   ;;  %v3053_v24 = vld [vmem:[#allocation11] sm:$0xff] }
 0x3e0   : > { %3057 = vperm.xlu0 %9597, %v3053_v24   ;;  %v9741_v24 = vld [vmem:[#allocation12 + $0x58] sm:$0xff]  }
 0x3e3   : > { %5315 = vperm.xlu1 %9596, %v5311_v29   ;;  %v4683_v29 = vld [vmem:[#allocation30 + $0x28] sm:$0xff] }
 0x3e7   : > { %5967 = vperm.xlu1 %9596, %v5953_v33   ;;  %v5383_v33 = vld [vmem:[#allocation38 + $0x8] sm:$0xff] }
 0x3eb   : > { %5957 = vperm.xlu1 %9596, %v5951_v34   ;;  %v5312_v34 = vld [vmem:[#allocation33 + $0x8] sm:$0xff] }
 0x3ef   : > { %5900 = vperm.xlu1 %9596, %v5897_v35   ;;  %v5954_v35 = vld [vmem:[%s12067_s13 + $0x18] sm:$0xff] }
 0x3f3   : > { %6528 = vperm.xlu1 %9596, %v6520_v36   ;;  %v5952_v36 = vld [vmem:[%s12067_s13 + $0x8] sm:$0xff] }
 0x3f7   : > { %7477 = vperm.xlu1 %9596, %v7474_v37   ;;  %v6466_v37 = vld [vmem:[#allocation45] sm:$0xff] }
 0x405   : > { %v8419_v60 = vpop.f32.mrf.mxu0  ;;  %v8441_v62 = vpop.f32.mrf.mxu1 }
 0x407   : > { %v8420_v63 = vpop.f32.mrf.mxu0  ;;  %v8442_v0 = vpop.f32.mrf.mxu1 }
 0x408   : > { %v8421_v6 = vadd.f32 %v8420_v63, %v8419_v60  ;;  %v8443_v7 = vadd.f32 %v8442_v0, %v8441_v62 }
 0x409   : > { %v8422_v8 = vpop.f32.mrf.mxu0  ;;  %v8444_v11 = vpop.f32.mrf.mxu1 }
 0x40a   : > { %v2941_v12 = vrot.slane %v8421_v6, %v11482_v3  ;;  %v2948_v13 = vrot.slane %v8443_v7, %v11482_v3 }
 0x40b   : > { %v8423_v14 = vpop.f32.mrf.mxu0  ;;  %v8445_v4 = vpop.f32.mrf.mxu1 }
 0x40c   : > { %v2942_v16 = vsel %vm2937_vm4, %v2941_v12, 0.0  ;;  %v2949_v17 = vsel %vm2944_vm5, %v2948_v13, 0.0  ;;  %vm4558_vm4 = vcmask 261120  }
 0x40d   : > { %v2950_v18 = vadd.f32 %v2949_v17, %v2942_v16 }
 0x425   : > { %v8463_v25 = vpop.f32.mrf.mxu0  ;;  %v8485_v26 = vpop.f32.mrf.mxu1 }
 0x427   : > { %v8464_v27 = vpop.f32.mrf.mxu0  ;;  %v8486_v28 = vpop.f32.mrf.mxu1 }
 0x428   : > { %v8465_v47 = vadd.f32 %v8464_v27, %v8463_v25  ;;  %v8487_v49 = vadd.f32 %v8486_v28, %v8485_v26  ;;  %v4497_v25 = vld [vmem:[#allocation26 + $0x38] sm:$0xff]  ;;  %v4495_v26 = vld [vmem:[#allocation26 + $0x28] sm:$0xff] }
 0x429   : > { %v8466_v30 = vpop.f32.mrf.mxu0  ;;  %v8488_v31 = vpop.f32.mrf.mxu1  ;;  %4535 = vperm.xlu0 %9597, %v4497_v25   ;;  %v4493_v27 = vld [vmem:[#allocation26 + $0x18] sm:$0xff]  ;;  %v4491_v28 = vld [vmem:[#allocation26 + $0x8] sm:$0xff] }
 0x42a   : > { %v2955_v48 = vrot.slane %v8465_v47, %v11482_v3  ;;  %v2962_v52 = vrot.slane %v8487_v49, %v11482_v3  ;;  %v4685_v30 = vld [vmem:[#allocation30 + $0x38] sm:$0xff]  ;;  %v4679_v31 = vld [vmem:[#allocation30 + $0x8] sm:$0xff]  ;;  %v9726_v49 = vld [vmem:[#allocation9] sm:$0xff]  }
 0x42b   : > { %v8467_v9 = vpop.f32.mrf.mxu0  ;;  %v8489_v32 = vpop.f32.mrf.mxu1  ;;  %v9742_v25 = vld [vmem:[#allocation12 + $0x7c] sm:$0xff]  }
 0x42c   : > { %v2956_v51 = vsel %vm2951_vm6, %v2955_v48, 0.0  ;;  %v2963_v56 = vsel %vm2958_vm7, %v2962_v52, 0.0  ;;  %v4681_v9 = vld [vmem:[#allocation30 + $0x18] sm:$0xff]  ;;  %v5385_v32 = vld [vmem:[#allocation38 + $0x18] sm:$0xff] }
 0x42d   : > { %v2957_v53 = vadd.f32 %v2956_v51, %v2950_v18  ;;  %4525 = vperm.xlu0 %9597, %v4495_v26   ;;  %v9728_v51 = vld [vmem:[#allocation12 + $0x44] ss:$0 sps:$4 sm:$0x33]   ;;  %v9743_v26 = vld [vmem:[#allocation12 + $0x50] sm:$0xff]  }
 0x42f   : > { %v2964_v58 = vadd.f32 %v2963_v56, %v2957_v53  ;;  %v9729_v53 = vld [vmem:[#allocation12 + $0x18] sm:$0xff]   ;;  %v9731_v56 = vld [vmem:[#allocation12 + $0x10] sm:$0xff]  }
 0x431   : > { %4515 = vperm.xlu0 %9597, %v4493_v27   ;;  %v9744_v27 = vld [vmem:[#allocation12 + $0x74] sm:$0xff]  }
 0x435   : > { %4505 = vperm.xlu0 %9597, %v4491_v28   ;;  %v9745_v28 = vld [vmem:[#allocation12 + $0x48] sm:$0xff]  }
 0x439   : > { %4713 = vperm.xlu0 %9597, %v4683_v29   ;;  %v9746_v29 = vld [vmem:[#allocation12 + $0x6c] sm:$0xff]  }
 0x43d   : > { %4723 = vperm.xlu0 %9597, %v4685_v30   ;;  %v9747_v30 = vld [vmem:[#allocation12 + $0xb0] ss:$0 sps:$4 sm:$0x33]  }
 0x441   : > { %4693 = vperm.xlu0 %9597, %v4679_v31   ;;  %v9748_v31 = vld [vmem:[#allocation12 + $0xd4] ss:$0 sps:$4 sm:$0x33]  }
 0x445   : > { %v8507_v38 = vpop.f32.mrf.mxu0  ;;  %4703 = vperm.xlu0 %9597, %v4681_v9   ;;  %v3487_v9 = vsel %vm3165_vm14, %v9747_v30, 0 }
 0x446   : > { %v8529_v39 = vpop.f32.mrf.mxu1 }
 0x447   : > { %v8508_v40 = vpop.f32.mrf.mxu0 }
 0x448   : > { %v8530_v41 = vpop.f32.mrf.mxu1  ;;  %v8509_v50 = vadd.f32 %v8508_v40, %v8507_v38  ;;  %v6519_v38 = vld [vmem:[%s11121_s4] sm:$0xff] }
 0x449   : > { %v8510_v42 = vpop.f32.mrf.mxu0  ;;  %v8531_v55 = vadd.f32 %v8530_v41, %v8529_v39  ;;  %5403 = vperm.xlu0 %9597, %v5385_v32   ;;  %v2999_v39 = vpop.permute.xlu1 %2998  ;;  %v3567_v32 = vsel %vm3165_vm14, %v9748_v31, 0 }
 0x44a   : > { %v8532_v43 = vpop.f32.mrf.mxu1  ;;  %v2969_v10 = vrot.slane %v8509_v50, %v11482_v3  ;;  %v9727_v50 = vld [vmem:[#allocation12 + $0x20] ss:$0 sps:$4 sm:$0x33]  }
 0x44b   : > { %v8511_v44 = vpop.f32.mrf.mxu0  ;;  %v2976_v60 = vrot.slane %v8531_v55, %v11482_v3  ;;  %v3167_v52 = vsel %vm3165_vm14, %v9727_v50, 0  ;;  %v9730_v55 = vld [vmem:[#allocation12 + $0x3c] sm:$0xff]  }
 0x44c   : > { %v8533_v45 = vpop.f32.mrf.mxu1  ;;  %v2970_v57 = vsel %vm2965_vm8, %v2969_v10, 0.0  ;;  %v3247_v10 = vsel %vm3165_vm14, %v9728_v51, 0  ;;  %v9763_v50 = vld [vmem:[#allocation12 + $0xe0] sm:$0xff]  }
 0x44d   : > { %v2971_v63 = vadd.f32 %v2970_v57, %v2964_v58  ;;  %v2977_v11 = vsel %vm2972_vm9, %v2976_v60, 0.0  ;;  %5393 = vperm.xlu0 %9597, %v5383_v33   ;;  %v9732_v57 = vld [vmem:[#allocation12 + $0x34] sm:$0xff]   ;;  %v9733_v58 = vld [vmem:[#allocation12 + $0x8] sm:$0xff]   ;;  %v9735_v60 = vld [vmem:[#allocation12] sm:$0xff]  }
 0x44e   : > { %v9749_v33 = vld [vmem:[#allocation12 + $0xa8] sm:$0xff]  }
 0x44f   : > { %v2978_v14 = vadd.f32 %v2977_v11, %v2971_v63  ;;  %v9764_v51 = vld [vmem:[#allocation12 + $0x104] sm:$0xff]  }
 0x451   : > { %5320 = vperm.xlu0 %9597, %v5312_v34   ;;  %v9750_v34 = vld [vmem:[#allocation12 + $0xcc] sm:$0xff]  }
 0x455   : > { %5972 = vperm.xlu0 %9597, %v5954_v35   ;;  %v9751_v35 = vld [vmem:[#allocation12 + $0xa0] sm:$0xff]  }
 0x459   : > { %5962 = vperm.xlu0 %9597, %v5952_v36   ;;  %v9752_v36 = vld [vmem:[#allocation12 + $0xc4] sm:$0xff]  }
 0x45d   : > { %6469 = vperm.xlu0 %9597, %v6466_v37   ;;  %v9753_v37 = vld [vmem:[#allocation12 + $0x98] sm:$0xff]  }
 0x461   : > { %6523 = vperm.xlu0 %9597, %v6519_v38   ;;  %v9754_v38 = vld [vmem:[#allocation12 + $0xbc] sm:$0xff]  }
 0x465   : > { %v8551_v59 = vpop.f32.mrf.mxu0 }
 0x466   : > { %v8573_v62 = vpop.f32.mrf.mxu1 }
 0x467   : > { %v8552_v0 = vpop.f32.mrf.mxu0 }
 0x468   : > { %v8553_v5 = vadd.f32 %v8552_v0, %v8551_v59  ;;  %v8574_v6 = vpop.f32.mrf.mxu1  ;;  %v9734_v59 = vld [vmem:[#allocation12 + $0x2c] sm:$0xff]  }
 0x469   : > { %v8575_v7 = vadd.f32 %v8574_v6, %v8573_v62  ;;  %v8554_v8 = vpop.f32.mrf.mxu0  ;;  %v9736_v62 = vld [vmem:[#allocation12 + $0x24] sm:$0xff]  }
 0x46a   : > { %v2983_v12 = vrot.slane %v8553_v5, %v11482_v3  ;;  %v8576_v13 = vpop.f32.mrf.mxu1  ;;  %v3063_v5 = vpop.permute.xlu1 %3062 }
 0x46b   : > { %v2990_v4 = vrot.slane %v8575_v7, %v11482_v3  ;;  %v8555_v15 = vpop.f32.mrf.mxu0 }
 0x46c   : > { %v2984_v16 = vsel %vm2979_vm10, %v2983_v12, 0.0  ;;  %v8577_v17 = vpop.f32.mrf.mxu1  ;;  %v9737_v15 = vld [vmem:[#allocation12 + $0x68] ss:$0 sps:$4 sm:$0x33]  }
 0x46d   : > { %v2985_v18 = vadd.f32 %v2984_v16, %v2978_v14  ;;  %v2991_v19 = vsel %vm2986_vm11, %v2990_v4, 0.0  ;;  %v3058_v14 = vpop.permute.xlu0 %3057  ;;  %v9738_v16 = vld [vmem:[#allocation12 + $0x8c] ss:$0 sps:$4 sm:$0x33]  }
 0x46f   : > { %v2992_v20 = vadd.f32 %v2991_v19, %v2985_v18 }
 0x471   : > { %v2993_v21 = vpack.c.bf16 %v2992_v20, %v2992_v20  ;;  %v3327_v20 = vsel %vm3165_vm14, %v9737_v15, 0 }
 0x473   : > { %v3007_v22 = vsel %vm3005_vm12, %v2993_v21, 0  ;;  %v3407_v21 = vsel %vm3165_vm14, %v9738_v16, 0 }
 0x474   : > { %8782 = vmatpush3.bf16.msra.mxu0 %v3007_v22  ;;  %v9739_v22 = vld [vmem:[#allocation12 + $0x60] sm:$0xff]  }
 0x475   : > { %8793 = vmatprep.subr.bf16.mxu0 %v10943_v54 }
 0x477   : > { %8784 = vmatmul.mubr.msk.bf16.vlgmr.msra.gmra.mxu0 %vm3001_vm13, %v2994_v23  ;;  %v9740_v23 = vld [vmem:[#allocation12 + $0x84] sm:$0xff]  }
 0x478   : > { %8803 = vmatprep.mubr.msk.bf16.mxu0 %vm10944_vm3, %v10943_v54  ;;  %8794 = vmatpush3.bf16.msra.mxu0 %v3167_v52  ;;  %v9765_v52 = vld [vmem:[#allocation12 + $0xd8] sm:$0xff]  }
 0x479   : > { %8795 = vmatprep.subr.bf16.mxu0 %v10943_v54 }
 0x47c   : > { %8796 = vmatpush3.bf16.msra.mxu0 %v9729_v53 }
 0x47d   : > { %8797 = vmatprep.subr.bf16.mxu0 %v10943_v54 }
 0x480   : > { %8798 = vmatpush3.bf16.msra.mxu0 %v9731_v56 }
 0x481   : > { %8799 = vmatprep.subr.bf16.mxu0 %v10943_v54 }
 0x484   : > { %8800 = vmatpush3.bf16.msra.mxu0 %v9733_v58 }
 0x485   : > { %8801 = vmatprep.subr.bf16.mxu0 %v10943_v54 }
 0x488   : > { %8802 = vmatpush3.bf16.msra.mxu0 %v9735_v60 }
 0x489   : > { %8821 = vmatprep.subr.bf16.mxu0 %v10943_v54 }
 0x537   : > { %v3043_v40 = vpop.f32.mrf.mxu0 }
 0x538   : > { %v3044_v41 = vadd.f32 %v3043_v40, %v2999_v39  ;;  %v9755_v39 = vld [vmem:[#allocation12 + $0x90] sm:$0xff]  }
 0x539   : > { %v8785_v42 = vpop.f32.mrf.mxu0  ;;  %v9756_v40 = vld [vmem:[#allocation12 + $0xb4] sm:$0xff]  }
 0x53a   : > { %v3049_v43 = vmax.f32 %v3044_v41, 0.0  ;;  %v9757_v41 = vld [vmem:[#allocation12 + $0xf8] ss:$0 sps:$4 sm:$0x33]  }
 0x53b   : > { %v3046_v44 = vpop.f32.mrf.mxu0  ;;  %v9758_v42 = vld [vmem:[#allocation12 + $0x11c] ss:$0 sps:$4 sm:$0x33]  }
 0x53c   : > { %v3052_v45 = vpack.c.bf16 %v3049_v43, %v3049_v43  ;;  %v3647_v43 = vsel %vm3165_vm14, %v9757_v41, 0  ;;  %v3727_v44 = vsel %vm3165_vm14, %v9758_v42, 0 }
 0x53d   : > { %v8786_v47 = vpop.f32.mrf.mxu0 }
 0x53e   : > { %v3074_v48 = vsel %vm3005_vm12, %v3052_v45, 0  ;;  %v9759_v45 = vld [vmem:[#allocation12 + $0xf0] sm:$0xff]  }
 0x53f   : > { %8788 = vmatpush3.bf16.msra.mxu1 %v3074_v48  ;;  %v9760_v47 = vld [vmem:[#allocation12 + $0x114] sm:$0xff]   ;;  %v9761_v48 = vld [vmem:[#allocation12 + $0xe8] sm:$0xff]  }
 0x540   : > { %8807 = vmatprep.subr.bf16.mxu1 %v10943_v54 }
 0x542   : > { %8790 = vmatmul.mubr.msk.bf16.vlgmr.msra.gmra.mxu1 %vm3001_vm13, %v9726_v49  ;;  %v9762_v49 = vld [vmem:[#allocation12 + $0x10c] sm:$0xff]  }
 0x543   : > { %8817 = vmatprep.mubr.msk.bf16.mxu1 %vm10944_vm3, %v10943_v54  ;;  %8808 = vmatpush3.bf16.msra.mxu1 %v3247_v10  ;;  %v9766_v10 = vld [vmem:[#allocation12 + $0xfc] sm:$0xff]  }
 0x544   : > { %8809 = vmatprep.subr.bf16.mxu1 %v10943_v54 }
 0x547   : > { %8810 = vmatpush3.bf16.msra.mxu1 %v9730_v55 }
 0x548   : > { %8811 = vmatprep.subr.bf16.mxu1 %v10943_v54 }
 0x54b   : > { %8812 = vmatpush3.bf16.msra.mxu1 %v9732_v57 }
 0x54c   : > { %8813 = vmatprep.subr.bf16.mxu1 %v10943_v54 }
 0x54f   : > { %8814 = vmatpush3.bf16.msra.mxu1 %v9734_v59 }
 0x550   : > { %8815 = vmatprep.subr.bf16.mxu1 %v10943_v54 }
 0x553   : > { %8816 = vmatpush3.bf16.msra.mxu1 %v9736_v62 }
 0x554   : > { %8835 = vmatprep.subr.bf16.mxu1 %v10943_v54 }
 0x602   : > { %v3110_v63 = vpop.f32.mrf.mxu1 }
 0x603   : > { %v3111_v4 = vadd.f32 %v3110_v63, %v3058_v14 }
 0x604   : > { %v8791_v0 = vpop.f32.mrf.mxu1 }
 0x606   : > { %v3113_v6 = vpop.f32.mrf.mxu1 }
 0x607   : > { %v3114_v7 = vadd.f32 %v3113_v6, %v3063_v5 }
 0x608   : > { %v8792_v8 = vpop.f32.mrf.mxu1 }
 0x609   : > { %v8136_v11 = vmul.f32 -1.442695, %v3114_v7 }
 0x60b   : > { %9928 = vpow2.f32 %v8136_v11 }
 0x618   : > { %v9929_v12 = vpop.eup %9928 }
 0x619   : > { %v3120_v13 = vadd.f32 1.0, %v9929_v12 }
 0x61b   : > { %9930 = vrcp.f32 %v3120_v13 }
 0x628   : > { %v9931_v17 = vpop.eup %9930 }
 0x629   : > { %v11579_v18 = vmul.f32 %v9931_v17, %v3111_v4 }
 0x62b   : > { %v11583_v19 = vpack.c.bf16 %v11579_v18, %v11579_v18 }
 0x62d   : > { %8804 = vmatmul.mubr.msk.bf16.vlgmr.msra.gmra.mxu0 %vm3161_vm15, %v11583_v19  ;;  %8818 = vmatmul.mubr.msk.bf16.vlgmr.msra.gmra.mxu1 %vm3161_vm15, %v11583_v19 }
 0x62e   : > { %8822 = vmatpush3.bf16.msra.mxu0 %v3327_v20  ;;  %8836 = vmatpush3.bf16.msra.mxu1 %v3407_v21 }
 0x62f   : > { %8823 = vmatprep.subr.bf16.mxu0 %v10943_v54  ;;  %8837 = vmatprep.subr.bf16.mxu1 %v10943_v54 }
 0x630   : > { %8831 = vmatprep.mubr.msk.bf16.mxu0 %vm10944_vm3, %v10943_v54  ;;  %8845 = vmatprep.mubr.msk.bf16.mxu1 %vm10944_vm3, %v10943_v54 }
 0x632   : > { %8824 = vmatpush3.bf16.msra.mxu0 %v9739_v22  ;;  %8838 = vmatpush3.bf16.msra.mxu1 %v9740_v23 }
 0x633   : > { %8825 = vmatprep.subr.bf16.mxu0 %v10943_v54  ;;  %8839 = vmatprep.subr.bf16.mxu1 %v10943_v54 }
 0x636   : > { %8826 = vmatpush3.bf16.msra.mxu0 %v9741_v24  ;;  %8840 = vmatpush3.bf16.msra.mxu1 %v9742_v25 }
 0x637   : > { %8827 = vmatprep.subr.bf16.mxu0 %v10943_v54  ;;  %8841 = vmatprep.subr.bf16.mxu1 %v10943_v54 }
 0x63a   : > { %8828 = vmatpush3.bf16.msra.mxu0 %v9743_v26  ;;  %8842 = vmatpush3.bf16.msra.mxu1 %v9744_v27 }
 0x63b   : > { %8829 = vmatprep.subr.bf16.mxu0 %v10943_v54  ;;  %8843 = vmatprep.subr.bf16.mxu1 %v10943_v54 }
 0x63e   : > { %8830 = vmatpush3.bf16.msra.mxu0 %v9745_v28  ;;  %8844 = vmatpush3.bf16.msra.mxu1 %v9746_v29 }
 0x63f   : > { %8849 = vmatprep.subr.bf16.mxu0 %v10943_v54  ;;  %8863 = vmatprep.subr.bf16.mxu1 %v10943_v54 }
 0x641   : > { %8832 = vmatmul.mubr.msk.bf16.vlgmr.msra.gmra.mxu0 %vm3161_vm15, %v11583_v19  ;;  %8846 = vmatmul.mubr.msk.bf16.vlgmr.msra.gmra.mxu1 %vm3161_vm15, %v11583_v19 }
 0x642   : > { %8850 = vmatpush3.bf16.msra.mxu0 %v3487_v9  ;;  %8864 = vmatpush3.bf16.msra.mxu1 %v3567_v32 }
 0x643   : > { %8851 = vmatprep.subr.bf16.mxu0 %v10943_v54  ;;  %8865 = vmatprep.subr.bf16.mxu1 %v10943_v54 }
 0x644   : > { %8859 = vmatprep.mubr.msk.bf16.mxu0 %vm10944_vm3, %v10943_v54  ;;  %8873 = vmatprep.mubr.msk.bf16.mxu1 %vm10944_vm3, %v10943_v54 }
 0x646   : > { %8852 = vmatpush3.bf16.msra.mxu0 %v9749_v33  ;;  %8866 = vmatpush3.bf16.msra.mxu1 %v9750_v34 }
 0x647   : > { %8853 = vmatprep.subr.bf16.mxu0 %v10943_v54  ;;  %8867 = vmatprep.subr.bf16.mxu1 %v10943_v54 }
 0x64a   : > { %8854 = vmatpush3.bf16.msra.mxu0 %v9751_v35  ;;  %8868 = vmatpush3.bf16.msra.mxu1 %v9752_v36 }
 0x64b   : > { %8855 = vmatprep.subr.bf16.mxu0 %v10943_v54  ;;  %8869 = vmatprep.subr.bf16.mxu1 %v10943_v54 }
 0x64e   : > { %8856 = vmatpush3.bf16.msra.mxu0 %v9753_v37  ;;  %8870 = vmatpush3.bf16.msra.mxu1 %v9754_v38 }
 0x64f   : > { %8857 = vmatprep.subr.bf16.mxu0 %v10943_v54  ;;  %8871 = vmatprep.subr.bf16.mxu1 %v10943_v54 }
 0x652   : > { %8858 = vmatpush3.bf16.msra.mxu0 %v9755_v39  ;;  %8872 = vmatpush3.bf16.msra.mxu1 %v9756_v40 }
 0x653   : > { %8877 = vmatprep.subr.bf16.mxu0 %v10943_v54  ;;  %8891 = vmatprep.subr.bf16.mxu1 %v10943_v54 }
 0x655   : > { %8860 = vmatmul.mubr.msk.bf16.vlgmr.msra.gmra.mxu0 %vm3161_vm15, %v11583_v19  ;;  %8874 = vmatmul.mubr.msk.bf16.vlgmr.msra.gmra.mxu1 %vm3161_vm15, %v11583_v19 }
 0x656   : > { %8878 = vmatpush3.bf16.msra.mxu0 %v3647_v43  ;;  %8892 = vmatpush3.bf16.msra.mxu1 %v3727_v44  ;;  %v9767_v44 = vld [vmem:[#allocation14] sm:$0xff]  }
 0x657   : > { %8879 = vmatprep.subr.bf16.mxu0 %v10943_v54  ;;  %8893 = vmatprep.subr.bf16.mxu1 %v10943_v54 }
 0x658   : > { %8887 = vmatprep.mubr.msk.bf16.mxu0 %vm10944_vm3, %v10943_v54  ;;  %8901 = vmatprep.mubr.msk.bf16.mxu1 %vm10944_vm3, %v10943_v54 }
 0x65a   : > { %8880 = vmatpush3.bf16.msra.mxu0 %v9759_v45  ;;  %8894 = vmatpush3.bf16.msra.mxu1 %v9760_v47  ;;  %v9768_v45 = vld [vmem:[#allocation17] sm:$0xff]   ;;  %v3808_v47 = vpop.permute.xlu1 %3807 }
 0x65b   : > { %8881 = vmatprep.subr.bf16.mxu0 %v10943_v54  ;;  %8895 = vmatprep.subr.bf16.mxu1 %v10943_v54 }
 0x65e   : > { %8882 = vmatpush3.bf16.msra.mxu0 %v9761_v48  ;;  %8896 = vmatpush3.bf16.msra.mxu1 %v9762_v49 }
 0x65f   : > { %8883 = vmatprep.subr.bf16.mxu0 %v10943_v54  ;;  %8897 = vmatprep.subr.bf16.mxu1 %v10943_v54 }
 0x662   : > { %8884 = vmatpush3.bf16.msra.mxu0 %v9763_v50  ;;  %8898 = vmatpush3.bf16.msra.mxu1 %v9764_v51  ;;  %v3813_v51 = vpop.permute.xlu1 %3812 }
 0x663   : > { %8885 = vmatprep.subr.bf16.mxu0 %v10943_v54  ;;  %8899 = vmatprep.subr.bf16.mxu1 %v10943_v54 }
 0x666   : > { %8886 = vmatpush3.bf16.msra.mxu0 %v9765_v52  ;;  %8900 = vmatpush3.bf16.msra.mxu1 %v9766_v10 }
 0x667   : > { %8905 = vmatprep.subr.bf16.mxu0 %v10943_v54 }
 0x669   : > { %8888 = vmatmul.mubr.msk.bf16.vlgmr.msra.gmra.mxu0 %vm3161_vm15, %v11583_v19  ;;  %8902 = vmatmul.mubr.msk.bf16.vlgmr.msra.gmra.mxu1 %vm3161_vm15, %v11583_v19 }
 0x66a   : > { %8913 = vmatprep.mubr.msk.bf16.mxu0 %vm10944_vm3, %v10943_v54  ;;  %8919 = vmatprep.mubr.msk.bf16.mxu1 %vm3906_vm2, %v9768_v45 }
 0x6ed   : > { %v3203_v53 = vpop.f32.mrf.mxu0  ;;  %v3283_v55 = vpop.f32.mrf.mxu1 }
 0x6ee   : > { %v3770_v56 = vpack.c.bf16 %v3283_v55, %v3283_v55  ;;  %v3769_v59 = vpack.c.bf16 %v3203_v53, %v3203_v53 }
 0x6ef   : > { %v8805_v57 = vpop.f32.mrf.mxu0  ;;  %v8819_v58 = vpop.f32.mrf.mxu1 }
 0x6f0   : > { %v3778_v60 = vrot.slane %v3770_v56, 4  ;;  %v9769_v58 = vld [vmem:[#allocation17 + $0x8] sm:$0xff]  }
 0x6f1   : > { %v3206_v62 = vpop.f32.mrf.mxu0  ;;  %v3286_v63 = vpop.f32.mrf.mxu1 }
 0x6f2   : > { %v3787_v0 = vsel %vm3005_vm12, %v3769_v59, %v3778_v60  ;;  %v9770_v59 = vld [vmem:[#allocation20] sm:$0xff]   ;;  %v9771_v60 = vld [vmem:[#allocation20 + $0x8] sm:$0xff]   ;;  %v3889_v62 = vpop.permute.xlu1 %3888 }
 0x6f3   : > { %v8806_v5 = vpop.f32.mrf.mxu0  ;;  %v8820_v6 = vpop.f32.mrf.mxu1 }
 0x701   : > { %v3363_v7 = vpop.f32.mrf.mxu0  ;;  %v3443_v8 = vpop.f32.mrf.mxu1 }
 0x702   : > { %v3772_v34 = vpack.c.bf16 %v3443_v8, %v3443_v8  ;;  %v3771_v42 = vpack.c.bf16 %v3363_v7, %v3363_v7  ;;  %v3894_v7 = vpop.permute.xlu1 %3893 }
 0x703   : > { %v8833_v11 = vpop.f32.mrf.mxu0  ;;  %v8847_v12 = vpop.f32.mrf.mxu1 }
 0x704   : > { %v3780_v40 = vrot.slane %v3772_v34, 4 }
 0x705   : > { %v3366_v13 = vpop.f32.mrf.mxu0  ;;  %v3446_v14 = vpop.f32.mrf.mxu1 }
 0x706   : > { %v3791_v43 = vsel %vm3005_vm12, %v3771_v42, %v3780_v40 }
 0x707   : > { %v8834_v4 = vpop.f32.mrf.mxu0  ;;  %v8848_v15 = vpop.f32.mrf.mxu1 }
 0x715   : > { %v3523_v16 = vpop.f32.mrf.mxu0  ;;  %v3603_v17 = vpop.f32.mrf.mxu1 }
 0x716   : > { %v3774_v27 = vpack.c.bf16 %v3603_v17, %v3603_v17  ;;  %v3773_v39 = vpack.c.bf16 %v3523_v16, %v3523_v16  ;;  %v3879_v16 = vpop.permute.xlu1 %3878 }
 0x717   : > { %v8861_v19 = vpop.f32.mrf.mxu0  ;;  %v8875_v20 = vpop.f32.mrf.mxu1 }
 0x718   : > { %v3782_v35 = vrot.slane %v3774_v27, 4  ;;  %v9773_v27 = vld [vmem:[#allocation20 + $0x18] sm:$0xff]  }
 0x719   : > { %v3526_v21 = vpop.f32.mrf.mxu0  ;;  %v3606_v22 = vpop.f32.mrf.mxu1 }
 0x71a   : > { %v3795_v41 = vsel %vm3005_vm12, %v3773_v39, %v3782_v35  ;;  %v3884_v20 = vpop.permute.xlu1 %3883 }
 0x71b   : > { %v8862_v23 = vpop.f32.mrf.mxu0  ;;  %v8876_v24 = vpop.f32.mrf.mxu1 }
 0x729   : > { %v3683_v25 = vpop.f32.mrf.mxu0  ;;  %v3763_v26 = vpop.f32.mrf.mxu1 }
 0x72a   : > { %v3776_v28 = vpack.c.bf16 %v3763_v26, %v3763_v26  ;;  %v3775_v31 = vpack.c.bf16 %v3683_v25, %v3683_v25  ;;  %v9772_v26 = vld [vmem:[#allocation20 + $0x10] sm:$0xff]  }
 0x72b   : > { %v8889_v29 = vpop.f32.mrf.mxu0  ;;  %v8903_v30 = vpop.f32.mrf.mxu1 }
 0x72c   : > { %v3784_v9 = vrot.slane %v3776_v28, 4  ;;  %v9774_v29 = vld [vmem:[#allocation20 + $0x20] sm:$0xff]   ;;  %v9775_v30 = vld [vmem:[#allocation20 + $0x28] sm:$0xff]  }
 0x72d   : > { %v3686_v32 = vpop.f32.mrf.mxu0  ;;  %v3766_v33 = vpop.f32.mrf.mxu1 }
 0x72e   : > { %v3799_v36 = vsel %vm3005_vm12, %v3775_v31, %v3784_v9  ;;  %v9776_v31 = vld [vmem:[#allocation20 + $0x30] sm:$0xff]   ;;  %v9777_v9 = vld [vmem:[#allocation20 + $0x38] sm:$0xff]   ;;  %v9778_v32 = vld [vmem:[#allocation21] sm:$0xff]  }
 0x72f   : > { %v8890_v37 = vpop.f32.mrf.mxu0  ;;  %v8904_v38 = vpop.f32.mrf.mxu1  ;;  %8906 = vmatpush3.bf16.msra.mxu0 %v3799_v36 }
 0x730   : > { %8907 = vmatprep.subr.bf16.mxu0 %v10943_v54 }
 0x733   : > { %8908 = vmatpush3.bf16.msra.mxu0 %v3795_v41 }
 0x734   : > { %8909 = vmatprep.subr.bf16.mxu0 %v10943_v54 }
 0x737   : > { %8910 = vmatpush3.bf16.msra.mxu0 %v3791_v43 }
 0x738   : > { %8911 = vmatprep.subr.bf16.mxu0 %v10943_v54 }
 0x73b   : > { %8912 = vmatpush3.bf16.msra.mxu0 %v3787_v0 }
 0x73c   : > { %8929 = vmatprep.subr.bf16.mxu0 %v10943_v54 }
 0x73e   : > { %8914 = vmatmul.mubr.msk.bf16.vlgmr.msra.gmra.mxu0 %vm3820_vm1, %v9767_v44 }
 0x73f   : > { %8931 = vmatprep.mubr.msk.bf16.mxu0 %vm10944_vm3, %v10943_v54  ;;  %8930 = vmatpush3.bf16.msra.mxu0 %v9771_v60 }
 0x740   : > { %8941 = vmatprep.subr.bf16.mxu0 %v10943_v54 }
 0x7fe   : > { %v3858_v48 = vpop.f32.mrf.mxu0 }
 0x7ff   : > { %v3859_v50 = vadd.f32 %v3858_v48, %v3808_v47 }
 0x800   : > { %v8915_v49 = vpop.f32.mrf.mxu0 }
 0x801   : > { %v3865_v55 = vmax.f32 %v3859_v50, 0.0 }
 0x802   : > { %v3861_v52 = vpop.f32.mrf.mxu0 }
 0x803   : > { %v3862_v10 = vadd.f32 %v3861_v52, %v3813_v51 }
 0x804   : > { %v8916_v53 = vpop.f32.mrf.mxu0 }
 0x805   : > { %v3866_v56 = vmax.f32 %v3862_v10, 0.0 }
 0x807   : > { %v3871_v57 = vpack.c.bf16 %v3866_v56, %v3865_v55 }
 0x809   : > { %8917 = vmatprep.subr.bf16.mxu1 %v3871_v57 }
 0x80a   : > { %8918 = vmatpush3.bf16.msra.mxu1 %v3871_v57 }
 0x80b   : > { %8923 = vmatprep.subr.bf16.mxu1 %v10943_v54 }
 0x80d   : > { %8920 = vmatmul.mubr.msk.bf16.vlgmr.msra.gmra.mxu1 %vm3906_vm2, %v9769_v58 }
 0x80e   : > { %8925 = vmatprep.mubr.msk.bf16.mxu1 %vm10944_vm3, %v10943_v54  ;;  %8924 = vmatpush3.bf16.msra.mxu1 %v9770_v59 }
 0x80f   : > { %8935 = vmatprep.subr.bf16.mxu1 %v10943_v54 }
 0x8cd   : > { %v8921_v63 = vpop.f32.mrf.mxu1 }
 0x8ce   : > { %v3956_v0 = vadd.f32 %v8921_v63, %v3889_v62 }
 0x8cf   : > { %v3947_v5 = vpop.f32.mrf.mxu1 }
 0x8d0   : > { %v8191_v6 = vmul.f32 -1.442695, %v3956_v0  ;;  %v3948_v21 = vadd.f32 %v3947_v5, %v3879_v16  ;;  %v9779_v16 = vld [vmem:[#allocation21 + $0x8] sm:$0xff]  }
 0x8d1   : > { %v8922_v8 = vpop.f32.mrf.mxu1 }
 0x8d2   : > { %9932 = vpow2.f32 %v8191_v6  ;;  %v3959_v11 = vadd.f32 %v8922_v8, %v3894_v7 }
 0x8d3   : > { %v3950_v17 = vpop.f32.mrf.mxu1 }
 0x8d4   : > { %v8192_v12 = vmul.f32 -1.442695, %v3959_v11  ;;  %v3951_v22 = vadd.f32 %v3950_v17, %v3884_v20  ;;  %v9780_v17 = vld [vmem:[#allocation24] sm:$0xff]  }
 0x8d6   : > { %9934 = vpow2.f32 %v8192_v12 }
 0x8df   : > { %v9933_v13 = vpop.eup %9932 }
 0x8e0   : > { %v3968_v14 = vadd.f32 1.0, %v9933_v13 }
 0x8e2   : > { %9936 = vrcp.f32 %v3968_v14 }
 0x8e3   : > { %v9935_v4 = vpop.eup %9934 }
 0x8e4   : > { %v3969_v15 = vadd.f32 1.0, %v9935_v4 }
 0x8e6   : > { %9938 = vrcp.f32 %v3969_v15 }
 0x8ef   : > { %v9937_v19 = vpop.eup %9936 }
 0x8f0   : > { %v11668_v24 = vmul.f32 %v9937_v19, %v3948_v21  ;;  %v4408_v19 = vpop.permute.xlu1 %4407 }
 0x8f3   : > { %v9939_v23 = vpop.eup %9938 }
 0x8f4   : > { %v11670_v25 = vmul.f32 %v9939_v23, %v3951_v22  ;;  %v4413_v20 = vpop.permute.xlu1 %4412 }
 0x8f6   : > { %v11674_v28 = vpack.c.bf16 %v11670_v25, %v11668_v24 }
 0x8f8   : > { %8926 = vmatmul.mubr.msk.bf16.vlgmr.msra.gmra.mxu1 %vm3906_vm2, %v11674_v28  ;;  %8932 = vmatmul.mubr.msk.bf16.vlgmr.msra.gmra.mxu0 %vm3906_vm2, %v11674_v28  ;;  %v4398_v21 = vpop.permute.xlu1 %4397 }
 0x8f9   : > { %8936 = vmatpush3.bf16.msra.mxu1 %v9772_v26  ;;  %8942 = vmatpush3.bf16.msra.mxu0 %v9773_v27 }
 0x8fa   : > { %8937 = vmatprep.mubr.msk.bf16.mxu1 %vm10944_vm3, %v10943_v54  ;;  %8943 = vmatprep.mubr.msk.bf16.mxu0 %vm10944_vm3, %v10943_v54 }
 0x8fb   : > { %8947 = vmatprep.subr.bf16.mxu1 %v10943_v54  ;;  %8953 = vmatprep.subr.bf16.mxu0 %v10943_v54 }
 0x900   : > { %8938 = vmatmul.mubr.msk.bf16.vlgmr.msra.gmra.mxu1 %vm3906_vm2, %v11674_v28  ;;  %8944 = vmatmul.mubr.msk.bf16.vlgmr.msra.gmra.mxu0 %vm3906_vm2, %v11674_v28 }
 0x901   : > { %8948 = vmatpush3.bf16.msra.mxu1 %v9774_v29  ;;  %8954 = vmatpush3.bf16.msra.mxu0 %v9775_v30 }
 0x902   : > { %8949 = vmatprep.mubr.msk.bf16.mxu1 %vm10944_vm3, %v10943_v54  ;;  %8955 = vmatprep.mubr.msk.bf16.mxu0 %vm10944_vm3, %v10943_v54 }
 0x903   : > { %8959 = vmatprep.subr.bf16.mxu1 %v10943_v54  ;;  %8965 = vmatprep.subr.bf16.mxu0 %v10943_v54 }
 0x908   : > { %8950 = vmatmul.mubr.msk.bf16.vlgmr.msra.gmra.mxu1 %vm3906_vm2, %v11674_v28  ;;  %8956 = vmatmul.mubr.msk.bf16.vlgmr.msra.gmra.mxu0 %vm3906_vm2, %v11674_v28 }
 0x909   : > { %8960 = vmatpush3.bf16.msra.mxu1 %v9776_v31  ;;  %8966 = vmatpush3.bf16.msra.mxu0 %v9777_v9  ;;  %v4403_v31 = vpop.permute.xlu1 %4402 }
 0x90a   : > { %8961 = vmatprep.mubr.msk.bf16.mxu1 %vm10944_vm3, %v10943_v54  ;;  %8967 = vmatprep.mubr.msk.bf16.mxu0 %vm10944_vm3, %v10943_v54 }
 0x910   : > { %8962 = vmatmul.mubr.msk.bf16.vlgmr.msra.gmra.mxu1 %vm3906_vm2, %v11674_v28  ;;  %8968 = vmatmul.mubr.msk.bf16.vlgmr.msra.gmra.mxu0 %vm3906_vm2, %v11674_v28 }
 0x911   : > { %8987 = vmatprep.mubr.bf16.mxu1 %v9778_v32  ;;  %8995 = vmatprep.mubr.msk.bf16.mxu0 %vm4558_vm4, %v9780_v17 }
 0x9b8   : > { %v4022_v33 = vpop.f32.mrf.mxu1  ;;  %v4072_v34 = vpop.f32.mrf.mxu0 }
 0x9ba   : > { %v8927_v35 = vpop.f32.mrf.mxu1  ;;  %v8933_v36 = vpop.f32.mrf.mxu0 }
 0x9bc   : > { %v4025_v37 = vpop.f32.mrf.mxu1  ;;  %v4075_v38 = vpop.f32.mrf.mxu0 }
 0x9bd   : > { %v4380_v4 = vpack.c.bf16 %v4075_v38, %v4072_v34  ;;  %v4379_v15 = vpack.c.bf16 %v4025_v37, %v4022_v33 }
 0x9be   : > { %v8928_v39 = vpop.f32.mrf.mxu1  ;;  %v8934_v40 = vpop.f32.mrf.mxu0 }
 0x9bf   : > { %v9781_v39 = vld [vmem:[#allocation24 + $0x8] sm:$0xff]   ;;  %v9782_v40 = vld [vmem:[#allocation24 + $0x10] sm:$0xff]  }
 0x9c0   : > { %v4122_v41 = vpop.f32.mrf.mxu1  ;;  %v4172_v42 = vpop.f32.mrf.mxu0 }
 0x9c2   : > { %v8939_v43 = vpop.f32.mrf.mxu1  ;;  %v8945_v44 = vpop.f32.mrf.mxu0 }
 0x9c4   : > { %v4125_v45 = vpop.f32.mrf.mxu1  ;;  %v4175_v47 = vpop.f32.mrf.mxu0 }
 0x9c5   : > { %v4382_v13 = vpack.c.bf16 %v4175_v47, %v4172_v42  ;;  %v4381_v14 = vpack.c.bf16 %v4125_v45, %v4122_v41  ;;  %v9783_v41 = vld [vmem:[#allocation24 + $0x18] sm:$0xff]   ;;  %v9784_v42 = vld [vmem:[#allocation29] sm:$0xff]   ;;  %v4531_v45 = vpop.permute.xlu1 %4530 }
 0x9c6   : > { %v8940_v48 = vpop.f32.mrf.mxu1  ;;  %v8946_v49 = vpop.f32.mrf.mxu0 }
 0x9c7   : > { %v4536_v49 = vpop.permute.xlu0 %4535 }
 0x9c8   : > { %v4222_v50 = vpop.f32.mrf.mxu1  ;;  %v4272_v51 = vpop.f32.mrf.mxu0 }
 0x9ca   : > { %v8951_v52 = vpop.f32.mrf.mxu1  ;;  %v8957_v10 = vpop.f32.mrf.mxu0 }
 0x9cb   : > { %v4521_v52 = vpop.permute.xlu1 %4520 }
 0x9cc   : > { %v4225_v53 = vpop.f32.mrf.mxu1  ;;  %v4275_v55 = vpop.f32.mrf.mxu0 }
 0x9cd   : > { %v4384_v11 = vpack.c.bf16 %v4275_v55, %v4272_v51  ;;  %v4383_v12 = vpack.c.bf16 %v4225_v53, %v4222_v50 }
 0x9ce   : > { %v8952_v56 = vpop.f32.mrf.mxu1  ;;  %v8958_v57 = vpop.f32.mrf.mxu0 }
 0x9d0   : > { %v4322_v58 = vpop.f32.mrf.mxu1  ;;  %v4372_v59 = vpop.f32.mrf.mxu0 }
 0x9d2   : > { %v8963_v60 = vpop.f32.mrf.mxu1  ;;  %v8969_v62 = vpop.f32.mrf.mxu0 }
 0x9d4   : > { %v4325_v63 = vpop.f32.mrf.mxu1  ;;  %v4375_v0 = vpop.f32.mrf.mxu0 }
 0x9d5   : > { %v4386_v5 = vpack.c.bf16 %v4375_v0, %v4372_v59  ;;  %v4385_v8 = vpack.c.bf16 %v4325_v63, %v4322_v58  ;;  %v4526_v59 = vpop.permute.xlu0 %4525 }
 0x9d6   : > { %v8964_v6 = vpop.f32.mrf.mxu1  ;;  %v8970_v7 = vpop.f32.mrf.mxu0 }
 0x9d7   : > { %8971 = vmatprep.subr.bf16.mxu1 %v4386_v5 }
 0x9d8   : > { %8972 = vmatpush3.bf16.msra.mxu1 %v4386_v5 }
 0x9d9   : > { %8973 = vmatprep.subr.bf16.mxu1 %v4385_v8 }
 0x9dc   : > { %8974 = vmatpush3.bf16.msra.mxu1 %v4385_v8 }
 0x9dd   : > { %8975 = vmatprep.subr.bf16.mxu1 %v4384_v11 }
 0x9e0   : > { %8976 = vmatpush3.bf16.msra.mxu1 %v4384_v11 }
 0x9e1   : > { %8977 = vmatprep.subr.bf16.mxu1 %v4383_v12 }
 0x9e4   : > { %8978 = vmatpush3.bf16.msra.mxu1 %v4383_v12 }
 0x9e5   : > { %8979 = vmatprep.subr.bf16.mxu1 %v4382_v13 }
 0x9e8   : > { %8980 = vmatpush3.bf16.msra.mxu1 %v4382_v13 }
 0x9e9   : > { %8981 = vmatprep.subr.bf16.mxu1 %v4381_v14 }
 0x9ec   : > { %8982 = vmatpush3.bf16.msra.mxu1 %v4381_v14 }
 0x9ed   : > { %8983 = vmatprep.subr.bf16.mxu1 %v4380_v4 }
 0x9f0   : > { %8984 = vmatpush3.bf16.msra.mxu1 %v4380_v4  ;;  %v4511_v4 = vpop.permute.xlu1 %4510 }
 0x9f1   : > { %8985 = vmatprep.subr.bf16.mxu1 %v4379_v15 }
 0x9f4   : > { %8986 = vmatpush3.bf16.msra.mxu1 %v4379_v15  ;;  %v4516_v15 = vpop.permute.xlu0 %4515 }
 0x9f7   : > { %8988 = vmatmul.mubr.bf16.vlgmr.msra.gmra.mxu1 %v9779_v16 }
 0xab7   : > { %v8989_v22 = vpop.f32.mrf.mxu1 }
 0xab8   : > { %v4470_v26 = vadd.f32 %v8989_v22, %v4408_v19  ;;  %v4501_v22 = vpop.permute.xlu1 %4500 }
 0xab9   : > { %v4461_v23 = vpop.f32.mrf.mxu1 }
 0xaba   : > { %v4462_v29 = vadd.f32 %v4461_v23, %v4398_v21  ;;  %v4478_v32 = vmax.f32 %v4470_v26, 0.0  ;;  %v4506_v23 = vpop.permute.xlu0 %4505 }
 0xabb   : > { %v8990_v27 = vpop.f32.mrf.mxu1 }
 0xabc   : > { %v4473_v30 = vadd.f32 %v8990_v27, %v4413_v20  ;;  %v4476_v35 = vmax.f32 %v4462_v29, 0.0 }
 0xabd   : > { %v4464_v9 = vpop.f32.mrf.mxu1 }
 0xabe   : > { %v4479_v33 = vmax.f32 %v4473_v30, 0.0  ;;  %v4465_v34 = vadd.f32 %v4464_v9, %v4403_v31 }
 0xac0   : > { %v4489_v36 = vpack.c.bf16 %v4479_v33, %v4478_v32  ;;  %v4477_v37 = vmax.f32 %v4465_v34, 0.0 }
 0xac2   : > { %v4488_v38 = vpack.c.bf16 %v4477_v37, %v4476_v35  ;;  %8991 = vmatprep.subr.bf16.mxu0 %v4489_v36  ;;  %v9785_v35 = vld [vmem:[#allocation29 + $0x8] sm:$0xff]   ;;  %v9787_v37 = vld [vmem:[#allocation29 + $0x18] sm:$0xff]  }
 0xac3   : > { %8992 = vmatpush3.bf16.msra.mxu0 %v4489_v36  ;;  %v9786_v36 = vld [vmem:[#allocation29 + $0x10] sm:$0xff]  }
 0xac4   : > { %8993 = vmatprep.subr.bf16.mxu0 %v4488_v38 }
 0xac7   : > { %8994 = vmatpush3.bf16.msra.mxu0 %v4488_v38  ;;  %v10945_v38 = vmov 65535  }
 0xaca   : > { %8996 = vmatmul.mubr.msk.bf16.vlgmr.msra.gmra.mxu0 %vm4558_vm4, %v9781_v39  ;;  %v4861_v39 = vsel %vm1521_vm0, 4294967295, %v10945_v38  ;;  %vm4854_vm0 = vcmask 23552  }
 0xacb   : > { %8999 = vmatprep.mubr.msk.bf16.mxu0 %vm4558_vm4, %v9782_v40  ;;  %v11718_v40 = vsel %vm3165_vm14, %v4861_v39, 0  ;;  %v5142_v39 = vld [vmem:[#allocation27 + $0xa] sm:$0x3] }
 0xad2   : > { %9000 = vmatmul.mubr.msk.bf16.gmra.mxu0 %vm4558_vm4, %v9783_v41  ;;  %v4918_v41 = vld [vmem:[#allocation27 + $0x2] sm:$0x3] }
 0xad3   : > { %9007 = vmatprep.mubr.msk.bf16.mxu0 %vm4558_vm4, %v9784_v42  ;;  %v4853_v42 = vld [vmem:[#allocation27] sm:$0x3] }
 0xb8a   : > { %v8997_v43 = vpop.f32.mrf.mxu0 }
 0xb8b   : > { %v4614_v19 = vadd.f32 %v8997_v43, %v4511_v4  ;;  %v4920_v43 = vand.u32 %v4918_v41, %v11718_v40  ;;  %v5086_v41 = vld [vmem:[#allocation27 + $0x8] sm:$0x3] }
 0xb8c   : > { %v4605_v44 = vpop.f32.mrf.mxu0 }
 0xb8d   : > { %v4606_v26 = vadd.f32 %v4605_v44, %v4501_v22  ;;  %v4864_v44 = vand.u32 %v11718_v40, %v4853_v42 }
 0xb8e   : > { %v8998_v47 = vpop.f32.mrf.mxu0 }
 0xb8f   : > { %v4617_v20 = vadd.f32 %v8998_v47, %v4516_v15  ;;  %9015 = vmatprep.subr.bf16.mxu1 %v4864_v44  ;;  %v5030_v47 = vld [vmem:[#allocation27 + $0x6] sm:$0x3] }
 0xb90   : > { %v4608_v48 = vpop.f32.mrf.mxu0  ;;  %9016 = vmatpush3.bf16.msra.mxu1 %v4864_v44  ;;  %v5144_v44 = vand.u32 %v5142_v39, %v11718_v40 }
 0xb91   : > { %v4609_v27 = vadd.f32 %v4608_v48, %v4506_v23 }
 0xb92   : > { %v9001_v50 = vpop.f32.mrf.mxu0 }
 0xb93   : > { %v4630_v51 = vadd.f32 %v9001_v50, %v4531_v45  ;;  %v4974_v45 = vld [vmem:[#allocation27 + $0x4] sm:$0x3] }
 0xb94   : > { %v4621_v10 = vpop.f32.mrf.mxu0  ;;  %v11723_v48 = vand.u32 %v4974_v45, %v11718_v40  ;;  %v5088_v45 = vand.u32 %v5086_v41, %v11718_v40 }
 0xb95   : > { %v8221_v53 = vmul.f32 -1.442695, %v4630_v51  ;;  %v4622_v55 = vadd.f32 %v4621_v10, %v4521_v52  ;;  %v4709_v51 = vpop.permute.xlu1 %4708 }
 0xb96   : > { %v9002_v56 = vpop.f32.mrf.mxu0  ;;  %9027 = vmatprep.subr.bf16.mxu1 %v11723_v48 }
 0xb97   : > { %9940 = vpow2.f32 %v8221_v53  ;;  %v8219_v57 = vmul.f32 -1.442695, %v4622_v55  ;;  %v4633_v58 = vadd.f32 %v9002_v56, %v4536_v49  ;;  %v11726_v49 = vand.u32 %v5030_v47, %v11718_v40  ;;  %v4714_v53 = vpop.permute.xlu0 %4713  ;;  %v5254_v47 = vld [vmem:[#allocation27 + $0xe] sm:$0x3] }
 0xb98   : > { %v4624_v60 = vpop.f32.mrf.mxu0 }
 0xb99   : > { %9942 = vpow2.f32 %v8219_v57  ;;  %v8222_v62 = vmul.f32 -1.442695, %v4633_v58  ;;  %v4625_v63 = vadd.f32 %v4624_v60, %v4526_v59  ;;  %v4719_v56 = vpop.permute.xlu1 %4718 }
 0xb9b   : > { %9944 = vpow2.f32 %v8222_v62  ;;  %v8220_v0 = vmul.f32 -1.442695, %v4625_v63  ;;  %v4724_v63 = vpop.permute.xlu0 %4723 }
 0xb9d   : > { %9946 = vpow2.f32 %v8220_v0  ;;  %v4689_v22 = vpop.permute.xlu1 %4688 }
 0xba4   : > { %v9941_v5 = vpop.eup %9940 }
 0xba5   : > { %v4650_v6 = vadd.f32 1.0, %v9941_v5 }
 0xba6   : > { %v9943_v7 = vpop.eup %9942 }
 0xba7   : > { %v4648_v8 = vadd.f32 1.0, %v9943_v7  ;;  %9948 = vrcp.f32 %v4650_v6 }
 0xba8   : > { %v9945_v11 = vpop.eup %9944 }
 0xba9   : > { %v4651_v12 = vadd.f32 1.0, %v9945_v11  ;;  %9950 = vrcp.f32 %v4648_v8 }
 0xbaa   : > { %v9947_v13 = vpop.eup %9946 }
 0xbab   : > { %9952 = vrcp.f32 %v4651_v12  ;;  %v4649_v14 = vadd.f32 1.0, %v9947_v13 }
 0xbad   : > { %9954 = vrcp.f32 %v4649_v14 }
 0xbb4   : > { %v9949_v16 = vpop.eup %9948 }
 0xbb5   : > { %v4662_v29 = vmul.f32 %v9949_v16, %v4614_v19 }
 0xbb6   : > { %v9951_v17 = vpop.eup %9950 }
 0xbb7   : > { %v4660_v32 = vmul.f32 %v9951_v17, %v4606_v26 }
 0xbb8   : > { %v9953_v21 = vpop.eup %9952 }
 0xbb9   : > { %v4663_v30 = vmul.f32 %v9953_v21, %v4617_v20  ;;  %v4694_v21 = vpop.permute.xlu0 %4693 }
 0xbba   : > { %v9955_v31 = vpop.eup %9954 }
 0xbbb   : > { %v4677_v9 = vpack.c.bf16 %v4663_v30, %v4662_v29  ;;  %v4661_v33 = vmul.f32 %v9955_v31, %v4609_v27  ;;  %v4699_v31 = vpop.permute.xlu1 %4698 }
 0xbbd   : > { %9003 = vmatprep.subr.bf16.mxu0 %v4677_v9  ;;  %v4676_v34 = vpack.c.bf16 %v4661_v33, %v4660_v32  ;;  %v4704_v26 = vpop.permute.xlu0 %4703 }
 0xbbe   : > { %9004 = vmatpush3.bf16.msra.mxu0 %v4677_v9 }
 0xbbf   : > { %9005 = vmatprep.subr.bf16.mxu0 %v4676_v34 }
 0xbc2   : > { %9006 = vmatpush3.bf16.msra.mxu0 %v4676_v34 }
 0xbc3   : > { %9021 = vmatprep.subr.bf16.mxu0 %v4920_v43 }
 0xbc5   : > { %9008 = vmatmul.mubr.msk.bf16.vlgmr.msra.gmra.mxu0 %vm4558_vm4, %v9785_v35 }
 0xbc6   : > { %9011 = vmatprep.mubr.msk.bf16.mxu0 %vm4558_vm4, %v9786_v36  ;;  %9022 = vmatpush3.bf16.msra.mxu0 %v4920_v43 }
 0xbc7   : > { %9033 = vmatprep.subr.bf16.mxu0 %v11726_v49 }
 0xbcd   : > { %9012 = vmatmul.mubr.msk.bf16.gmra.mxu0 %vm4558_vm4, %v9787_v37 }
 0xc85   : > { %v9009_v50 = vpop.f32.mrf.mxu0 }
 0xc86   : > { %v4801_v34 = vadd.f32 %v9009_v50, %v4699_v31  ;;  %v5198_v50 = vld [vmem:[#allocation27 + $0xc] sm:$0x3]  ;;  %v5399_v31 = vpop.permute.xlu1 %5398 }
 0xc87   : > { %v4792_v52 = vpop.f32.mrf.mxu0 }
 0xc88   : > { %v4793_v9 = vadd.f32 %v4792_v52, %v4689_v22  ;;  %v5200_v52 = vand.u32 %v5198_v50, %v11718_v40 }
 0xc89   : > { %v9010_v10 = vpop.f32.mrf.mxu0 }
 0xc8a   : > { %v4804_v29 = vadd.f32 %v9010_v10, %v4704_v26  ;;  %v9793_v10 = vld [vmem:[#allocation35] sm:$0xff]  }
 0xc8b   : > { %v4795_v55 = vpop.f32.mrf.mxu0 }
 0xc8c   : > { %v4796_v32 = vadd.f32 %v4795_v55, %v4694_v21 }
 0xc8d   : > { %v9013_v57 = vpop.f32.mrf.mxu0 }
 0xc8e   : > { %v4817_v58 = vadd.f32 %v9013_v57, %v4719_v56 }
 0xc8f   : > { %v4808_v59 = vpop.f32.mrf.mxu0 }
 0xc90   : > { %v8233_v60 = vmul.f32 -1.442695, %v4817_v58  ;;  %v4809_v62 = vadd.f32 %v4808_v59, %v4709_v51  ;;  %v5256_v51 = vand.u32 %v5254_v47, %v11718_v40  ;;  %v9788_v40 = vld [vmem:[#allocation36] sm:$0xff]  }
 0xc91   : > { %v9014_v0 = vpop.f32.mrf.mxu0 }
 0xc92   : > { %v8231_v5 = vmul.f32 -1.442695, %v4809_v62  ;;  %v4820_v6 = vadd.f32 %v9014_v0, %v4724_v63  ;;  %9956 = vpow2.f32 %v8233_v60 }
 0xc93   : > { %v4811_v7 = vpop.f32.mrf.mxu0 }
 0xc94   : > { %9958 = vpow2.f32 %v8231_v5  ;;  %v8234_v8 = vmul.f32 -1.442695, %v4820_v6  ;;  %v4812_v11 = vadd.f32 %v4811_v7, %v4714_v53 }
 0xc96   : > { %9960 = vpow2.f32 %v8234_v8  ;;  %v8232_v12 = vmul.f32 -1.442695, %v4812_v11 }
 0xc98   : > { %9962 = vpow2.f32 %v8232_v12 }
 0xc9f   : > { %v9957_v13 = vpop.eup %9956 }
 0xca0   : > { %v4837_v16 = vadd.f32 1.0, %v9957_v13 }
 0xca1   : > { %v9959_v14 = vpop.eup %9958 }
 0xca2   : > { %v4835_v4 = vadd.f32 1.0, %v9959_v14 }
 0xca3   : > { %v9961_v15 = vpop.eup %9960 }
 0xca4   : > { %v4838_v17 = vadd.f32 1.0, %v9961_v15  ;;  %9964 = vrcp.f32 %v4835_v4 }
 0xca5   : > { %v9963_v19 = vpop.eup %9962 }
 0xca6   : > { %9966 = vrcp.f32 %v4838_v17  ;;  %v4836_v20 = vadd.f32 1.0, %v9963_v19 }
 0xca7   : > { %9968 = vrcp.f32 %v4837_v16 }
 0xca8   : > { %9970 = vrcp.f32 %v4836_v20 }
 0xcb1   : > { %v9965_v23 = vpop.eup %9964 }
 0xcb2   : > { %v4847_v36 = vmul.f32 %v9965_v23, %v4793_v9 }
 0xcb3   : > { %v9967_v27 = vpop.eup %9966 }
 0xcb4   : > { %v9969_v30 = vpop.eup %9968  ;;  %v4850_v35 = vmul.f32 %v9967_v27, %v4804_v29 }
 0xcb5   : > { %v9971_v33 = vpop.eup %9970  ;;  %v4849_v38 = vmul.f32 %v9969_v30, %v4801_v34 }
 0xcb6   : > { %v4848_v37 = vmul.f32 %v9971_v33, %v4796_v32 }
 0xcb7   : > { %v4852_v43 = vpack.c.bf16 %v4850_v35, %v4849_v38 }
 0xcb8   : > { %v4851_v42 = vpack.c.bf16 %v4848_v37, %v4847_v36  ;;  %v5404_v37 = vpop.permute.xlu0 %5403 }
 0xcba   : > { %9017 = vmatprep.mubr.msk.bf16.mxu1 %vm4854_vm0, %v4851_v42  ;;  %9023 = vmatprep.mubr.msk.bf16.mxu0 %vm4854_vm0, %v4851_v42 }
 0xcbb   : > { %9018 = vmatmul.mubr.msk.bf16.vlgmr.msra.gmra.mxu1 %vm4854_vm0, %v4852_v43  ;;  %9024 = vmatmul.mubr.msk.bf16.vlgmr.msra.gmra.mxu0 %vm4854_vm0, %v4852_v43 }
 0xcbc   : > { %9029 = vmatprep.mubr.msk.bf16.mxu1 %vm4854_vm0, %v4851_v42  ;;  %9035 = vmatprep.mubr.msk.bf16.mxu0 %vm4854_vm0, %v4851_v42 }
 0xcbd   : > { %9028 = vmatpush3.bf16.msra.mxu1 %v11723_v48  ;;  %9034 = vmatpush3.bf16.msra.mxu0 %v11726_v49  ;;  %v9789_v48 = vld [vmem:[#allocation36 + $0x8] sm:$0xff]  }
 0xcbe   : > { %9045 = vmatprep.subr.bf16.mxu0 %v5144_v44  ;;  %9039 = vmatprep.subr.bf16.mxu1 %v5088_v45  ;;  %v9792_v49 = vld [vmem:[#allocation32 + $0x4] ss:$8 sps:$4 sm:$0xff]  }
 0xcc3   : > { %9030 = vmatmul.mubr.msk.bf16.vlgmr.msra.gmra.mxu1 %vm4854_vm0, %v4852_v43  ;;  %9036 = vmatmul.mubr.msk.bf16.vlgmr.msra.gmra.mxu0 %vm4854_vm0, %v4852_v43 }
 0xcc4   : > { %9041 = vmatprep.mubr.msk.bf16.mxu1 %vm4854_vm0, %v4851_v42  ;;  %9047 = vmatprep.mubr.msk.bf16.mxu0 %vm4854_vm0, %v4851_v42 }
 0xcc5   : > { %9046 = vmatpush3.bf16.msra.mxu0 %v5144_v44  ;;  %9040 = vmatpush3.bf16.msra.mxu1 %v5088_v45 }
 0xcc6   : > { %9057 = vmatprep.subr.bf16.mxu0 %v5256_v51  ;;  %9051 = vmatprep.subr.bf16.mxu1 %v5200_v52 }
 0xccb   : > { %9042 = vmatmul.mubr.msk.bf16.vlgmr.msra.gmra.mxu1 %vm4854_vm0, %v4852_v43  ;;  %9048 = vmatmul.mubr.msk.bf16.vlgmr.msra.gmra.mxu0 %vm4854_vm0, %v4852_v43 }
 0xccc   : > { %9058 = vmatpush3.bf16.msra.mxu0 %v5256_v51  ;;  %9053 = vmatprep.mubr.msk.bf16.mxu1 %vm4854_vm0, %v4851_v42 }
 0xccd   : > { %9059 = vmatprep.mubr.msk.bf16.mxu0 %vm4854_vm0, %v4851_v42  ;;  %9063 = vmatprep.subr.bf16.mxu0 %v11674_v28 }
 0xcce   : > { %9052 = vmatpush3.bf16.msra.mxu1 %v5200_v52 }
 0xcd3   : > { %9054 = vmatmul.mubr.msk.bf16.vlgmr.msra.gmra.mxu1 %vm4854_vm0, %v4852_v43  ;;  %9060 = vmatmul.mubr.msk.bf16.vlgmr.msra.gmra.mxu0 %vm4854_vm0, %v4852_v43 }
 0xcd4   : > { %9064 = vmatpush3.bf16.msra.mxu0 %v11674_v28  ;;  %9065 = vmatprep.mubr.msk.bf16.mxu0 %vm3906_vm2, %v9788_v40 }
 0xcd5   : > { %9069 = vmatprep.subr.bf16.mxu0 %v10943_v54  ;;  %5365 = vmatprep.mubr.bf16.mxu1 %v9792_v49 }
 0xcdb   : > { %9066 = vmatmul.mubr.msk.bf16.vlgmr.msra.gmra.mxu0 %vm3906_vm2, %v9789_v48 }
 0xcdc   : > { %9071 = vmatprep.mubr.msk.bf16.mxu0 %vm10944_vm3, %v10943_v54  ;;  %9070 = vmatpush3.bf16.msra.mxu0 %v9793_v10 }
 0xcdd   : > { %9075 = vmatprep.subr.bf16.mxu0 %v10943_v54 }
 0xd7b   : > { %v11760_v53 = vpop.f32.mrf.mxu1  ;;  %v9025_v55 = vpop.f32.mrf.mxu0 }
 0xd7d   : > { %v11762_v28 = vpop.f32.mrf.mxu1  ;;  %v11764_v56 = vpop.f32.mrf.mxu0 }
 0xd7f   : > { %v11766_v57 = vpop.f32.mrf.mxu1  ;;  %v9026_v58 = vpop.f32.mrf.mxu0 }
 0xd80   : > { %v4972_v52 = vpack.c.bf16 %v9026_v58, %v9025_v55  ;;  %v9790_v58 = vld [vmem:[#allocation32] ss:$8 sps:$4 sm:$0xff]  }
 0xd81   : > { %v11768_v59 = vpop.f32.mrf.mxu1  ;;  %v4959_v60 = vpop.f32.mrf.mxu0 }
 0xd82   : > { %v4971_v49 = vpack.c.bf16 %v4959_v60, %v11764_v56  ;;  %v4915_v55 = vpack.c.bf16 %v11768_v59, %v11762_v28  ;;  %v9794_v56 = vld [vmem:[#allocation35 + $0x18] sm:$0xff]   ;;  %v5389_v60 = vpop.permute.xlu1 %5388 }
 0xd83   : > { %v9031_v62 = vpop.f32.mrf.mxu1  ;;  %v9037_v63 = vpop.f32.mrf.mxu0 }
 0xd85   : > { %v5012_v0 = vpop.f32.mrf.mxu1  ;;  %v5068_v5 = vpop.f32.mrf.mxu0 }
 0xd87   : > { %v9032_v6 = vpop.f32.mrf.mxu1  ;;  %v9038_v7 = vpop.f32.mrf.mxu0 }
 0xd88   : > { %v5084_v29 = vpack.c.bf16 %v9038_v7, %v9037_v63  ;;  %v5028_v44 = vpack.c.bf16 %v9032_v6, %v9031_v62  ;;  %v5394_v7 = vpop.permute.xlu0 %5393 }
 0xd89   : > { %v5015_v8 = vpop.f32.mrf.mxu1  ;;  %v5071_v11 = vpop.f32.mrf.mxu0 }
 0xd8a   : > { %v5083_v35 = vpack.c.bf16 %v5071_v11, %v5068_v5  ;;  %v5027_v50 = vpack.c.bf16 %v5015_v8, %v5012_v0  ;;  %v4916_v5 = vpack.c.bf16 %v11766_v57, %v11760_v53 }
 0xd8b   : > { %v9043_v12 = vpop.f32.mrf.mxu1  ;;  %v9049_v13 = vpop.f32.mrf.mxu0 }
 0xd8d   : > { %v5124_v14 = vpop.f32.mrf.mxu1  ;;  %v5180_v4 = vpop.f32.mrf.mxu0 }
 0xd8f   : > { %v9044_v15 = vpop.f32.mrf.mxu1  ;;  %v9050_v16 = vpop.f32.mrf.mxu0 }
 0xd90   : > { %v5196_v51 = vpack.c.bf16 %v9050_v16, %v9049_v13  ;;  %v5140_v10 = vpack.c.bf16 %v9044_v15, %v9043_v12  ;;  %v9795_v13 = vld [vmem:[#allocation35 + $0x8] sm:$0xff]   ;;  %v9797_v15 = vld [vmem:[#allocation35 + $0x10] sm:$0xff]   ;;  %v9798_v16 = vld [vmem:[#allocation35 + $0x38] sm:$0xff]  }
 0xd91   : > { %v5127_v17 = vpop.f32.mrf.mxu1  ;;  %v5183_v19 = vpop.f32.mrf.mxu0 }
 0xd92   : > { %v5195_v40 = vpack.c.bf16 %v5183_v19, %v5180_v4  ;;  %v5139_v6 = vpack.c.bf16 %v5127_v17, %v5124_v14  ;;  %v9796_v14 = vld [vmem:[#allocation35 + $0x28] sm:$0xff]   ;;  %v9799_v17 = vld [vmem:[#allocation35 + $0x20] sm:$0xff]   ;;  %v9800_v19 = vld [vmem:[#allocation35 + $0x30] sm:$0xff]  }
 0xd93   : > { %v9055_v20 = vpop.f32.mrf.mxu1  ;;  %v9061_v21 = vpop.f32.mrf.mxu0 }
 0xd95   : > { %v5292_v22 = vpop.f32.mrf.mxu0  ;;  %v5236_v23 = vpop.f32.mrf.mxu1 }
 0xd97   : > { %v9062_v26 = vpop.f32.mrf.mxu0  ;;  %v9056_v32 = vpop.f32.mrf.mxu1 }
 0xd98   : > { %v5308_v27 = vpack.c.bf16 %v9062_v26, %v9061_v21  ;;  %v5252_v38 = vpack.c.bf16 %v9056_v32, %v9055_v20  ;;  %v9801_v20 = vld [vmem:[#allocation44] sm:$0xff]   ;;  %v5316_v26 = vpop.permute.xlu1 %5315 }
 0xd99   : > { %v5295_v30 = vpop.f32.mrf.mxu0  ;;  %v5239_v41 = vpop.f32.mrf.mxu1 }
 0xd9a   : > { %v5307_v9 = vpack.c.bf16 %v5295_v30, %v5292_v22  ;;  %8701 = vmatprep.subr.bf16.mxu1 %v5308_v27  ;;  %v5251_v45 = vpack.c.bf16 %v5239_v41, %v5236_v23 }
 0xd9b   : > { %8702 = vmatpush3.bf16.msra.mxu1 %v5084_v29  ;;  %v9067_v33 = vpop.f32.mrf.mxu0 }
 0xd9c   : > { %v5465_v34 = vadd.f32 %v9067_v33, %v5399_v31  ;;  %8703 = vmatprep.subr.bf16.mxu1 %v5307_v9  ;;  %v5321_v9 = vpop.permute.xlu0 %5320 }
 0xd9d   : > { %v5456_v36 = vpop.f32.mrf.mxu0 }
 0xd9e   : > { %v8257_v39 = vmul.f32 -1.442695, %v5465_v34  ;;  %v5457_v8 = vadd.f32 %v5456_v36, %v5389_v60 }
 0xd9f   : > { %8704 = vmatpush3.bf16.msra.mxu1 %v5083_v35  ;;  %v9068_v42 = vpop.f32.mrf.mxu0 }
 0xda0   : > { %9972 = vpow2.f32 %v8257_v39  ;;  %v5468_v43 = vadd.f32 %v9068_v42, %v5404_v37  ;;  %8705 = vmatprep.subr.bf16.mxu1 %v5252_v38 }
 0xda1   : > { %v5459_v53 = vpop.f32.mrf.mxu0 }
 0xda2   : > { %v8258_v47 = vmul.f32 -1.442695, %v5468_v43  ;;  %v5460_v11 = vadd.f32 %v5459_v53, %v5394_v7 }
 0xda3   : > { %8706 = vmatpush3.bf16.msra.mxu1 %v5028_v44 }
 0xda4   : > { %9974 = vpow2.f32 %v8258_v47  ;;  %8707 = vmatprep.subr.bf16.mxu1 %v5251_v45  ;;  %v9802_v45 = vld [vmem:[#allocation44 + $0x8] sm:$0xff]  }
 0xda7   : > { %8708 = vmatpush3.bf16.msra.mxu1 %v5027_v50 }
 0xda8   : > { %8709 = vmatprep.subr.bf16.mxu1 %v5196_v51 }
 0xdab   : > { %8710 = vmatpush3.bf16.msra.mxu1 %v4972_v52 }
 0xdac   : > { %8711 = vmatprep.subr.bf16.mxu1 %v5195_v40 }
 0xdad   : > { %v9973_v48 = vpop.eup %9972 }
 0xdae   : > { %v5477_v63 = vadd.f32 1.0, %v9973_v48 }
 0xdaf   : > { %8712 = vmatpush3.bf16.msra.mxu1 %v4971_v49 }
 0xdb0   : > { %8713 = vmatprep.subr.bf16.mxu1 %v5140_v10  ;;  %9976 = vrcp.f32 %v5477_v63 }
 0xdb1   : > { %v9975_v62 = vpop.eup %9974 }
 0xdb2   : > { %v5478_v0 = vadd.f32 1.0, %v9975_v62 }
 0xdb3   : > { %8714 = vmatpush3.bf16.msra.mxu1 %v4916_v5 }
 0xdb4   : > { %9978 = vrcp.f32 %v5478_v0  ;;  %8715 = vmatprep.subr.bf16.mxu1 %v5139_v6 }
 0xdb7   : > { %8716 = vmatpush3.bf16.msra.mxu1 %v4915_v55 }
 0xdb8   : > { %9087 = vmatprep.subr.bf16.mxu1 %v10943_v54 }
 0xdba   : > { %5366 = vmatmul.mubr.bf16.vlgmr.msra.gmra.mxu1 %v9790_v58 }
 0xdbb   : > { %9088 = vmatpush3.bf16.msra.mxu1 %v9794_v56  ;;  %9089 = vmatprep.mubr.msk.bf16.mxu1 %vm10944_vm3, %v10943_v54 }
 0xdbc   : > { %9099 = vmatprep.subr.bf16.mxu1 %v10943_v54 }
 0xdbd   : > { %v9977_v57 = vpop.eup %9976 }
 0xdbe   : > { %v5483_v28 = vmul.f32 %v9977_v57, %v5457_v8 }
 0xdc1   : > { %v9979_v12 = vpop.eup %9978 }
 0xdc2   : > { %v5484_v59 = vmul.f32 %v9979_v12, %v5460_v11 }
 0xdc4   : > { %v5485_v4 = vpack.c.bf16 %v5484_v59, %v5483_v28 }
 0xdc6   : > { %9072 = vmatmul.mubr.msk.bf16.vlgmr.msra.gmra.mxu0 %vm3906_vm2, %v5485_v4  ;;  %9090 = vmatmul.mubr.msk.bf16.vlgmr.msra.gmra.mxu1 %vm3906_vm2, %v5485_v4 }
 0xdc7   : > { %9076 = vmatpush3.bf16.msra.mxu0 %v9795_v13  ;;  %9100 = vmatpush3.bf16.msra.mxu1 %v9796_v14 }
 0xdc8   : > { %9077 = vmatprep.mubr.msk.bf16.mxu0 %vm10944_vm3, %v10943_v54  ;;  %9101 = vmatprep.mubr.msk.bf16.mxu1 %vm10944_vm3, %v10943_v54 }
 0xdc9   : > { %9081 = vmatprep.subr.bf16.mxu0 %v10943_v54  ;;  %9111 = vmatprep.subr.bf16.mxu1 %v10943_v54 }
 0xdce   : > { %9078 = vmatmul.mubr.msk.bf16.vlgmr.msra.gmra.mxu0 %vm3906_vm2, %v5485_v4  ;;  %9102 = vmatmul.mubr.msk.bf16.vlgmr.msra.gmra.mxu1 %vm3906_vm2, %v5485_v4 }
 0xdcf   : > { %9082 = vmatpush3.bf16.msra.mxu0 %v9797_v15  ;;  %9112 = vmatpush3.bf16.msra.mxu1 %v9798_v16 }
 0xdd0   : > { %9083 = vmatprep.mubr.msk.bf16.mxu0 %vm10944_vm3, %v10943_v54  ;;  %9113 = vmatprep.mubr.msk.bf16.mxu1 %vm10944_vm3, %v10943_v54 }
 0xdd1   : > { %9093 = vmatprep.subr.bf16.mxu0 %v10943_v54 }
 0xdd6   : > { %9084 = vmatmul.mubr.msk.bf16.vlgmr.msra.gmra.mxu0 %vm3906_vm2, %v5485_v4  ;;  %9114 = vmatmul.mubr.msk.bf16.vlgmr.msra.gmra.mxu1 %vm3906_vm2, %v5485_v4 }
 0xdd7   : > { %9094 = vmatpush3.bf16.msra.mxu0 %v9799_v17  ;;  %9095 = vmatprep.mubr.msk.bf16.mxu0 %vm10944_vm3, %v10943_v54 }
 0xdd8   : > { %9105 = vmatprep.subr.bf16.mxu0 %v10943_v54  ;;  %9139 = vmatprep.mubr.msk.bf16.mxu1 %vm3906_vm2, %v9801_v20  ;;  %v5896_v20 = vld [vmem:[#allocation39] sm:$0xf] }
 0xdde   : > { %9096 = vmatmul.mubr.msk.bf16.vlgmr.msra.gmra.mxu0 %vm3906_vm2, %v5485_v4 }
 0xddf   : > { %9106 = vmatpush3.bf16.msra.mxu0 %v9800_v19  ;;  %9107 = vmatprep.mubr.msk.bf16.mxu0 %vm10944_vm3, %v10943_v54 }
 0xde0   : > { %9117 = vmatprep.subr.bf16.mxu0 %v10943_v54 }
 0xde6   : > { %9108 = vmatmul.mubr.msk.bf16.vlgmr.msra.gmra.mxu0 %vm3906_vm2, %v5485_v4 }
 0xde7   : > { %9133 = vmatprep.mubr.msk.bf16.mxu0 %vm10944_vm3, %v10943_v54 }
 0xe7a   : > { %v8717_v21 = vpop.f32.mrf.mxu1 }
 0xe7c   : > { %v8718_v22 = vpop.f32.mrf.mxu1 }
 0xe7d   : > { %v8719_v23 = vadd.f32 %v8718_v22, %v8717_v21  ;;  %v9803_v21 = vld [vmem:[#allocation42] sm:$0xff]   ;;  %v9804_v22 = vld [vmem:[#allocation42 + $0x18] sm:$0xff]  }
 0xe7e   : > { %v8720_v27 = vpop.f32.mrf.mxu1 }
 0xe7f   : > { %v5368_v29 = vadd.f32 %v8719_v23, %v5316_v26  ;;  %v5968_v23 = vpop.permute.xlu1 %5967 }
 0xe80   : > { %v8721_v30 = vpop.f32.mrf.mxu1 }
 0xe81   : > { %v8722_v31 = vadd.f32 %v8721_v30, %v8720_v27  ;;  %v5374_v32 = vmax.f32 %v5368_v29, 0.0 }
 0xe83   : > { %v5371_v33 = vadd.f32 %v8722_v31, %v5321_v9  ;;  %v5944_v37 = vadd.f32 %v5374_v32, %v11668_v24  ;;  %v5973_v31 = vpop.permute.xlu0 %5972 }
 0xe85   : > { %v5375_v34 = vmax.f32 %v5371_v33, 0.0 }
 0xe86   : > { %v11807_v35 = vpop.f32.mrf.mxu0  ;;  %v5684_v36 = vpop.f32.mrf.mxu1 }
 0xe87   : > { %v5945_v38 = vadd.f32 %v5375_v34, %v11670_v25 }
 0xe88   : > { %v9073_v39 = vpop.f32.mrf.mxu0  ;;  %v9091_v41 = vpop.f32.mrf.mxu1 }
 0xe89   : > { %v5950_v42 = vpack.c.bf16 %v5945_v38, %v5944_v37  ;;  %v5958_v41 = vpop.permute.xlu1 %5957 }
 0xe8a   : > { %v5534_v43 = vpop.f32.mrf.mxu0  ;;  %v5687_v44 = vpop.f32.mrf.mxu1 }
 0xe8b   : > { %9137 = vmatprep.subr.bf16.mxu1 %v5950_v42  ;;  %v5691_v15 = vpack.c.bf16 %v5687_v44, %v5684_v36  ;;  %v5538_v19 = vpack.c.bf16 %v5534_v43, %v11807_v35 }
 0xe8c   : > { %v9074_v47 = vpop.f32.mrf.mxu0  ;;  %v9092_v50 = vpop.f32.mrf.mxu1  ;;  %9138 = vmatpush3.bf16.msra.mxu1 %v5950_v42 }
 0xe8d   : > { %9143 = vmatprep.subr.bf16.mxu1 %v10943_v54  ;;  %v5963_v42 = vpop.permute.xlu0 %5962 }
 0xe8e   : > { %v5582_v51 = vpop.f32.mrf.mxu0  ;;  %v5786_v52 = vpop.f32.mrf.mxu1 }
 0xe8f   : > { %9140 = vmatmul.mubr.msk.bf16.vlgmr.msra.gmra.mxu1 %vm3906_vm2, %v9802_v45 }
 0xe90   : > { %v9079_v40 = vpop.f32.mrf.mxu0  ;;  %v9103_v24 = vpop.f32.mrf.mxu1  ;;  %9145 = vmatprep.mubr.msk.bf16.mxu1 %vm10944_vm3, %v10943_v54  ;;  %9144 = vmatpush3.bf16.msra.mxu1 %v9803_v21 }
 0xe91   : > { %9149 = vmatprep.subr.bf16.mxu1 %v10943_v54  ;;  %v9807_v24 = vld [vmem:[#allocation42 + $0x10] sm:$0xff]  }
 0xe92   : > { %v5585_v25 = vpop.f32.mrf.mxu0  ;;  %v5789_v48 = vpop.f32.mrf.mxu1 }
 0xe93   : > { %v5793_v14 = vpack.c.bf16 %v5789_v48, %v5786_v52  ;;  %v5589_v17 = vpack.c.bf16 %v5585_v25, %v5582_v51  ;;  %v9805_v51 = vld [vmem:[#allocation42 + $0x8] sm:$0xff]   ;;  %v9808_v25 = vld [vmem:[#allocation42 + $0x38] sm:$0xff]   ;;  %v9809_v48 = vld [vmem:[#allocation42 + $0x20] sm:$0xff]  }
 0xe94   : > { %v9080_v49 = vpop.f32.mrf.mxu0  ;;  %v9104_v10 = vpop.f32.mrf.mxu1  ;;  %v9806_v52 = vld [vmem:[#allocation42 + $0x28] sm:$0xff]  }
 0xe96   : > { %v5633_v63 = vpop.f32.mrf.mxu0  ;;  %v5888_v62 = vpop.f32.mrf.mxu1 }
 0xe98   : > { %v9085_v5 = vpop.f32.mrf.mxu0  ;;  %v9115_v6 = vpop.f32.mrf.mxu1 }
 0xe99   : > { %v9810_v5 = vld [vmem:[#allocation42 + $0x30] sm:$0xff]  }
 0xe9a   : > { %v5636_v0 = vpop.f32.mrf.mxu0  ;;  %v5891_v55 = vpop.f32.mrf.mxu1 }
 0xe9b   : > { %v5895_v58 = vpack.c.bf16 %v5891_v55, %v5888_v62  ;;  %v5640_v16 = vpack.c.bf16 %v5636_v0, %v5633_v63 }
 0xe9c   : > { %v9086_v56 = vpop.f32.mrf.mxu0  ;;  %v9116_v53 = vpop.f32.mrf.mxu1 }
 0xe9d   : > { %9118 = vmatpush3.bf16.msra.mxu0 %v5895_v58 }
 0xe9e   : > { %v5735_v57 = vpop.f32.mrf.mxu0  ;;  %9119 = vmatprep.subr.bf16.mxu0 %v10943_v54 }
 0xea0   : > { %v9097_v60 = vpop.f32.mrf.mxu0 }
 0xea2   : > { %v5738_v7 = vpop.f32.mrf.mxu0 }
 0xea3   : > { %v5742_v4 = vpack.c.bf16 %v5738_v7, %v5735_v57 }
 0xea4   : > { %v9098_v8 = vpop.f32.mrf.mxu0 }
 0xea6   : > { %v5837_v11 = vpop.f32.mrf.mxu0 }
 0xea8   : > { %v9109_v12 = vpop.f32.mrf.mxu0 }
 0xeaa   : > { %v5840_v28 = vpop.f32.mrf.mxu0 }
 0xeab   : > { %v5844_v59 = vpack.c.bf16 %v5840_v28, %v5837_v11 }
 0xeac   : > { %v9110_v13 = vpop.f32.mrf.mxu0 }
 0xead   : > { %9120 = vmatpush3.bf16.msra.mxu0 %v5844_v59 }
 0xeae   : > { %9121 = vmatprep.subr.bf16.mxu0 %v10943_v54 }
 0xeb1   : > { %9122 = vmatpush3.bf16.msra.mxu0 %v5793_v14 }
 0xeb2   : > { %9123 = vmatprep.subr.bf16.mxu0 %v10943_v54 }
 0xeb5   : > { %9124 = vmatpush3.bf16.msra.mxu0 %v5742_v4 }
 0xeb6   : > { %9125 = vmatprep.subr.bf16.mxu0 %v10943_v54 }
 0xeb9   : > { %9126 = vmatpush3.bf16.msra.mxu0 %v5691_v15 }
 0xeba   : > { %9127 = vmatprep.subr.bf16.mxu0 %v10943_v54 }
 0xebd   : > { %9128 = vmatpush3.bf16.msra.mxu0 %v5640_v16 }
 0xebe   : > { %9129 = vmatprep.subr.bf16.mxu0 %v10943_v54 }
 0xec1   : > { %9130 = vmatpush3.bf16.msra.mxu0 %v5589_v17 }
 0xec2   : > { %9131 = vmatprep.subr.bf16.mxu0 %v10943_v54 }
 0xec5   : > { %9132 = vmatpush3.bf16.msra.mxu0 %v5538_v19 }
 0xec6   : > { %9161 = vmatprep.subr.bf16.mxu0 %v10943_v54 }
 0xec8   : > { %9134 = vmatmul.mubr.bf16.vlgmr.msra.gmra.mxu0 %v5896_v20 }
 0xec9   : > { %9163 = vmatprep.mubr.msk.bf16.mxu0 %vm10944_vm3, %v10943_v54  ;;  %9162 = vmatpush3.bf16.msra.mxu0 %v9804_v22 }
 0xeca   : > { %9173 = vmatprep.subr.bf16.mxu0 %v10943_v54 }
 0xf4f   : > { %v9141_v26 = vpop.f32.mrf.mxu1 }
 0xf50   : > { %v6034_v27 = vadd.f32 %v9141_v26, %v5968_v23 }
 0xf51   : > { %v6025_v29 = vpop.f32.mrf.mxu1 }
 0xf52   : > { %v8279_v30 = vmul.f32 -1.442695, %v6034_v27  ;;  %v6026_v43 = vadd.f32 %v6025_v29, %v5958_v41 }
 0xf53   : > { %v9142_v9 = vpop.f32.mrf.mxu1 }
 0xf54   : > { %9980 = vpow2.f32 %v8279_v30  ;;  %v6037_v32 = vadd.f32 %v9142_v9, %v5973_v31 }
 0xf55   : > { %v6028_v38 = vpop.f32.mrf.mxu1 }
 0xf56   : > { %v8280_v33 = vmul.f32 -1.442695, %v6037_v32  ;;  %v6029_v44 = vadd.f32 %v6028_v38, %v5963_v42  ;;  %v6465_v42 = vld [vmem:[%s12068_s26] sm:$0xf] }
 0xf58   : > { %9982 = vpow2.f32 %v8280_v33 }
 0xf61   : > { %v9981_v34 = vpop.eup %9980 }
 0xf62   : > { %v6046_v35 = vadd.f32 1.0, %v9981_v34 }
 0xf64   : > { %9984 = vrcp.f32 %v6046_v35 }
 0xf65   : > { %v9983_v36 = vpop.eup %9982 }
 0xf66   : > { %v6047_v37 = vadd.f32 1.0, %v9983_v36 }
 0xf68   : > { %9986 = vrcp.f32 %v6047_v37 }
 0xf71   : > { %v9985_v39 = vpop.eup %9984 }
 0xf72   : > { %v6052_v47 = vmul.f32 %v9985_v39, %v6026_v43  ;;  %v5901_v43 = vpop.permute.xlu1 %5900 }
 0xf75   : > { %v9987_v45 = vpop.eup %9986 }
 0xf76   : > { %v6053_v50 = vmul.f32 %v9987_v45, %v6029_v44 }
 0xf78   : > { %v6054_v40 = vpack.c.bf16 %v6053_v50, %v6052_v47  ;;  %v6470_v47 = vpop.permute.xlu0 %6469 }
 0xf7a   : > { %9146 = vmatmul.mubr.msk.bf16.vlgmr.msra.gmra.mxu1 %vm3906_vm2, %v6054_v40  ;;  %9164 = vmatmul.mubr.msk.bf16.vlgmr.msra.gmra.mxu0 %vm3906_vm2, %v6054_v40 }
 0xf7b   : > { %9150 = vmatpush3.bf16.msra.mxu1 %v9805_v51  ;;  %9174 = vmatpush3.bf16.msra.mxu0 %v9806_v52 }
 0xf7c   : > { %9151 = vmatprep.mubr.msk.bf16.mxu1 %vm10944_vm3, %v10943_v54  ;;  %9175 = vmatprep.mubr.msk.bf16.mxu0 %vm10944_vm3, %v10943_v54 }
 0xf7d   : > { %9155 = vmatprep.subr.bf16.mxu1 %v10943_v54  ;;  %9185 = vmatprep.subr.bf16.mxu0 %v10943_v54 }
 0xf82   : > { %9152 = vmatmul.mubr.msk.bf16.vlgmr.msra.gmra.mxu1 %vm3906_vm2, %v6054_v40  ;;  %9176 = vmatmul.mubr.msk.bf16.vlgmr.msra.gmra.mxu0 %vm3906_vm2, %v6054_v40 }
 0xf83   : > { %9156 = vmatpush3.bf16.msra.mxu1 %v9807_v24  ;;  %9186 = vmatpush3.bf16.msra.mxu0 %v9808_v25 }
 0xf84   : > { %9157 = vmatprep.mubr.msk.bf16.mxu1 %vm10944_vm3, %v10943_v54  ;;  %9187 = vmatprep.mubr.msk.bf16.mxu0 %vm10944_vm3, %v10943_v54 }
 0xf85   : > { %9167 = vmatprep.subr.bf16.mxu1 %v10943_v54  ;;  %9211 = vmatprep.subr.bf16.mxu0 %v10943_v54 }
 0xf88   : > { %v11844_v49 = vpop.f32.mrf.mxu0 }
 0xf89   : > { %v5938_v44 = vadd.f32 %v11844_v49, %v5901_v43  ;;  %v6599_v49 = vld [vmem:[#allocation47 + $0x60] sm:$0x33] }
 0xf8a   : > { %9158 = vmatmul.mubr.msk.bf16.vlgmr.msra.gmra.mxu1 %vm3906_vm2, %v6054_v40  ;;  %9188 = vmatmul.mubr.msk.bf16.vlgmr.msra.gmra.mxu0 %vm3906_vm2, %v6054_v40  ;;  %v9135_v10 = vpop.f32.mrf.mxu0 }
 0xf8b   : > { %9168 = vmatpush3.bf16.msra.mxu1 %v9809_v48  ;;  %9169 = vmatprep.mubr.msk.bf16.mxu1 %vm10944_vm3, %v10943_v54  ;;  %v5943_v45 = vmax.f32 %v5938_v44, 0.0 }
 0xf8c   : > { %9179 = vmatprep.subr.bf16.mxu1 %v10943_v54  ;;  %v5940_v63 = vpop.f32.mrf.mxu0  ;;  %9213 = vmatprep.mubr.msk.bf16.mxu0 %vm10944_vm3, %v10943_v54 }
 0xf8e   : > { %v9136_v62 = vpop.f32.mrf.mxu0 }
 0xf8f   : > { %v9811_v62 = vld [vmem:[%s12069_s7] sm:$0xff]  }
 0xf92   : > { %9170 = vmatmul.mubr.msk.bf16.vlgmr.msra.gmra.mxu1 %vm3906_vm2, %v6054_v40 }
 0xf93   : > { %9180 = vmatpush3.bf16.msra.mxu1 %v9810_v5  ;;  %9181 = vmatprep.mubr.msk.bf16.mxu1 %vm10944_vm3, %v10943_v54  ;;  %v6706_v5 = vld [vmem:[#allocation47 + $0xcc] sm:$0x33] }
 0xf94   : > { %9191 = vmatprep.subr.bf16.mxu1 %v10943_v54 }
 0xf9a   : > { %9182 = vmatmul.mubr.msk.bf16.vlgmr.msra.gmra.mxu1 %vm3906_vm2, %v6054_v40  ;;  %v6514_v40 = vadd.f32 %v5943_v45, %v11579_v18  ;;  %v9846_v45 = vld [vmem:[#allocation47 + $0x124] ss:$12 sps:$4 sm:$0xff]  }
 0xf9b   : > { %9207 = vmatprep.mubr.msk.bf16.mxu1 %vm10944_vm3, %v10943_v54  ;;  %vm7550_vm3 = vcmp.lt.s32.totalorder %v1511_v1, 256 }
0x103a   : > { %v6100_v6 = vpop.f32.mrf.mxu1  ;;  %v6253_v0 = vpop.f32.mrf.mxu0 }
0x103c   : > { %v9147_v55 = vpop.f32.mrf.mxu1  ;;  %v9165_v58 = vpop.f32.mrf.mxu0 }
0x103d   : > { %v8308_v55 = vcombine.low %v6599_v49, %v6599_v49  ;;  %v8320_v58 = vcombine.low %v6706_v5, %v6706_v5 }
0x103e   : > { %v6103_v56 = vpop.f32.mrf.mxu1  ;;  %v6256_v53 = vpop.f32.mrf.mxu0 }
0x103f   : > { %v6260_v37 = vpack.c.bf16 %v6256_v53, %v6253_v0  ;;  %v6107_v41 = vpack.c.bf16 %v6103_v56, %v6100_v6  ;;  %v8309_v6 = vcombine.high %v6599_v49, %v6599_v49  ;;  %v8321_v0 = vcombine.high %v6706_v5, %v6706_v5  ;;  %v9818_v53 = vld [vmem:[#allocation47 + $0x4c] ss:$12 sps:$4 sm:$0xff]   ;;  %v9867_v49 = vld [vmem:[#allocation47 + $0x148] ss:$12 sps:$4 sm:$0xff]  }
0x1040   : > { %v9148_v57 = vpop.f32.mrf.mxu1  ;;  %v9166_v60 = vpop.f32.mrf.mxu0  ;;  %v6649_v18 = vsel %vm3165_vm14, %v8308_v55, 0  ;;  %v6753_v56 = vsel %vm3165_vm14, %v8320_v58, 0  ;;  %v7018_v5 = vld [vmem:[#allocation47 + $0x210] sm:$0x33] }
0x1041   : > { %v9821_v57 = vld [vmem:[#allocation47 + $0xb8] ss:$12 sps:$4 sm:$0xff]   ;;  %v9816_v60 = vld [vmem:[#allocation47 + $0x48] ss:$12 sps:$4 sm:$0xff]   ;;  %v8357_v58 = vcombine.high %v7018_v5, %v7018_v5 }
0x1042   : > { %v6151_v7 = vpop.f32.mrf.mxu1  ;;  %v6355_v8 = vpop.f32.mrf.mxu0  ;;  %v9865_v55 = vld [vmem:[#allocation47 + $0x144] ss:$12 sps:$4 sm:$0xff]  }
0x1044   : > { %v9153_v11 = vpop.f32.mrf.mxu1  ;;  %v9177_v12 = vpop.f32.mrf.mxu0 }
0x1045   : > { %v9827_v11 = vld [vmem:[#allocation47 + $0xa0] ss:$12 sps:$4 sm:$0xff]   ;;  %v9822_v12 = vld [vmem:[#allocation47 + $0x30] ss:$12 sps:$4 sm:$0xff]  }
0x1046   : > { %v6154_v28 = vpop.f32.mrf.mxu1  ;;  %v6358_v59 = vpop.f32.mrf.mxu0 }
0x1047   : > { %v6362_v35 = vpack.c.bf16 %v6358_v59, %v6355_v8  ;;  %v6158_v39 = vpack.c.bf16 %v6154_v28, %v6151_v7  ;;  %v9819_v7 = vld [vmem:[#allocation47 + $0xb4] ss:$12 sps:$4 sm:$0xff]   ;;  %v9825_v28 = vld [vmem:[#allocation47 + $0x9c] ss:$12 sps:$4 sm:$0xff]  }
0x1048   : > { %v9154_v13 = vpop.f32.mrf.mxu1  ;;  %v9178_v14 = vpop.f32.mrf.mxu0  ;;  %v9824_v8 = vld [vmem:[#allocation47 + $0x34] ss:$12 sps:$4 sm:$0xff]   ;;  %v9830_v59 = vld [vmem:[#allocation47 + $0x1c] ss:$12 sps:$4 sm:$0xff]  }
0x1049   : > { %v9833_v13 = vld [vmem:[#allocation47 + $0x88] ss:$12 sps:$4 sm:$0xff]   ;;  %v9828_v14 = vld [vmem:[#allocation47 + $0x18] ss:$12 sps:$4 sm:$0xff]  }
0x104a   : > { %v6202_v4 = vpop.f32.mrf.mxu1  ;;  %v6457_v15 = vpop.f32.mrf.mxu0 }
0x104c   : > { %v9159_v16 = vpop.f32.mrf.mxu1  ;;  %v9189_v17 = vpop.f32.mrf.mxu0 }
0x104d   : > { %v9839_v16 = vld [vmem:[#allocation47 + $0x70] ss:$12 sps:$4 sm:$0xff]   ;;  %v9834_v17 = vld [vmem:[#allocation47] ss:$12 sps:$4 sm:$0xff]  }
0x104e   : > { %v6205_v19 = vpop.f32.mrf.mxu1  ;;  %v6460_v20 = vpop.f32.mrf.mxu0 }
0x104f   : > { %v6464_v21 = vpack.c.bf16 %v6460_v20, %v6457_v15  ;;  %v6209_v38 = vpack.c.bf16 %v6205_v19, %v6202_v4  ;;  %v9831_v4 = vld [vmem:[#allocation47 + $0x84] ss:$12 sps:$4 sm:$0xff]   ;;  %v9837_v19 = vld [vmem:[#allocation47 + $0x6c] ss:$12 sps:$4 sm:$0xff]  }
0x1050   : > { %v9160_v22 = vpop.f32.mrf.mxu1  ;;  %v9190_v23 = vpop.f32.mrf.mxu0  ;;  %v9836_v15 = vld [vmem:[#allocation47 + $0x4] ss:$12 sps:$4 sm:$0xff]   ;;  %v6810_v20 = vld [vmem:[#allocation47 + $0x138] sm:$0x33] }
0x1051   : > { %9192 = vmatpush3.bf16.msra.mxu1 %v6464_v21  ;;  %v6914_v21 = vld [vmem:[#allocation47 + $0x1a4] sm:$0x33]  ;;  %v8333_v22 = vcombine.high %v6810_v20, %v6810_v20 }
0x1052   : > { %v6304_v26 = vpop.f32.mrf.mxu1  ;;  %9193 = vmatprep.subr.bf16.mxu1 %v10943_v54  ;;  %v8345_v23 = vcombine.high %v6914_v21, %v6914_v21 }
0x1054   : > { %v9171_v27 = vpop.f32.mrf.mxu1 }
0x1056   : > { %v6307_v29 = vpop.f32.mrf.mxu1 }
0x1057   : > { %v6311_v36 = vpack.c.bf16 %v6307_v29, %v6304_v26  ;;  %v6529_v29 = vpop.permute.xlu1 %6528 }
0x1058   : > { %v9172_v30 = vpop.f32.mrf.mxu1 }
0x105a   : > { %v6406_v31 = vpop.f32.mrf.mxu1 }
0x105c   : > { %v9183_v9 = vpop.f32.mrf.mxu1 }
0x105e   : > { %v6409_v32 = vpop.f32.mrf.mxu1 }
0x105f   : > { %v6413_v33 = vpack.c.bf16 %v6409_v32, %v6406_v31 }
0x1060   : > { %v9184_v34 = vpop.f32.mrf.mxu1 }
0x1061   : > { %9194 = vmatpush3.bf16.msra.mxu1 %v6413_v33 }
0x1062   : > { %9195 = vmatprep.subr.bf16.mxu1 %v10943_v54 }
0x1065   : > { %9196 = vmatpush3.bf16.msra.mxu1 %v6362_v35  ;;  %v6524_v35 = vpop.permute.xlu0 %6523 }
0x1066   : > { %9197 = vmatprep.subr.bf16.mxu1 %v10943_v54 }
0x1069   : > { %9198 = vmatpush3.bf16.msra.mxu1 %v6311_v36 }
0x106a   : > { %9199 = vmatprep.subr.bf16.mxu1 %v10943_v54 }
0x106d   : > { %9200 = vmatpush3.bf16.msra.mxu1 %v6260_v37  ;;  %v8332_v37 = vcombine.low %v6810_v20, %v6810_v20  ;;  %v9895_v20 = vld [vmem:[#allocation47 + $0x220] ss:$12 sps:$4 sm:$0xff]  }
0x106e   : > { %9201 = vmatprep.subr.bf16.mxu1 %v10943_v54 }
0x106f   : > { %v6857_v43 = vsel %vm3165_vm14, %v8332_v37, 0  ;;  %v9908_v37 = vld [vmem:[#allocation47 + $0x2bc] ss:$12 sps:$4 sm:$0xff]  }
0x1071   : > { %9202 = vmatpush3.bf16.msra.mxu1 %v6209_v38  ;;  %v8344_v38 = vcombine.low %v6914_v21, %v6914_v21  ;;  %v7226_v21 = vld [vmem:[#allocation47 + $0x2e8] sm:$0x33] }
0x1072   : > { %9203 = vmatprep.subr.bf16.mxu1 %v10943_v54 }
0x1073   : > { %v6961_v44 = vsel %vm3165_vm14, %v8344_v38, 0  ;;  %v9911_v38 = vld [vmem:[#allocation47 + $0x328] ss:$12 sps:$4 sm:$0xff]  }
0x1075   : > { %9204 = vmatpush3.bf16.msra.mxu1 %v6158_v39 }
0x1076   : > { %9205 = vmatprep.subr.bf16.mxu1 %v10943_v54 }
0x1079   : > { %9206 = vmatpush3.bf16.msra.mxu1 %v6107_v41 }
0x107a   : > { %8322 = vmatprep.subr.msk.bf16.mxu1 %vm3165_vm14, %v8321_v0  ;;  %v9862_v0 = vld [vmem:[#allocation47 + $0xd8] ss:$12 sps:$4 sm:$0xff]  }
0x107c   : > { %9208 = vmatmul.mubr.bf16.vlgmr.msra.gmra.mxu1 %v6465_v42 }
0x107d   : > { %6790 = vmatprep.mubr.bf16.mxu1 %v10942_v46  ;;  %6765 = vmatpush1.bf16.msra.mxu1 %v6753_v56  ;;  %v8356_v56 = vcombine.low %v7018_v5, %v7018_v5 }
0x107e   : > { %6766 = vmatprep.subr.bf16.mxu1 %v9821_v57 }
0x107f   : > { %v7065_v57 = vsel %vm3165_vm14, %v8356_v56, 0 }
0x1081   : > { %6767 = vmatpush1.bf16.msra.mxu1 %v9819_v7  ;;  %v9874_v7 = vld [vmem:[#allocation47 + $0x1fc] ss:$12 sps:$4 sm:$0xff]  }
0x1082   : > { %6768 = vmatprep.subr.bf16.mxu1 %v9827_v11  ;;  %v9872_v11 = vld [vmem:[#allocation47 + $0x1f8] ss:$12 sps:$4 sm:$0xff]  }
0x1085   : > { %6769 = vmatpush1.bf16.msra.mxu1 %v9825_v28  ;;  %v9880_v28 = vld [vmem:[#allocation47 + $0x1e4] ss:$12 sps:$4 sm:$0xff]  }
0x1086   : > { %6770 = vmatprep.subr.bf16.mxu1 %v9833_v13  ;;  %v9878_v13 = vld [vmem:[#allocation47 + $0x1e0] ss:$12 sps:$4 sm:$0xff]  }
0x1089   : > { %6771 = vmatpush1.bf16.msra.mxu1 %v9831_v4  ;;  %v9886_v4 = vld [vmem:[#allocation47 + $0x1cc] ss:$12 sps:$4 sm:$0xff]  }
0x108a   : > { %6772 = vmatprep.subr.bf16.mxu1 %v9839_v16  ;;  %v9884_v16 = vld [vmem:[#allocation47 + $0x1c8] ss:$12 sps:$4 sm:$0xff]  }
0x108d   : > { %6773 = vmatpush1.bf16.msra.mxu1 %v9837_v19  ;;  %v9892_v19 = vld [vmem:[#allocation47 + $0x1b4] ss:$12 sps:$4 sm:$0xff]  }
0x108e   : > { %8346 = vmatprep.subr.msk.bf16.mxu1 %vm3165_vm14, %v8345_v23  ;;  %v9890_v23 = vld [vmem:[#allocation47 + $0x1b0] ss:$12 sps:$4 sm:$0xff]  }
0x113c   : > { %v6506_v50 = vpop.f32.mrf.mxu1 }
0x113d   : > { %v6507_v51 = vadd.f32 %v6506_v50, %v6470_v47  ;;  %v9849_v47 = vld [vmem:[#allocation47 + $0x190] ss:$12 sps:$4 sm:$0xff]   ;;  %v9844_v50 = vld [vmem:[#allocation47 + $0x120] ss:$12 sps:$4 sm:$0xff]  }
0x113e   : > { %v9209_v52 = vpop.f32.mrf.mxu1 }
0x113f   : > { %v6512_v24 = vmax.f32 %v6507_v51, 0.0  ;;  %v9847_v51 = vld [vmem:[#allocation47 + $0x18c] ss:$12 sps:$4 sm:$0xff]  }
0x1140   : > { %v6509_v25 = vpop.f32.mrf.mxu1  ;;  %v9852_v52 = vld [vmem:[#allocation47 + $0x10c] ss:$12 sps:$4 sm:$0xff]  }
0x1141   : > { %v6515_v54 = vadd.f32 %v6514_v40, %v6512_v24  ;;  %v9855_v40 = vld [vmem:[#allocation47 + $0x178] ss:$12 sps:$4 sm:$0xff]   ;;  %v9850_v24 = vld [vmem:[#allocation47 + $0x108] ss:$12 sps:$4 sm:$0xff]  }
0x1142   : > { %v9210_v48 = vpop.f32.mrf.mxu1  ;;  %v9853_v25 = vld [vmem:[#allocation47 + $0x174] ss:$12 sps:$4 sm:$0xff]  }
0x1143   : > { %v6518_v10 = vpack.c.bf16 %v6515_v54, %v6515_v54  ;;  %v9858_v54 = vld [vmem:[#allocation47 + $0xf4] ss:$12 sps:$4 sm:$0xff]  }
0x1144   : > { %v9861_v48 = vld [vmem:[#allocation47 + $0x160] ss:$12 sps:$4 sm:$0xff]  }
0x1145   : > { %v6540_v63 = vsel %vm3005_vm12, %v6518_v10, 0  ;;  %v9856_v10 = vld [vmem:[#allocation47 + $0xf0] ss:$12 sps:$4 sm:$0xff]  }
0x1146   : > { %9212 = vmatpush3.bf16.msra.mxu0 %v6540_v63  ;;  %v9859_v63 = vld [vmem:[#allocation47 + $0x15c] ss:$12 sps:$4 sm:$0xff]  }
0x1147   : > { %8310 = vmatprep.subr.msk.bf16.mxu0 %vm3165_vm14, %v8309_v6  ;;  %v7122_v6 = vld [vmem:[#allocation47 + $0x27c] sm:$0x33] }
0x1149   : > { %9214 = vmatmul.mubr.msk.bf16.vlgmr.msra.gmra.mxu0 %vm3001_vm13, %v9811_v62  ;;  %v9864_v62 = vld [vmem:[#allocation47 + $0xdc] ss:$12 sps:$4 sm:$0xff]  }
0x114a   : > { %6686 = vmatprep.mubr.bf16.mxu0 %v10942_v46  ;;  %6661 = vmatpush1.bf16.msra.mxu0 %v6649_v18  ;;  %v8369_v18 = vcombine.high %v7122_v6, %v7122_v6 }
0x114b   : > { %6662 = vmatprep.subr.bf16.mxu0 %v9818_v53  ;;  %v8368_v53 = vcombine.low %v7122_v6, %v7122_v6 }
0x114e   : > { %6663 = vmatpush1.bf16.msra.mxu0 %v9816_v60  ;;  %v7169_v60 = vsel %vm3165_vm14, %v8368_v53, 0 }
0x114f   : > { %6664 = vmatprep.subr.bf16.mxu0 %v9824_v8  ;;  %v9877_v8 = vld [vmem:[#allocation47 + $0x268] ss:$12 sps:$4 sm:$0xff]  }
0x1152   : > { %6665 = vmatpush1.bf16.msra.mxu0 %v9822_v12  ;;  %v9875_v12 = vld [vmem:[#allocation47 + $0x264] ss:$12 sps:$4 sm:$0xff]  }
0x1153   : > { %6666 = vmatprep.subr.bf16.mxu0 %v9830_v59  ;;  %v9883_v59 = vld [vmem:[#allocation47 + $0x250] ss:$12 sps:$4 sm:$0xff]  }
0x1156   : > { %6667 = vmatpush1.bf16.msra.mxu0 %v9828_v14  ;;  %v9881_v14 = vld [vmem:[#allocation47 + $0x24c] ss:$12 sps:$4 sm:$0xff]  }
0x1157   : > { %6668 = vmatprep.subr.bf16.mxu0 %v9836_v15  ;;  %v9889_v15 = vld [vmem:[#allocation47 + $0x238] ss:$12 sps:$4 sm:$0xff]  }
0x115a   : > { %6669 = vmatpush1.bf16.msra.mxu0 %v9834_v17  ;;  %v9887_v17 = vld [vmem:[#allocation47 + $0x234] ss:$12 sps:$4 sm:$0xff]  }
0x115b   : > { %8334 = vmatprep.subr.msk.bf16.mxu0 %vm3165_vm14, %v8333_v22  ;;  %v7330_v22 = vld [vmem:[#allocation47 + $0x354] sm:$0x33] }
0x1209   : > { %v6576_v26 = vpop.f32.mrf.mxu0 }
0x120a   : > { %v6577_v36 = vadd.f32 %v6576_v26, %v6524_v35  ;;  %v9893_v26 = vld [vmem:[#allocation47 + $0x21c] ss:$12 sps:$4 sm:$0xff]  }
0x120b   : > { %v9215_v27 = vpop.f32.mrf.mxu0  ;;  %v9900_v35 = vld [vmem:[#allocation47 + $0x2d0] ss:$12 sps:$4 sm:$0xff]  }
0x120c   : > { %v8381_v27 = vcombine.high %v7226_v21, %v7226_v21 }
0x120d   : > { %v6579_v30 = vpop.f32.mrf.mxu0 }
0x120e   : > { %v6580_v31 = vadd.f32 %v6579_v30, %v6529_v29  ;;  %v8393_v29 = vcombine.high %v7330_v22, %v7330_v22  ;;  %v8380_v30 = vcombine.low %v7226_v21, %v7226_v21 }
0x120f   : > { %v9216_v9 = vpop.f32.mrf.mxu0 }
0x1210   : > { %v8299_v32 = vmul.f32 -1.442695, %v6580_v31  ;;  %v8392_v31 = vcombine.low %v7330_v22, %v7330_v22  ;;  %v7273_v9 = vsel %vm3165_vm14, %v8380_v30, 0 }
0x1212   : > { %9988 = vpow2.f32 %v8299_v32  ;;  %v7377_v32 = vsel %vm3165_vm14, %v8392_v31, 0 }
0x121f   : > { %v9989_v33 = vpop.eup %9988 }
0x1220   : > { %v6586_v34 = vadd.f32 1.0, %v9989_v33  ;;  %v9902_v33 = vld [vmem:[#allocation47 + $0x2d4] ss:$12 sps:$4 sm:$0xff]  }
0x1222   : > { %9990 = vrcp.f32 %v6586_v34  ;;  %v9905_v34 = vld [vmem:[#allocation47 + $0x340] ss:$12 sps:$4 sm:$0xff]  }
0x122f   : > { %v9991_v39 = vpop.eup %9990 }
0x1230   : > { %v6589_v41 = vmul.f32 %v9991_v39, %v6577_v36  ;;  %v9903_v36 = vld [vmem:[#allocation47 + $0x33c] ss:$12 sps:$4 sm:$0xff]   ;;  %v9906_v39 = vld [vmem:[#allocation47 + $0x2b8] ss:$12 sps:$4 sm:$0xff]  }
0x1232   : > { %v11881_v42 = vpack.c.bf16 %v6589_v41, %v6589_v41  ;;  %v9909_v41 = vld [vmem:[#allocation47 + $0x324] ss:$12 sps:$4 sm:$0xff]  }
0x1234   : > { %8311 = vmatmul.mubr.msk.bf16.vlgmr.msra.gmra.mxu0 %vm3161_vm15, %v11881_v42  ;;  %8323 = vmatmul.mubr.msk.bf16.vlgmr.msra.gmra.mxu1 %vm3161_vm15, %v11881_v42 }
0x1235   : > { %6869 = vmatpush1.bf16.msra.mxu0 %v6857_v43  ;;  %6973 = vmatpush1.bf16.msra.mxu1 %v6961_v44  ;;  %v9914_v43 = vld [vmem:[#allocation47 + $0x2a4] ss:$12 sps:$4 sm:$0xff]  }
0x1236   : > { %6870 = vmatprep.subr.bf16.mxu0 %v9846_v45  ;;  %6974 = vmatprep.subr.bf16.mxu1 %v9849_v47  ;;  %v9917_v44 = vld [vmem:[#allocation47 + $0x310] ss:$12 sps:$4 sm:$0xff]   ;;  %v9912_v45 = vld [vmem:[#allocation47 + $0x2a0] ss:$12 sps:$4 sm:$0xff]  }
0x1237   : > { %6894 = vmatprep.mubr.bf16.mxu0 %v10942_v46  ;;  %6998 = vmatprep.mubr.bf16.mxu1 %v10942_v46  ;;  %v9915_v47 = vld [vmem:[#allocation47 + $0x30c] ss:$12 sps:$4 sm:$0xff]  }
0x1239   : > { %6871 = vmatpush1.bf16.msra.mxu0 %v9844_v50  ;;  %6975 = vmatpush1.bf16.msra.mxu1 %v9847_v51  ;;  %v9920_v50 = vld [vmem:[#allocation47 + $0x28c] ss:$12 sps:$4 sm:$0xff]  }
0x123a   : > { %6872 = vmatprep.subr.bf16.mxu0 %v9852_v52  ;;  %6976 = vmatprep.subr.bf16.mxu1 %v9855_v40  ;;  %v9923_v51 = vld [vmem:[#allocation47 + $0x2f8] ss:$12 sps:$4 sm:$0xff]   ;;  %v9918_v52 = vld [vmem:[#allocation47 + $0x288] ss:$12 sps:$4 sm:$0xff]  }
0x123b   : > { %v9921_v40 = vld [vmem:[#allocation47 + $0x2f4] ss:$12 sps:$4 sm:$0xff]  }
0x123d   : > { %6873 = vmatpush1.bf16.msra.mxu0 %v9850_v24  ;;  %6977 = vmatpush1.bf16.msra.mxu1 %v9853_v25 }
0x123e   : > { %6874 = vmatprep.subr.bf16.mxu0 %v9858_v54  ;;  %6978 = vmatprep.subr.bf16.mxu1 %v9861_v48 }
0x1241   : > { %6875 = vmatpush1.bf16.msra.mxu0 %v9856_v10  ;;  %6979 = vmatpush1.bf16.msra.mxu1 %v9859_v63 }
0x1242   : > { %6876 = vmatprep.subr.bf16.mxu0 %v9864_v62  ;;  %6980 = vmatprep.subr.bf16.mxu1 %v9867_v49 }
0x1245   : > { %6877 = vmatpush1.bf16.msra.mxu0 %v9862_v0  ;;  %6981 = vmatpush1.bf16.msra.mxu1 %v9865_v55 }
0x1246   : > { %8358 = vmatprep.subr.msk.bf16.mxu0 %vm3165_vm14, %v8357_v58  ;;  %8370 = vmatprep.subr.msk.bf16.mxu1 %vm3165_vm14, %v8369_v18 }
0x1248   : > { %8335 = vmatmul.mubr.msk.bf16.vlgmr.msra.gmra.mxu0 %vm3161_vm15, %v11881_v42  ;;  %8347 = vmatmul.mubr.msk.bf16.vlgmr.msra.gmra.mxu1 %vm3161_vm15, %v11881_v42 }
0x1249   : > { %7077 = vmatpush1.bf16.msra.mxu0 %v7065_v57  ;;  %7181 = vmatpush1.bf16.msra.mxu1 %v7169_v60 }
0x124a   : > { %7078 = vmatprep.subr.bf16.mxu0 %v9874_v7  ;;  %7182 = vmatprep.subr.bf16.mxu1 %v9877_v8 }
0x124b   : > { %7102 = vmatprep.mubr.bf16.mxu0 %v10942_v46  ;;  %7206 = vmatprep.mubr.bf16.mxu1 %v10942_v46 }
0x124d   : > { %7079 = vmatpush1.bf16.msra.mxu0 %v9872_v11  ;;  %7183 = vmatpush1.bf16.msra.mxu1 %v9875_v12 }
0x124e   : > { %7080 = vmatprep.subr.bf16.mxu0 %v9880_v28  ;;  %7184 = vmatprep.subr.bf16.mxu1 %v9883_v59 }
0x1251   : > { %7081 = vmatpush1.bf16.msra.mxu0 %v9878_v13  ;;  %7185 = vmatpush1.bf16.msra.mxu1 %v9881_v14 }
0x1252   : > { %7082 = vmatprep.subr.bf16.mxu0 %v9886_v4  ;;  %7186 = vmatprep.subr.bf16.mxu1 %v9889_v15 }
0x1255   : > { %7083 = vmatpush1.bf16.msra.mxu0 %v9884_v16  ;;  %7187 = vmatpush1.bf16.msra.mxu1 %v9887_v17 }
0x1256   : > { %7084 = vmatprep.subr.bf16.mxu0 %v9892_v19  ;;  %7188 = vmatprep.subr.bf16.mxu1 %v9895_v20 }
0x1259   : > { %7085 = vmatpush1.bf16.msra.mxu0 %v9890_v23  ;;  %7189 = vmatpush1.bf16.msra.mxu1 %v9893_v26 }
0x125a   : > { %8382 = vmatprep.subr.msk.bf16.mxu0 %vm3165_vm14, %v8381_v27  ;;  %8394 = vmatprep.subr.msk.bf16.mxu1 %vm3165_vm14, %v8393_v29 }
0x125c   : > { %8359 = vmatmul.mubr.msk.bf16.vlgmr.msra.gmra.mxu0 %vm3161_vm15, %v11881_v42  ;;  %8371 = vmatmul.mubr.msk.bf16.vlgmr.msra.gmra.mxu1 %vm3161_vm15, %v11881_v42 }
0x125d   : > { %7285 = vmatpush1.bf16.msra.mxu0 %v7273_v9  ;;  %7389 = vmatpush1.bf16.msra.mxu1 %v7377_v32 }
0x125e   : > { %7286 = vmatprep.subr.bf16.mxu0 %v9902_v33  ;;  %7390 = vmatprep.subr.bf16.mxu1 %v9905_v34 }
0x125f   : > { %7310 = vmatprep.mubr.bf16.mxu0 %v10942_v46  ;;  %7414 = vmatprep.mubr.bf16.mxu1 %v10942_v46 }
0x1261   : > { %7287 = vmatpush1.bf16.msra.mxu0 %v9900_v35  ;;  %7391 = vmatpush1.bf16.msra.mxu1 %v9903_v36 }
0x1262   : > { %7288 = vmatprep.subr.bf16.mxu0 %v9908_v37  ;;  %7392 = vmatprep.subr.bf16.mxu1 %v9911_v38 }
0x1265   : > { %7289 = vmatpush1.bf16.msra.mxu0 %v9906_v39  ;;  %7393 = vmatpush1.bf16.msra.mxu1 %v9909_v41 }
0x1266   : > { %7290 = vmatprep.subr.bf16.mxu0 %v9914_v43  ;;  %7394 = vmatprep.subr.bf16.mxu1 %v9917_v44 }
0x1269   : > { %7291 = vmatpush1.bf16.msra.mxu0 %v9912_v45  ;;  %7395 = vmatpush1.bf16.msra.mxu1 %v9915_v47 }
0x126a   : > { %7292 = vmatprep.subr.bf16.mxu0 %v9920_v50  ;;  %7396 = vmatprep.subr.bf16.mxu1 %v9923_v51 }
0x126d   : > { %7293 = vmatpush1.bf16.msra.mxu0 %v9918_v52  ;;  %7397 = vmatpush1.bf16.msra.mxu1 %v9921_v40 }
0x1270   : > { %8383 = vmatmul.mubr.msk.bf16.vlgmr.msra.gmra.mxu0 %vm3161_vm15, %v11881_v42  ;;  %8395 = vmatmul.mubr.msk.bf16.vlgmr.msra.gmra.mxu1 %vm3161_vm15, %v11881_v42 }
0x1271   : > { %7519 = vmatprep.mubr.bf16.mxu0 %v10942_v46 }
0x12f4   : > { %v6688_v24 = vpop.f32.mrf.mxu0  ;;  %v6792_v25 = vpop.f32.mrf.mxu1 }
0x12f5   : > { %v6799_v54 = vpack.c.bf16 %v6792_v25, %v6792_v25  ;;  %v6695_v63 = vpack.c.bf16 %v6688_v24, %v6688_v24 }
0x12f6   : > { %v6690_v48 = vpop.f32.mrf.mxu0  ;;  %v6794_v10 = vpop.f32.mrf.mxu1 }
0x12f7   : > { %v7427_v62 = vrot.slane %v6799_v54, 4  ;;  %v6800_v49 = vpack.c.bf16 %v6794_v10, %v6794_v10  ;;  %v6696_v0 = vpack.c.bf16 %v6690_v48, %v6690_v48  ;;  %v7473_v10 = vld [vmem:[%s11126_s9] sm:$0x1] }
0x12f8   : > { %v6692_v5 = vpop.f32.mrf.mxu0  ;;  %v6796_v6 = vpop.f32.mrf.mxu1 }
0x12f9   : > { %v7428_v55 = vrot.slane %v6800_v49, 4  ;;  %v7443_v58 = vsel %vm3005_vm12, %v6695_v63, %v7427_v62  ;;  %v7478_v63 = vpop.permute.xlu1 %7477  ;;  %v10946_v62 = vmov 1966171168  }
0x12fa   : > { %v6693_v18 = vpop.f32.mrf.mxu0  ;;  %v6797_v56 = vpop.f32.mrf.mxu1  ;;  %v7534_v49 = vunpack.c.l.s4 %v10946_v62  ;;  %v7483_v5 = vrot.slane %v7478_v63, %v11482_v3 }
0x12fb   : > { %v7447_v42 = vsel %vm3005_vm12, %v6696_v0, %v7428_v55 }
0x12fc   : > { %v7535_v55 = vunpack.c.0.s8 %v7534_v49 }
0x1308   : > { %v6896_v53 = vpop.f32.mrf.mxu0  ;;  %v7000_v46 = vpop.f32.mrf.mxu1 }
0x1309   : > { %v7007_v43 = vpack.c.bf16 %v7000_v46, %v7000_v46  ;;  %v6903_v54 = vpack.c.bf16 %v6896_v53, %v6896_v53  ;;  %v7538_v46 = vsub.s32 %v7535_v55, %v11479_v2 }
0x130a   : > { %v6898_v57 = vpop.f32.mrf.mxu0  ;;  %v7002_v60 = vpop.f32.mrf.mxu1 }
0x130b   : > { %v7008_v32 = vpack.c.bf16 %v7002_v60, %v7002_v60  ;;  %v6904_v52 = vpack.c.bf16 %v6898_v57, %v6898_v57  ;;  %v7431_v40 = vrot.slane %v7007_v43, 4 }
0x130c   : > { %v6900_v7 = vpop.f32.mrf.mxu0  ;;  %v7004_v8 = vpop.f32.mrf.mxu1 }
0x130d   : > { %v7432_v47 = vrot.slane %v7008_v32, 4  ;;  %v7451_v48 = vsel %vm3005_vm12, %v6903_v54, %v7431_v40 }
0x130e   : > { %v6901_v11 = vpop.f32.mrf.mxu0  ;;  %v7005_v12 = vpop.f32.mrf.mxu1 }
0x130f   : > { %v7455_v25 = vsel %vm3005_vm12, %v6904_v52, %v7432_v47 }
0x131c   : > { %v7104_v28 = vpop.f32.mrf.mxu0  ;;  %v7208_v59 = vpop.f32.mrf.mxu1 }
0x131d   : > { %v7215_v29 = vpack.c.bf16 %v7208_v59, %v7208_v59  ;;  %v7111_v51 = vpack.c.bf16 %v7104_v28, %v7104_v28 }
0x131e   : > { %v7106_v13 = vpop.f32.mrf.mxu0  ;;  %v7210_v14 = vpop.f32.mrf.mxu1 }
0x131f   : > { %v7216_v21 = vpack.c.bf16 %v7210_v14, %v7210_v14  ;;  %v7112_v39 = vpack.c.bf16 %v7106_v13, %v7106_v13  ;;  %v7435_v44 = vrot.slane %v7215_v29, 4 }
0x1320   : > { %v7108_v4 = vpop.f32.mrf.mxu0  ;;  %v7212_v15 = vpop.f32.mrf.mxu1 }
0x1321   : > { %v7436_v33 = vrot.slane %v7216_v21, 4  ;;  %v7459_v24 = vsel %vm3005_vm12, %v7111_v51, %v7435_v44 }
0x1322   : > { %v7109_v16 = vpop.f32.mrf.mxu0  ;;  %v7213_v17 = vpop.f32.mrf.mxu1 }
0x1323   : > { %v7463_v50 = vsel %vm3005_vm12, %v7112_v39, %v7436_v33 }
0x1330   : > { %v7312_v19 = vpop.f32.mrf.mxu0  ;;  %v7416_v20 = vpop.f32.mrf.mxu1 }
0x1331   : > { %v7423_v22 = vpack.c.bf16 %v7416_v20, %v7416_v20  ;;  %v7319_v36 = vpack.c.bf16 %v7312_v19, %v7312_v19 }
0x1332   : > { %v7314_v23 = vpop.f32.mrf.mxu0  ;;  %v7418_v26 = vpop.f32.mrf.mxu1 }
0x1333   : > { %v7424_v27 = vpack.c.bf16 %v7418_v26, %v7418_v26  ;;  %v7439_v30 = vrot.slane %v7423_v22, 4  ;;  %v7320_v34 = vpack.c.bf16 %v7314_v23, %v7314_v23 }
0x1334   : > { %v7316_v31 = vpop.f32.mrf.mxu0  ;;  %v7420_v9 = vpop.f32.mrf.mxu1 }
0x1335   : > { %v7440_v35 = vrot.slane %v7424_v27, 4  ;;  %v7467_v45 = vsel %vm3005_vm12, %v7319_v36, %v7439_v30 }
0x1336   : > { %v7317_v37 = vpop.f32.mrf.mxu0  ;;  %v7421_v38 = vpop.f32.mrf.mxu1 }
0x1337   : > { %v7471_v41 = vsel %vm3005_vm12, %v7320_v34, %v7440_v35 }
0x1338   : > { %7495 = vmatprep.subr.bf16.mxu0 %v7471_v41 }
0x1339   : > { %7496 = vmatpush1.bf16.msra.mxu0 %v7467_v45 }
0x133a   : > { %7497 = vmatprep.subr.bf16.mxu0 %v7463_v50 }
0x133d   : > { %7498 = vmatpush1.bf16.msra.mxu0 %v7459_v24 }
0x133e   : > { %7499 = vmatprep.subr.bf16.mxu0 %v7455_v25 }
0x1341   : > { %7500 = vmatpush1.bf16.msra.mxu0 %v7451_v48 }
0x1342   : > { %7501 = vmatprep.subr.bf16.mxu0 %v7447_v42 }
0x1345   : > { %7502 = vmatpush1.bf16.msra.mxu0 %v7443_v58 }
0x1348   : > { %8396 = vmatmul.mubr.msk.bf16.vlgmr.msra.gmra.mxu0 %vm3820_vm1, %v7473_v10 }
0x1408   : > { %v7521_v6 = vpop.f32.mrf.mxu0 }
0x1409   : > { %v7522_v0 = vadd.f32 %v7521_v6, %v7483_v5 }
0x140a   : > { %v7523_v18 = vpop.f32.mrf.mxu0 }
0x140b   : > { %v7524_v56 = vadd.f32 %v7523_v18, %v7483_v5  ;;  %v7528_v58 = vmul.f32 %v7522_v0, %v11500_v61 }
0x140c   : > { %v7525_v53 = vpop.f32.mrf.mxu0 }
0x140d   : > { %v7529_v42 = vmul.f32 %v7524_v56, %v11500_v61 }
0x140e   : > { %v7526_v57 = vpop.f32.mrf.mxu0 }
0x140f   : > { %v7532_v60 = vcombine.low %v7528_v58, %v7529_v42 }
0x1411   : > { %v7539_v3 = vrot.slane %v7532_v60, %v7538_v46 }
0x1413   : > { %v7546_v7 = vrot.slane %v7539_v3, %v7538_v46 }
0x1415   : > { %7552 = vst.msk [vmem:[%s1502_s15] sm:$0x3] %vm7550_vm3, %v7546_v7 }
0x1416   : > { %10760 = shalt.err (!%p10757_p10)
}
0x1417   : > { %s10761_s2 = scalar_lea.hbm %s7566_s12, 32  ;;  %s10765_s22 = scalar_lea.hbm %s11134_s25, 64 }
0x1418   : > { %p10762_p7 = scmp.ne.s32.totalorder %s7566_s12, %s10761_s2  ;;  %p10766_p0 = scmp.lt.s32.totalorder %s7566_s12, %s11134_s25 }
0x1419   : > { %p10767_p13 = scmp.lt.s32.totalorder %s10765_s22, %s10761_s2 }
0x141a   : > { %p10763_p8 = pnand %p10762_p7, %p12070_p9 }
0x141b   : > { %p10768_p1 = por %p10767_p13, %p10766_p0 }
0x141c   : > { %p10764_p11 = pneg %p10763_p8 }
0x141e   : > { %p10769_p2 = pnand %p10768_p1, %p10764_p11 }
0x1420   : > { %10772 = shalt.err (!%p10769_p2)
}
0x1421   : > { %9333 = dma.vmem_to_hbm [thread:$0]  (%p12070_p9), %s7569_s21, 32, %s7566_s12, %s7554_s5  }
0x1422 PF: > { %s12071_s11 = sld [smem:[#allocation90_spill]]  ;;  %p9485_p12 = scmp.ge.s32.totalorder %s10867_s1, 2 }
0x1423   : > { %s12072_s26 = sld [smem:[#allocation94_spill]] }
0x1428   : > { %s7580_s7 = sand.u32 1, %s12071_s11  }
0x1429   : > { %p12073_p3 = scmp.ne.s32.totalorder %s12072_s26, 0  ;;  %s7581_s10 = scalar_lea.sflag [#allocation5], %s7580_s7 }
0x142b   : > { %p9424_p4 = pnand %p9485_p12, %p12073_p3 }
0x142d   : > { %p9425_p5 = pneg %p9424_p4 }
0x142f   : > { %10850 = dma.done.wait (%p9425_p5), %s7581_s10, 32  }
0x1430   : > { %10852 = vsyncadd (%p9425_p5), %s7581_s10, 4294967264  ;;  %s12074_s1 = sld [smem:[#allocation92_spill]]  ;;  %s12077_s0 = smov %s10859_s20 }
0x1431   : > { %s12075_s16 = sld [smem:[#allocation91_spill]] }
0x1432   : > { %s12076_s28 = sld [smem:[#allocation93_spill]] }
0x1436   : > { %p100_p6 = scmp.ge.s32.totalorder %s12074_s1, 4  }
0x1437   : > { %s12078_s20 = smov %s12075_s16 }
0x1438   :  { %102 = sbr.rel (!%p100_p6) target bundleno = 88 (0x58), region = 401 }
0x143d   :  { %7586 = vsyncpa [#allocation4], 1 }
0x143e   :  { %7588 = vsyncpa [#allocation4 + $0x1], 1 }
0x143f   :  { %7589 = vsyncpa [#allocation7], 1 }
0x1440   :  { %7590 = vsyncpa [#allocation10], 1 }
0x1441   :  { %7591 = vsyncpa [#allocation13], 1 }
0x1442   :  { %7592 = vsyncpa [#allocation16], 1 }
0x1443   :  { %7593 = vsyncpa [#allocation19], 1 }
0x1444   :  { %7594 = vsyncpa [#allocation22], 1 }
0x1445   :  { %7595 = vsyncpa [#allocation25], 1 }
0x1446   :  { %7596 = vsyncpa [#allocation28], 1 }
0x1447   :  { %7597 = vsyncpa [#allocation31], 1 }
0x1448   :  { %7598 = vsyncpa [#allocation34], 1 }
0x1449   :  { %7599 = vsyncpa [#allocation37], 1 }
0x144a   :  { %7600 = vsyncpa [#allocation40], 1 }
0x144b   :  { %7601 = vsyncpa [#allocation43], 1 }
0x144c   :  { %7602 = vsyncpa [#allocation46], 1 }
0x144d   :  { %7603 = vsyncpa [#allocation5], 1 }
0x144e   :  { %7605 = vsyncpa [#allocation5 + $0x1], 1 }

</bundles_post_ra>
